<compile_context>
chip_gen: v7x
topology: tpu7x:2x2x1
jax: 0.10.0
libtpu: 0.0.40
codegen_flags: <defaults>
</compile_context>

<pallas_src>
import functools

import numpy as np
import jax
import jax.numpy as jnp
from jax.experimental import pallas as pl
from jax.experimental.pallas import tpu as pltpu


# --------------------------- fused forward kernel ---------------------------
def _fused_kernel(emb_ref, wih_ref, whh_ref, b_ref,
                  ws1_w_ref, ws1_b_ref, ws2_w_ref, ws2_b_ref,
                  fc_w_ref, fc_b_ref,
                  out_ref, xseq_scr, flat_scr, *, B, T):
    H2 = whh_ref.shape[0]            # 2*hidden   ([fwd | bwd] lanes)
    H = H2 // 2
    G = whh_ref.shape[1]             # 8*hidden   (4 gates x [fwd | bwd])
    R2 = ws2_w_ref.shape[1]          # padded attention heads (32)

    # ---- (1) hoisted input projection: one matmul covers every step & direction.
    # emb_ref rows are time-major: row = t*B + b.
    gx = (jnp.dot(emb_ref[...], wih_ref[...], preferred_element_type=jnp.float32)
          + b_ref[...])                                        # [T*B, 8H]

    # In each 2H-wide gate block, the first H lanes are the fwd direction
    # (reads x[t]) and the last H lanes are the bwd direction (reads x[T-1-t]).
    lane = jax.lax.broadcasted_iota(jnp.int32, (1, G), 1)
    is_fwd = (lane % H2) < H

    whh = whh_ref[...]                                         # [2H, 8H] per-gate block-diag
    h2 = jnp.zeros((B, H2), jnp.float32)                       # [h_fwd | h_bwd]
    c2 = jnp.zeros((B, H2), jnp.float32)

    # ---- (2) fused fwd/bwd recurrence: T serial steps, one matmul each.
    # TODO(synk): use lax.fori_loop(..., unroll=k) + pl.ds stores if T grows large.
    for s in range(T):
        x_fwd = gx[s * B:(s + 1) * B, :]
        x_bwd = gx[(T - 1 - s) * B:(T - s) * B, :]
        gates = (jnp.where(is_fwd, x_fwd, x_bwd)
                 + jnp.dot(h2, whh, preferred_element_type=jnp.float32))
        gi = jax.nn.sigmoid(gates[:, 0 * H2:1 * H2])           # PyTorch gate order i,f,g,o
        gf = jax.nn.sigmoid(gates[:, 1 * H2:2 * H2])
        gg = jnp.tanh(gates[:, 2 * H2:3 * H2])
        go = jax.nn.sigmoid(gates[:, 3 * H2:4 * H2])
        c2 = gf * c2 + gi * gg
        h2 = go * jnp.tanh(c2)
        # scatter into the batch-major sequence buffer (VMEM scratch, stays on chip)
        for b in range(B):
            xseq_scr[b * T + s:b * T + s + 1, 0:H] = h2[b:b + 1, 0:H]
            xseq_scr[b * T + (T - 1 - s):b * T + (T - s), H:H2] = h2[b:b + 1, H:H2]

    # ---- (3) self attention: W_s2(tanh(W_s1(x))), softmax over the sequence axis.
    xf = xseq_scr[...]                                          # [B*T, 2H], row = b*T + t
    s1 = jnp.tanh(jnp.dot(xf, ws1_w_ref[...],
                          preferred_element_type=jnp.float32) + ws1_b_ref[...])
    s2 = jnp.dot(s1, ws2_w_ref[...],
                 preferred_element_type=jnp.float32) + ws2_b_ref[...]   # [B*T, R2]

    for b in range(B):
        sb = s2[b * T:(b + 1) * T, :]                           # [T, R2]
        m = jnp.max(sb, axis=0, keepdims=True)
        e = jnp.exp(sb - m)
        p = e / jnp.sum(e, axis=0, keepdims=True)               # softmax over T
        xb = xf[b * T:(b + 1) * T, :]                           # [T, 2H]
        hb = jax.lax.dot_general(p, xb, (((0,), (0,)), ((), ())),
                                 preferred_element_type=jnp.float32)    # [R2, 2H]
        # flatten head-major / hidden-minor into a lane-dense [1, R2*2H] row
        for r in range(R2):
            flat_scr[b:b + 1, r * H2:(r + 1) * H2] = hb[r:r + 1, :]

    # ---- (4) folded FC head on the lane-dense [B, R2*2H] slab.
    # fc_w = fc1_w @ fc2_w, fc_b = fc1_b @ fc2_w + fc2_b  (no activation between
    # the two Linear layers in the module, so this is the exact same function).
    flat = flat_scr[...]
    out_ref[...] = (jnp.dot(flat, fc_w_ref[...],
                            preferred_element_type=jnp.float32) + fc_b_ref[...])


def lstm_att_forward(text, KP, hidden_dim):
    """text: [B, T] int32 token ids; KP: packed/padded kernel params."""
    B, T = text.shape
    emb = KP['emb_table'][text]                                 # [B, T, E] gather (JAX glue)
    E = emb.shape[-1]
    emb2d = jnp.transpose(emb, (1, 0, 2)).reshape(T * B, E)     # time-major rows: t*B + b
    H2 = 2 * hidden_dim
    R2 = KP['ws2_w'].shape[1]
    out_pad = KP['fc_w'].shape[1]                               # lane-dense padded output
    out_size = KP['out_size']

    vmem = pl.BlockSpec(memory_space=pltpu.MemorySpace.VMEM)
    kernel = functools.partial(_fused_kernel, B=B, T=T)
    out = pl.pallas_call(
        kernel,
        out_shape=jax.ShapeDtypeStruct((B, out_pad), jnp.float32),
        in_specs=[vmem] * 10,
        out_specs=vmem,
        scratch_shapes=[pltpu.VMEM((B * T, H2), jnp.float32),       # lstm output seq
                        pltpu.VMEM((B, R2 * H2), jnp.float32)],     # lane-dense attn slab
        compiler_params=pltpu.CompilerParams(
            vmem_limit_bytes=32 * 1024 * 1024),
    )(emb2d, KP['wih'], KP['whh'], KP['b'],
      KP['ws1_w'], KP['ws1_b'], KP['ws2_w'], KP['ws2_b'],
      KP['fc_w'], KP['fc_b'])
    return out[:, :out_size]                                    # drop zero-padded lanes


# ------------------------------- parameters ---------------------------------
def init_base_params(key, vocab_size, emb_dim, hidden_dim, output_size, pad_idx):
    """PyTorch-layout (transposed for right-multiply) unpadded parameters."""
    ks = jax.random.split(key, 17)

    def u(k, shape, scale):
        return jax.random.uniform(k, shape, jnp.float32, -scale, scale)

    H, H2 = hidden_dim, 2 * hidden_dim
    s = 1.0 / np.sqrt(H)

    emb_table = jax.random.normal(ks[0], (vocab_size, emb_dim), jnp.float32) * 0.1
    emb_table = emb_table.at[pad_idx].set(0.0)                  # padding_idx row is zero

    wih_f = u(ks[1], (4 * H, emb_dim), s).T                     # [E, 4H]
    whh_f = u(ks[2], (4 * H, H), s).T                           # [H, 4H]
    b_f = (u(ks[3], (4 * H,), s) + u(ks[4], (4 * H,), s))[None, :]
    wih_b = u(ks[5], (4 * H, emb_dim), s).T
    whh_b = u(ks[6], (4 * H, H), s).T
    b_b = (u(ks[7], (4 * H,), s) + u(ks[8], (4 * H,), s))[None, :]

    ws1_w = u(ks[9], (350, H2), 1 / np.sqrt(H2)).T              # [2H, 350]
    ws1_b = u(ks[10], (350,), 1 / np.sqrt(H2))[None, :]
    ws2_w = u(ks[11], (30, 350), 1 / np.sqrt(350)).T            # [350, 30]
    ws2_b = u(ks[12], (30,), 1 / np.sqrt(350))[None, :]

    fc1_w = u(ks[13], (2000, 30 * H2), 1 / np.sqrt(30 * H2)).T  # [30*2H, 2000]
    fc1_b = u(ks[14], (2000,), 1 / np.sqrt(30 * H2))[None, :]
    fc2_w = u(ks[15], (output_size, 2000), 1 / np.sqrt(2000)).T # [2000, out]
    fc2_b = u(ks[16], (output_size,), 1 / np.sqrt(2000))[None, :]

    return dict(emb_table=emb_table,
                wih_f=wih_f, whh_f=whh_f, b_f=b_f,
                wih_b=wih_b, whh_b=whh_b, b_b=b_b,
                ws1_w=ws1_w, ws1_b=ws1_b, ws2_w=ws2_w, ws2_b=ws2_b,
                fc1_w=fc1_w, fc1_b=fc1_b, fc2_w=fc2_w, fc2_b=fc2_b)


def pack_params(bp, hidden_dim):
    """Pack fwd/bwd LSTM weights for the fused recurrence, fold the two FC
    linears (exact: no activation between them), and zero-pad to lane sizes."""
    H, H2 = hidden_dim, 2 * hidden_dim
    R1P, R2P = 384, 32

    def interleave(wf, wb):
        # per-gate [fwd(H) | bwd(H)] lane blocks -> [..., 8H]
        parts = []
        for k in range(4):
            parts.append(wf[..., k * H:(k + 1) * H])
            parts.append(wb[..., k * H:(k + 1) * H])
        return jnp.concatenate(parts, axis=-1)

    wih = interleave(bp['wih_f'], bp['wih_b'])                  # [E, 8H]
    b = interleave(bp['b_f'], bp['b_b'])                        # [1, 8H]

    zh = jnp.zeros((H, H), jnp.float32)
    parts = []
    for k in range(4):
        parts.append(jnp.concatenate([bp['whh_f'][:, k * H:(k + 1) * H], zh], axis=0))
        parts.append(jnp.concatenate([zh, bp['whh_b'][:, k * H:(k + 1) * H]], axis=0))
    whh = jnp.concatenate(parts, axis=-1)                       # [2H, 8H] per-gate block-diag

    def pad2(a, rows, cols):
        return jnp.pad(a, ((0, rows - a.shape[0]), (0, cols - a.shape[1])))

    ws1_w = pad2(bp['ws1_w'], H2, R1P)
    ws1_b = pad2(bp['ws1_b'], 1, R1P)
    ws2_w = pad2(bp['ws2_w'], R1P, R2P)
    ws2_b = pad2(bp['ws2_b'], 1, R2P)

    # Fold Linear(30*2H -> 2000) . Linear(2000 -> out) once at pack time.
    fc12_w = bp['fc1_w'] @ bp['fc2_w']                          # [30*2H, out]
    fc12_b = bp['fc1_b'] @ bp['fc2_w'] + bp['fc2_b']            # [1, out]
    out_size = int(fc12_w.shape[1])
    out_pad = max(128, ((out_size + 127) // 128) * 128)         # lane-dense output
    # Zero rows for the padded attention heads (30,31) kill their contribution,
    # so the head padding stays mathematically exact.
    fc_w = pad2(fc12_w, R2P * H2, out_pad)
    fc_b = pad2(fc12_b, 1, out_pad)

    return dict(emb_table=bp['emb_table'], wih=wih, whh=whh, b=b,
                ws1_w=ws1_w, ws1_b=ws1_b, ws2_w=ws2_w, ws2_b=ws2_b,
                fc_w=fc_w, fc_b=fc_b, out_size=out_size)


# ----------------------------- pure-JAX reference ---------------------------
def reference_forward(text, P, hidden_dim):
    emb = P['emb_table'][text]
    x = jnp.transpose(emb, (1, 0, 2))
    T, B, _ = x.shape
    H = hidden_dim

    def run(wih, whh, b, reverse):
        h = jnp.zeros((B, H)); c = jnp.zeros((B, H))
        outs = []
        ts = range(T - 1, -1, -1) if reverse else range(T)
        for t in ts:
            g = x[t] @ wih + h @ whh + b
            i = jax.nn.sigmoid(g[:, :H]); f = jax.nn.sigmoid(g[:, H:2 * H])
            gg = jnp.tanh(g[:, 2 * H:3 * H]); o = jax.nn.sigmoid(g[:, 3 * H:])
            c = f * c + i * gg
            h = o * jnp.tanh(c)
            outs.append(h)
        if reverse:
            outs = outs[::-1]
        return jnp.stack(outs)

    fwd = run(P['wih_f'], P['whh_f'], P['b_f'], False)
    bwd = run(P['wih_b'], P['whh_b'], P['b_b'], True)
    out = jnp.transpose(jnp.concatenate([fwd, bwd], -1), (1, 0, 2))   # [B,T,2H]
    s1 = jnp.tanh(out @ P['ws1_w'] + P['ws1_b'])
    s2 = s1 @ P['ws2_w'] + P['ws2_b']                                  # [B,T,30]
    attn = jax.nn.softmax(jnp.transpose(s2, (0, 2, 1)), axis=2)        # [B,30,T]
    hidden = jnp.einsum('bnt,btc->bnc', attn, out)                     # [B,30,2H]
    flat = hidden.reshape(out.shape[0], -1)
    return (flat @ P['fc1_w'] + P['fc1_b']) @ P['fc2_w'] + P['fc2_b']


if __name__ == "__main__":
    B, S = 2, 8
    vocab_size, emb_dim, hidden_dim, output_size, pad_idx = 50, 32, 32, 3, 0

    key = jax.random.PRNGKey(0)
    pkey, tkey = jax.random.split(key)
    base = init_base_params(pkey, vocab_size, emb_dim, hidden_dim, output_size, pad_idx)
    packed = pack_params(base, hidden_dim)
    text = jax.random.randint(tkey, (B, S), 0, vocab_size, dtype=jnp.int32)

    out = jax.block_until_ready(lstm_att_forward(text, packed, hidden_dim))
    ref = jax.block_until_ready(reference_forward(text, base, hidden_dim))

    assert out.shape == (B, output_size)
    np.testing.assert_allclose(np.asarray(out), np.asarray(ref), rtol=2e-4, atol=2e-4)
    print("KERNEL_OK")
</pallas_src>

<mosaic_0001>
module attributes {stable_mosaic.version = 11 : i64} {
  func.func @_fused_kernel(%arg0: memref<16x32xf32, #tpu.memory_space<vmem>>, %arg1: memref<32x256xf32, #tpu.memory_space<vmem>>, %arg2: memref<64x256xf32, #tpu.memory_space<vmem>>, %arg3: memref<1x256xf32, #tpu.memory_space<vmem>>, %arg4: memref<64x384xf32, #tpu.memory_space<vmem>>, %arg5: memref<1x384xf32, #tpu.memory_space<vmem>>, %arg6: memref<384x32xf32, #tpu.memory_space<vmem>>, %arg7: memref<1x32xf32, #tpu.memory_space<vmem>>, %arg8: memref<2048x128xf32, #tpu.memory_space<vmem>>, %arg9: memref<1x128xf32, #tpu.memory_space<vmem>>, %arg10: memref<2x128xf32, #tpu.memory_space<vmem>>, %arg11: memref<16x64xf32, #tpu.memory_space<vmem>>, %arg12: memref<2x2048xf32, #tpu.memory_space<vmem>>) attributes {dimension_semantics = [], scalar_prefetch = 0 : i64, scratch_operands = 2 : i64, tpu.core_type = #tpu.core_type<tc>} {
    %c0 = arith.constant 0 : index
    %c0_0 = arith.constant 0 : index
    %0 = vector.load %arg0[%c0, %c0_0] : memref<16x32xf32, #tpu.memory_space<vmem>>, vector<16x32xf32>
    %c0_1 = arith.constant 0 : index
    %c0_2 = arith.constant 0 : index
    %1 = vector.load %arg1[%c0_1, %c0_2] : memref<32x256xf32, #tpu.memory_space<vmem>>, vector<32x256xf32>
    %cst = arith.constant dense<0.000000e+00> : vector<16x256xf32>
    %2 = tpu.matmul %0, %1, %cst {dimension_numbers = #tpu.dot_dimension_numbers<[1], [0], [0], [1], [0, 0, 1, 1], [], []>} : vector<16x32xf32>, vector<32x256xf32>, vector<16x256xf32> -> vector<16x256xf32>
    %c0_3 = arith.constant 0 : index
    %c0_4 = arith.constant 0 : index
    %3 = vector.load %arg3[%c0_3, %c0_4] : memref<1x256xf32, #tpu.memory_space<vmem>>, vector<1x256xf32>
    %4 = vector.broadcast %3 : vector<1x256xf32> to vector<16x256xf32>
    %5 = arith.addf %2, %4 : vector<16x256xf32>
    %6 = tpu.iota {dimensions = array<i32: 1>} : vector<1x256xi32>
    %c64_i32 = arith.constant 64 : i32
    %c0_i32 = arith.constant 0 : i32
    %7 = arith.cmpi eq, %c64_i32, %c0_i32 : i32
    %c1_i32 = arith.constant 1 : i32
    %8 = arith.select %7, %c1_i32, %c64_i32 : i32
    %9 = vector.broadcast %8 : i32 to vector<1x256xi32>
    %10 = arith.remsi %6, %9 : vector<1x256xi32>
    %c0_i32_5 = arith.constant 0 : i32
    %11 = vector.broadcast %c0_i32_5 : i32 to vector<1x256xi32>
    %12 = arith.cmpi ne, %10, %11 : vector<1x256xi32>
    %c0_i32_6 = arith.constant 0 : i32
    %13 = vector.broadcast %c0_i32_6 : i32 to vector<1x256xi32>
    %14 = arith.cmpi slt, %10, %13 : vector<1x256xi32>
    %c0_i32_7 = arith.constant 0 : i32
    %15 = arith.cmpi slt, %8, %c0_i32_7 : i32
    %16 = vector.broadcast %15 : i1 to vector<1x256xi1>
    %17 = vector.broadcast %16 : vector<1x256xi1> to vector<1x256xi1>
    %18 = arith.xori %14, %17 : vector<1x256xi1>
    %19 = arith.andi %18, %12 : vector<1x256xi1>
    %20 = vector.broadcast %8 : i32 to vector<1x256xi32>
    %21 = arith.addi %10, %20 : vector<1x256xi32>
    %22 = arith.select %19, %21, %10 : vector<1x256xi1>, vector<1x256xi32>
    %c32_i32 = arith.constant 32 : i32
    %23 = vector.broadcast %c32_i32 : i32 to vector<1x256xi32>
    %24 = arith.cmpi slt, %22, %23 : vector<1x256xi32>
    %c0_8 = arith.constant 0 : index
    %c0_9 = arith.constant 0 : index
    %25 = vector.load %arg2[%c0_8, %c0_9] : memref<64x256xf32, #tpu.memory_space<vmem>>, vector<64x256xf32>
    %cst_10 = arith.constant 0.000000e+00 : f32
    %26 = vector.broadcast %cst_10 : f32 to vector<2x64xf32>
    %cst_11 = arith.constant 0.000000e+00 : f32
    %27 = vector.broadcast %cst_11 : f32 to vector<2x64xf32>
    %28 = vector.extract_strided_slice %5 {offsets = [0, 0], sizes = [2, 256], strides = [1, 1]} : vector<16x256xf32> to vector<2x256xf32>
    %29 = vector.extract_strided_slice %5 {offsets = [14, 0], sizes = [2, 256], strides = [1, 1]} : vector<16x256xf32> to vector<2x256xf32>
    %30 = vector.shape_cast %24 : vector<1x256xi1> to vector<1x256xi1>
    %31 = vector.broadcast %30 : vector<1x256xi1> to vector<2x256xi1>
    %32 = arith.select %31, %28, %29 : vector<2x256xi1>, vector<2x256xf32>
    %cst_12 = arith.constant dense<0.000000e+00> : vector<2x256xf32>
    %33 = tpu.matmul %26, %25, %cst_12 {dimension_numbers = #tpu.dot_dimension_numbers<[1], [0], [0], [1], [0, 0, 1, 1], [], []>} : vector<2x64xf32>, vector<64x256xf32>, vector<2x256xf32> -> vector<2x256xf32>
    %34 = arith.addf %32, %33 : vector<2x256xf32>
    %35 = vector.extract_strided_slice %34 {offsets = [0, 0], sizes = [2, 64], strides = [1, 1]} : vector<2x256xf32> to vector<2x64xf32>
    %36 = arith.negf %35 : vector<2x64xf32>
    %37 = math.exp %36 : vector<2x64xf32>
    %cst_13 = arith.constant 1.000000e+00 : f32
    %38 = vector.broadcast %cst_13 : f32 to vector<2x64xf32>
    %39 = arith.addf %38, %37 : vector<2x64xf32>
    %40 = arith.divf %38, %39 : vector<2x64xf32>
    %41 = vector.extract_strided_slice %34 {offsets = [0, 64], sizes = [2, 64], strides = [1, 1]} : vector<2x256xf32> to vector<2x64xf32>
    %42 = arith.negf %41 : vector<2x64xf32>
    %43 = math.exp %42 : vector<2x64xf32>
    %cst_14 = arith.constant 1.000000e+00 : f32
    %44 = vector.broadcast %cst_14 : f32 to vector<2x64xf32>
    %45 = arith.addf %44, %43 : vector<2x64xf32>
    %46 = arith.divf %44, %45 : vector<2x64xf32>
    %47 = vector.extract_strided_slice %34 {offsets = [0, 128], sizes = [2, 64], strides = [1, 1]} : vector<2x256xf32> to vector<2x64xf32>
    %48 = math.tanh %47 : vector<2x64xf32>
    %49 = vector.extract_strided_slice %34 {offsets = [0, 192], sizes = [2, 64], strides = [1, 1]} : vector<2x256xf32> to vector<2x64xf32>
    %50 = arith.negf %49 : vector<2x64xf32>
    %51 = math.exp %50 : vector<2x64xf32>
    %cst_15 = arith.constant 1.000000e+00 : f32
    %52 = vector.broadcast %cst_15 : f32 to vector<2x64xf32>
    %53 = arith.addf %52, %51 : vector<2x64xf32>
    %54 = arith.divf %52, %53 : vector<2x64xf32>
    %55 = arith.mulf %46, %27 : vector<2x64xf32>
    %56 = arith.mulf %40, %48 : vector<2x64xf32>
    %57 = arith.addf %55, %56 : vector<2x64xf32>
    %58 = math.tanh %57 : vector<2x64xf32>
    %59 = arith.mulf %54, %58 : vector<2x64xf32>
    %60 = vector.extract_strided_slice %59 {offsets = [0, 0], sizes = [1, 32], strides = [1, 1]} : vector<2x64xf32> to vector<1x32xf32>
    %c0_16 = arith.constant 0 : index
    %c0_17 = arith.constant 0 : index
    %61 = vector.load %arg11[%c0_16, %c0_17] : memref<16x64xf32, #tpu.memory_space<vmem>>, vector<1x32xf32>
    tpu.vector_store %arg11[%c0_16, %c0_17], %60 {strides = array<i32>} : memref<16x64xf32, #tpu.memory_space<vmem>>, vector<1x32xf32>,
    %62 = vector.extract_strided_slice %59 {offsets = [0, 32], sizes = [1, 32], strides = [1, 1]} : vector<2x64xf32> to vector<1x32xf32>
    %c7 = arith.constant 7 : index
    %c32 = arith.constant 32 : index
    %63 = vector.load %arg11[%c7, %c32] : memref<16x64xf32, #tpu.memory_space<vmem>>, vector<1x32xf32>
    tpu.vector_store %arg11[%c7, %c32], %62 {strides = array<i32>} : memref<16x64xf32, #tpu.memory_space<vmem>>, vector<1x32xf32>,
    %64 = vector.extract_strided_slice %59 {offsets = [1, 0], sizes = [1, 32], strides = [1, 1]} : vector<2x64xf32> to vector<1x32xf32>
    %c8 = arith.constant 8 : index
    %c0_18 = arith.constant 0 : index
    %65 = vector.load %arg11[%c8, %c0_18] : memref<16x64xf32, #tpu.memory_space<vmem>>, vector<1x32xf32>
    tpu.vector_store %arg11[%c8, %c0_18], %64 {strides = array<i32>} : memref<16x64xf32, #tpu.memory_space<vmem>>, vector<1x32xf32>,
    %66 = vector.extract_strided_slice %59 {offsets = [1, 32], sizes = [1, 32], strides = [1, 1]} : vector<2x64xf32> to vector<1x32xf32>
    %c15 = arith.constant 15 : index
    %c32_19 = arith.constant 32 : index
    %67 = vector.load %arg11[%c15, %c32_19] : memref<16x64xf32, #tpu.memory_space<vmem>>, vector<1x32xf32>
    tpu.vector_store %arg11[%c15, %c32_19], %66 {strides = array<i32>} : memref<16x64xf32, #tpu.memory_space<vmem>>, vector<1x32xf32>,
    %68 = vector.extract_strided_slice %5 {offsets = [2, 0], sizes = [2, 256], strides = [1, 1]} : vector<16x256xf32> to vector<2x256xf32>
    %69 = vector.extract_strided_slice %5 {offsets = [12, 0], sizes = [2, 256], strides = [1, 1]} : vector<16x256xf32> to vector<2x256xf32>
    %70 = vector.shape_cast %24 : vector<1x256xi1> to vector<1x256xi1>
    %71 = vector.broadcast %70 : vector<1x256xi1> to vector<2x256xi1>
    %72 = arith.select %71, %68, %69 : vector<2x256xi1>, vector<2x256xf32>
    %cst_20 = arith.constant dense<0.000000e+00> : vector<2x256xf32>
    %73 = tpu.matmul %59, %25, %cst_20 {dimension_numbers = #tpu.dot_dimension_numbers<[1], [0], [0], [1], [0, 0, 1, 1], [], []>} : vector<2x64xf32>, vector<64x256xf32>, vector<2x256xf32> -> vector<2x256xf32>
    %74 = arith.addf %72, %73 : vector<2x256xf32>
    %75 = vector.extract_strided_slice %74 {offsets = [0, 0], sizes = [2, 64], strides = [1, 1]} : vector<2x256xf32> to vector<2x64xf32>
    %76 = arith.negf %75 : vector<2x64xf32>
    %77 = math.exp %76 : vector<2x64xf32>
    %cst_21 = arith.constant 1.000000e+00 : f32
    %78 = vector.broadcast %cst_21 : f32 to vector<2x64xf32>
    %79 = arith.addf %78, %77 : vector<2x64xf32>
    %80 = arith.divf %78, %79 : vector<2x64xf32>
    %81 = vector.extract_strided_slice %74 {offsets = [0, 64], sizes = [2, 64], strides = [1, 1]} : vector<2x256xf32> to vector<2x64xf32>
    %82 = arith.negf %81 : vector<2x64xf32>
    %83 = math.exp %82 : vector<2x64xf32>
    %cst_22 = arith.constant 1.000000e+00 : f32
    %84 = vector.broadcast %cst_22 : f32 to vector<2x64xf32>
    %85 = arith.addf %84, %83 : vector<2x64xf32>
    %86 = arith.divf %84, %85 : vector<2x64xf32>
    %87 = vector.extract_strided_slice %74 {offsets = [0, 128], sizes = [2, 64], strides = [1, 1]} : vector<2x256xf32> to vector<2x64xf32>
    %88 = math.tanh %87 : vector<2x64xf32>
    %89 = vector.extract_strided_slice %74 {offsets = [0, 192], sizes = [2, 64], strides = [1, 1]} : vector<2x256xf32> to vector<2x64xf32>
    %90 = arith.negf %89 : vector<2x64xf32>
    %91 = math.exp %90 : vector<2x64xf32>
    %cst_23 = arith.constant 1.000000e+00 : f32
    %92 = vector.broadcast %cst_23 : f32 to vector<2x64xf32>
    %93 = arith.addf %92, %91 : vector<2x64xf32>
    %94 = arith.divf %92, %93 : vector<2x64xf32>
    %95 = arith.mulf %86, %57 : vector<2x64xf32>
    %96 = arith.mulf %80, %88 : vector<2x64xf32>
    %97 = arith.addf %95, %96 : vector<2x64xf32>
    %98 = math.tanh %97 : vector<2x64xf32>
    %99 = arith.mulf %94, %98 : vector<2x64xf32>
    %100 = vector.extract_strided_slice %99 {offsets = [0, 0], sizes = [1, 32], strides = [1, 1]} : vector<2x64xf32> to vector<1x32xf32>
    %c1 = arith.constant 1 : index
    %c0_24 = arith.constant 0 : index
    %101 = vector.load %arg11[%c1, %c0_24] : memref<16x64xf32, #tpu.memory_space<vmem>>, vector<1x32xf32>
    tpu.vector_store %arg11[%c1, %c0_24], %100 {strides = array<i32>} : memref<16x64xf32, #tpu.memory_space<vmem>>, vector<1x32xf32>,
    %102 = vector.extract_strided_slice %99 {offsets = [0, 32], sizes = [1, 32], strides = [1, 1]} : vector<2x64xf32> to vector<1x32xf32>
    %c6 = arith.constant 6 : index
    %c32_25 = arith.constant 32 : index
    %103 = vector.load %arg11[%c6, %c32_25] : memref<16x64xf32, #tpu.memory_space<vmem>>, vector<1x32xf32>
    tpu.vector_store %arg11[%c6, %c32_25], %102 {strides = array<i32>} : memref<16x64xf32, #tpu.memory_space<vmem>>, vector<1x32xf32>,
    %104 = vector.extract_strided_slice %99 {offsets = [1, 0], sizes = [1, 32], strides = [1, 1]} : vector<2x64xf32> to vector<1x32xf32>
    %c9 = arith.constant 9 : index
    %c0_26 = arith.constant 0 : index
    %105 = vector.load %arg11[%c9, %c0_26] : memref<16x64xf32, #tpu.memory_space<vmem>>, vector<1x32xf32>
    tpu.vector_store %arg11[%c9, %c0_26], %104 {strides = array<i32>} : memref<16x64xf32, #tpu.memory_space<vmem>>, vector<1x32xf32>,
    %106 = vector.extract_strided_slice %99 {offsets = [1, 32], sizes = [1, 32], strides = [1, 1]} : vector<2x64xf32> to vector<1x32xf32>
    %c14 = arith.constant 14 : index
    %c32_27 = arith.constant 32 : index
    %107 = vector.load %arg11[%c14, %c32_27] : memref<16x64xf32, #tpu.memory_space<vmem>>, vector<1x32xf32>
    tpu.vector_store %arg11[%c14, %c32_27], %106 {strides = array<i32>} : memref<16x64xf32, #tpu.memory_space<vmem>>, vector<1x32xf32>,
    %108 = vector.extract_strided_slice %5 {offsets = [4, 0], sizes = [2, 256], strides = [1, 1]} : vector<16x256xf32> to vector<2x256xf32>
    %109 = vector.extract_strided_slice %5 {offsets = [10, 0], sizes = [2, 256], strides = [1, 1]} : vector<16x256xf32> to vector<2x256xf32>
    %110 = vector.shape_cast %24 : vector<1x256xi1> to vector<1x256xi1>
    %111 = vector.broadcast %110 : vector<1x256xi1> to vector<2x256xi1>
    %112 = arith.select %111, %108, %109 : vector<2x256xi1>, vector<2x256xf32>
    %cst_28 = arith.constant dense<0.000000e+00> : vector<2x256xf32>
    %113 = tpu.matmul %99, %25, %cst_28 {dimension_numbers = #tpu.dot_dimension_numbers<[1], [0], [0], [1], [0, 0, 1, 1], [], []>} : vector<2x64xf32>, vector<64x256xf32>, vector<2x256xf32> -> vector<2x256xf32>
    %114 = arith.addf %112, %113 : vector<2x256xf32>
    %115 = vector.extract_strided_slice %114 {offsets = [0, 0], sizes = [2, 64], strides = [1, 1]} : vector<2x256xf32> to vector<2x64xf32>
    %116 = arith.negf %115 : vector<2x64xf32>
    %117 = math.exp %116 : vector<2x64xf32>
    %cst_29 = arith.constant 1.000000e+00 : f32
    %118 = vector.broadcast %cst_29 : f32 to vector<2x64xf32>
    %119 = arith.addf %118, %117 : vector<2x64xf32>
    %120 = arith.divf %118, %119 : vector<2x64xf32>
    %121 = vector.extract_strided_slice %114 {offsets = [0, 64], sizes = [2, 64], strides = [1, 1]} : vector<2x256xf32> to vector<2x64xf32>
    %122 = arith.negf %121 : vector<2x64xf32>
    %123 = math.exp %122 : vector<2x64xf32>
    %cst_30 = arith.constant 1.000000e+00 : f32
    %124 = vector.broadcast %cst_30 : f32 to vector<2x64xf32>
    %125 = arith.addf %124, %123 : vector<2x64xf32>
    %126 = arith.divf %124, %125 : vector<2x64xf32>
    %127 = vector.extract_strided_slice %114 {offsets = [0, 128], sizes = [2, 64], strides = [1, 1]} : vector<2x256xf32> to vector<2x64xf32>
    %128 = math.tanh %127 : vector<2x64xf32>
    %129 = vector.extract_strided_slice %114 {offsets = [0, 192], sizes = [2, 64], strides = [1, 1]} : vector<2x256xf32> to vector<2x64xf32>
    %130 = arith.negf %129 : vector<2x64xf32>
    %131 = math.exp %130 : vector<2x64xf32>
    %cst_31 = arith.constant 1.000000e+00 : f32
    %132 = vector.broadcast %cst_31 : f32 to vector<2x64xf32>
    %133 = arith.addf %132, %131 : vector<2x64xf32>
    %134 = arith.divf %132, %133 : vector<2x64xf32>
    %135 = arith.mulf %126, %97 : vector<2x64xf32>
    %136 = arith.mulf %120, %128 : vector<2x64xf32>
    %137 = arith.addf %135, %136 : vector<2x64xf32>
    %138 = math.tanh %137 : vector<2x64xf32>
    %139 = arith.mulf %134, %138 : vector<2x64xf32>
    %140 = vector.extract_strided_slice %139 {offsets = [0, 0], sizes = [1, 32], strides = [1, 1]} : vector<2x64xf32> to vector<1x32xf32>
    %c2 = arith.constant 2 : index
    %c0_32 = arith.constant 0 : index
    %141 = vector.load %arg11[%c2, %c0_32] : memref<16x64xf32, #tpu.memory_space<vmem>>, vector<1x32xf32>
    tpu.vector_store %arg11[%c2, %c0_32], %140 {strides = array<i32>} : memref<16x64xf32, #tpu.memory_space<vmem>>, vector<1x32xf32>,
    %142 = vector.extract_strided_slice %139 {offsets = [0, 32], sizes = [1, 32], strides = [1, 1]} : vector<2x64xf32> to vector<1x32xf32>
    %c5 = arith.constant 5 : index
    %c32_33 = arith.constant 32 : index
    %143 = vector.load %arg11[%c5, %c32_33] : memref<16x64xf32, #tpu.memory_space<vmem>>, vector<1x32xf32>
    tpu.vector_store %arg11[%c5, %c32_33], %142 {strides = array<i32>} : memref<16x64xf32, #tpu.memory_space<vmem>>, vector<1x32xf32>,
    %144 = vector.extract_strided_slice %139 {offsets = [1, 0], sizes = [1, 32], strides = [1, 1]} : vector<2x64xf32> to vector<1x32xf32>
    %c10 = arith.constant 10 : index
    %c0_34 = arith.constant 0 : index
    %145 = vector.load %arg11[%c10, %c0_34] : memref<16x64xf32, #tpu.memory_space<vmem>>, vector<1x32xf32>
    tpu.vector_store %arg11[%c10, %c0_34], %144 {strides = array<i32>} : memref<16x64xf32, #tpu.memory_space<vmem>>, vector<1x32xf32>,
    %146 = vector.extract_strided_slice %139 {offsets = [1, 32], sizes = [1, 32], strides = [1, 1]} : vector<2x64xf32> to vector<1x32xf32>
    %c13 = arith.constant 13 : index
    %c32_35 = arith.constant 32 : index
    %147 = vector.load %arg11[%c13, %c32_35] : memref<16x64xf32, #tpu.memory_space<vmem>>, vector<1x32xf32>
    tpu.vector_store %arg11[%c13, %c32_35], %146 {strides = array<i32>} : memref<16x64xf32, #tpu.memory_space<vmem>>, vector<1x32xf32>,
    %148 = vector.extract_strided_slice %5 {offsets = [6, 0], sizes = [2, 256], strides = [1, 1]} : vector<16x256xf32> to vector<2x256xf32>
    %149 = vector.extract_strided_slice %5 {offsets = [8, 0], sizes = [2, 256], strides = [1, 1]} : vector<16x256xf32> to vector<2x256xf32>
    %150 = vector.shape_cast %24 : vector<1x256xi1> to vector<1x256xi1>
    %151 = vector.broadcast %150 : vector<1x256xi1> to vector<2x256xi1>
    %152 = arith.select %151, %148, %149 : vector<2x256xi1>, vector<2x256xf32>
    %cst_36 = arith.constant dense<0.000000e+00> : vector<2x256xf32>
    %153 = tpu.matmul %139, %25, %cst_36 {dimension_numbers = #tpu.dot_dimension_numbers<[1], [0], [0], [1], [0, 0, 1, 1], [], []>} : vector<2x64xf32>, vector<64x256xf32>, vector<2x256xf32> -> vector<2x256xf32>
    %154 = arith.addf %152, %153 : vector<2x256xf32>
    %155 = vector.extract_strided_slice %154 {offsets = [0, 0], sizes = [2, 64], strides = [1, 1]} : vector<2x256xf32> to vector<2x64xf32>
    %156 = arith.negf %155 : vector<2x64xf32>
    %157 = math.exp %156 : vector<2x64xf32>
    %cst_37 = arith.constant 1.000000e+00 : f32
    %158 = vector.broadcast %cst_37 : f32 to vector<2x64xf32>
    %159 = arith.addf %158, %157 : vector<2x64xf32>
    %160 = arith.divf %158, %159 : vector<2x64xf32>
    %161 = vector.extract_strided_slice %154 {offsets = [0, 64], sizes = [2, 64], strides = [1, 1]} : vector<2x256xf32> to vector<2x64xf32>
    %162 = arith.negf %161 : vector<2x64xf32>
    %163 = math.exp %162 : vector<2x64xf32>
    %cst_38 = arith.constant 1.000000e+00 : f32
    %164 = vector.broadcast %cst_38 : f32 to vector<2x64xf32>
    %165 = arith.addf %164, %163 : vector<2x64xf32>
    %166 = arith.divf %164, %165 : vector<2x64xf32>
    %167 = vector.extract_strided_slice %154 {offsets = [0, 128], sizes = [2, 64], strides = [1, 1]} : vector<2x256xf32> to vector<2x64xf32>
    %168 = math.tanh %167 : vector<2x64xf32>
    %169 = vector.extract_strided_slice %154 {offsets = [0, 192], sizes = [2, 64], strides = [1, 1]} : vector<2x256xf32> to vector<2x64xf32>
    %170 = arith.negf %169 : vector<2x64xf32>
    %171 = math.exp %170 : vector<2x64xf32>
    %cst_39 = arith.constant 1.000000e+00 : f32
    %172 = vector.broadcast %cst_39 : f32 to vector<2x64xf32>
    %173 = arith.addf %172, %171 : vector<2x64xf32>
    %174 = arith.divf %172, %173 : vector<2x64xf32>
    %175 = arith.mulf %166, %137 : vector<2x64xf32>
    %176 = arith.mulf %160, %168 : vector<2x64xf32>
    %177 = arith.addf %175, %176 : vector<2x64xf32>
    %178 = math.tanh %177 : vector<2x64xf32>
    %179 = arith.mulf %174, %178 : vector<2x64xf32>
    %180 = vector.extract_strided_slice %179 {offsets = [0, 0], sizes = [1, 32], strides = [1, 1]} : vector<2x64xf32> to vector<1x32xf32>
    %c3 = arith.constant 3 : index
    %c0_40 = arith.constant 0 : index
    %181 = vector.load %arg11[%c3, %c0_40] : memref<16x64xf32, #tpu.memory_space<vmem>>, vector<1x32xf32>
    tpu.vector_store %arg11[%c3, %c0_40], %180 {strides = array<i32>} : memref<16x64xf32, #tpu.memory_space<vmem>>, vector<1x32xf32>,
    %182 = vector.extract_strided_slice %179 {offsets = [0, 32], sizes = [1, 32], strides = [1, 1]} : vector<2x64xf32> to vector<1x32xf32>
    %c4 = arith.constant 4 : index
    %c32_41 = arith.constant 32 : index
    %183 = vector.load %arg11[%c4, %c32_41] : memref<16x64xf32, #tpu.memory_space<vmem>>, vector<1x32xf32>
    tpu.vector_store %arg11[%c4, %c32_41], %182 {strides = array<i32>} : memref<16x64xf32, #tpu.memory_space<vmem>>, vector<1x32xf32>,
    %184 = vector.extract_strided_slice %179 {offsets = [1, 0], sizes = [1, 32], strides = [1, 1]} : vector<2x64xf32> to vector<1x32xf32>
    %c11 = arith.constant 11 : index
    %c0_42 = arith.constant 0 : index
    %185 = vector.load %arg11[%c11, %c0_42] : memref<16x64xf32, #tpu.memory_space<vmem>>, vector<1x32xf32>
    tpu.vector_store %arg11[%c11, %c0_42], %184 {strides = array<i32>} : memref<16x64xf32, #tpu.memory_space<vmem>>, vector<1x32xf32>,
    %186 = vector.extract_strided_slice %179 {offsets = [1, 32], sizes = [1, 32], strides = [1, 1]} : vector<2x64xf32> to vector<1x32xf32>
    %c12 = arith.constant 12 : index
    %c32_43 = arith.constant 32 : index
    %187 = vector.load %arg11[%c12, %c32_43] : memref<16x64xf32, #tpu.memory_space<vmem>>, vector<1x32xf32>
    tpu.vector_store %arg11[%c12, %c32_43], %186 {strides = array<i32>} : memref<16x64xf32, #tpu.memory_space<vmem>>, vector<1x32xf32>,
    %188 = vector.extract_strided_slice %5 {offsets = [8, 0], sizes = [2, 256], strides = [1, 1]} : vector<16x256xf32> to vector<2x256xf32>
    %189 = vector.extract_strided_slice %5 {offsets = [6, 0], sizes = [2, 256], strides = [1, 1]} : vector<16x256xf32> to vector<2x256xf32>
    %190 = vector.shape_cast %24 : vector<1x256xi1> to vector<1x256xi1>
    %191 = vector.broadcast %190 : vector<1x256xi1> to vector<2x256xi1>
    %192 = arith.select %191, %188, %189 : vector<2x256xi1>, vector<2x256xf32>
    %cst_44 = arith.constant dense<0.000000e+00> : vector<2x256xf32>
    %193 = tpu.matmul %179, %25, %cst_44 {dimension_numbers = #tpu.dot_dimension_numbers<[1], [0], [0], [1], [0, 0, 1, 1], [], []>} : vector<2x64xf32>, vector<64x256xf32>, vector<2x256xf32> -> vector<2x256xf32>
    %194 = arith.addf %192, %193 : vector<2x256xf32>
    %195 = vector.extract_strided_slice %194 {offsets = [0, 0], sizes = [2, 64], strides = [1, 1]} : vector<2x256xf32> to vector<2x64xf32>
    %196 = arith.negf %195 : vector<2x64xf32>
    %197 = math.exp %196 : vector<2x64xf32>
    %cst_45 = arith.constant 1.000000e+00 : f32
    %198 = vector.broadcast %cst_45 : f32 to vector<2x64xf32>
    %199 = arith.addf %198, %197 : vector<2x64xf32>
    %200 = arith.divf %198, %199 : vector<2x64xf32>
    %201 = vector.extract_strided_slice %194 {offsets = [0, 64], sizes = [2, 64], strides = [1, 1]} : vector<2x256xf32> to vector<2x64xf32>
    %202 = arith.negf %201 : vector<2x64xf32>
    %203 = math.exp %202 : vector<2x64xf32>
    %cst_46 = arith.constant 1.000000e+00 : f32
    %204 = vector.broadcast %cst_46 : f32 to vector<2x64xf32>
    %205 = arith.addf %204, %203 : vector<2x64xf32>
    %206 = arith.divf %204, %205 : vector<2x64xf32>
    %207 = vector.extract_strided_slice %194 {offsets = [0, 128], sizes = [2, 64], strides = [1, 1]} : vector<2x256xf32> to vector<2x64xf32>
    %208 = math.tanh %207 : vector<2x64xf32>
    %209 = vector.extract_strided_slice %194 {offsets = [0, 192], sizes = [2, 64], strides = [1, 1]} : vector<2x256xf32> to vector<2x64xf32>
    %210 = arith.negf %209 : vector<2x64xf32>
    %211 = math.exp %210 : vector<2x64xf32>
    %cst_47 = arith.constant 1.000000e+00 : f32
    %212 = vector.broadcast %cst_47 : f32 to vector<2x64xf32>
    %213 = arith.addf %212, %211 : vector<2x64xf32>
    %214 = arith.divf %212, %213 : vector<2x64xf32>
    %215 = arith.mulf %206, %177 : vector<2x64xf32>
    %216 = arith.mulf %200, %208 : vector<2x64xf32>
    %217 = arith.addf %215, %216 : vector<2x64xf32>
    %218 = math.tanh %217 : vector<2x64xf32>
    %219 = arith.mulf %214, %218 : vector<2x64xf32>
    %220 = vector.extract_strided_slice %219 {offsets = [0, 0], sizes = [1, 32], strides = [1, 1]} : vector<2x64xf32> to vector<1x32xf32>
    %c4_48 = arith.constant 4 : index
    %c0_49 = arith.constant 0 : index
    %221 = vector.load %arg11[%c4_48, %c0_49] : memref<16x64xf32, #tpu.memory_space<vmem>>, vector<1x32xf32>
    tpu.vector_store %arg11[%c4_48, %c0_49], %220 {strides = array<i32>} : memref<16x64xf32, #tpu.memory_space<vmem>>, vector<1x32xf32>,
    %222 = vector.extract_strided_slice %219 {offsets = [0, 32], sizes = [1, 32], strides = [1, 1]} : vector<2x64xf32> to vector<1x32xf32>
    %c3_50 = arith.constant 3 : index
    %c32_51 = arith.constant 32 : index
    %223 = vector.load %arg11[%c3_50, %c32_51] : memref<16x64xf32, #tpu.memory_space<vmem>>, vector<1x32xf32>
    tpu.vector_store %arg11[%c3_50, %c32_51], %222 {strides = array<i32>} : memref<16x64xf32, #tpu.memory_space<vmem>>, vector<1x32xf32>,
    %224 = vector.extract_strided_slice %219 {offsets = [1, 0], sizes = [1, 32], strides = [1, 1]} : vector<2x64xf32> to vector<1x32xf32>
    %c12_52 = arith.constant 12 : index
    %c0_53 = arith.constant 0 : index
    %225 = vector.load %arg11[%c12_52, %c0_53] : memref<16x64xf32, #tpu.memory_space<vmem>>, vector<1x32xf32>
    tpu.vector_store %arg11[%c12_52, %c0_53], %224 {strides = array<i32>} : memref<16x64xf32, #tpu.memory_space<vmem>>, vector<1x32xf32>,
    %226 = vector.extract_strided_slice %219 {offsets = [1, 32], sizes = [1, 32], strides = [1, 1]} : vector<2x64xf32> to vector<1x32xf32>
    %c11_54 = arith.constant 11 : index
    %c32_55 = arith.constant 32 : index
    %227 = vector.load %arg11[%c11_54, %c32_55] : memref<16x64xf32, #tpu.memory_space<vmem>>, vector<1x32xf32>
    tpu.vector_store %arg11[%c11_54, %c32_55], %226 {strides = array<i32>} : memref<16x64xf32, #tpu.memory_space<vmem>>, vector<1x32xf32>,
    %228 = vector.extract_strided_slice %5 {offsets = [10, 0], sizes = [2, 256], strides = [1, 1]} : vector<16x256xf32> to vector<2x256xf32>
    %229 = vector.extract_strided_slice %5 {offsets = [4, 0], sizes = [2, 256], strides = [1, 1]} : vector<16x256xf32> to vector<2x256xf32>
    %230 = vector.shape_cast %24 : vector<1x256xi1> to vector<1x256xi1>
    %231 = vector.broadcast %230 : vector<1x256xi1> to vector<2x256xi1>
    %232 = arith.select %231, %228, %229 : vector<2x256xi1>, vector<2x256xf32>
    %cst_56 = arith.constant dense<0.000000e+00> : vector<2x256xf32>
    %233 = tpu.matmul %219, %25, %cst_56 {dimension_numbers = #tpu.dot_dimension_numbers<[1], [0], [0], [1], [0, 0, 1, 1], [], []>} : vector<2x64xf32>, vector<64x256xf32>, vector<2x256xf32> -> vector<2x256xf32>
    %234 = arith.addf %232, %233 : vector<2x256xf32>
    %235 = vector.extract_strided_slice %234 {offsets = [0, 0], sizes = [2, 64], strides = [1, 1]} : vector<2x256xf32> to vector<2x64xf32>
    %236 = arith.negf %235 : vector<2x64xf32>
    %237 = math.exp %236 : vector<2x64xf32>
    %cst_57 = arith.constant 1.000000e+00 : f32
    %238 = vector.broadcast %cst_57 : f32 to vector<2x64xf32>
    %239 = arith.addf %238, %237 : vector<2x64xf32>
    %240 = arith.divf %238, %239 : vector<2x64xf32>
    %241 = vector.extract_strided_slice %234 {offsets = [0, 64], sizes = [2, 64], strides = [1, 1]} : vector<2x256xf32> to vector<2x64xf32>
    %242 = arith.negf %241 : vector<2x64xf32>
    %243 = math.exp %242 : vector<2x64xf32>
    %cst_58 = arith.constant 1.000000e+00 : f32
    %244 = vector.broadcast %cst_58 : f32 to vector<2x64xf32>
    %245 = arith.addf %244, %243 : vector<2x64xf32>
    %246 = arith.divf %244, %245 : vector<2x64xf32>
    %247 = vector.extract_strided_slice %234 {offsets = [0, 128], sizes = [2, 64], strides = [1, 1]} : vector<2x256xf32> to vector<2x64xf32>
    %248 = math.tanh %247 : vector<2x64xf32>
    %249 = vector.extract_strided_slice %234 {offsets = [0, 192], sizes = [2, 64], strides = [1, 1]} : vector<2x256xf32> to vector<2x64xf32>
    %250 = arith.negf %249 : vector<2x64xf32>
    %251 = math.exp %250 : vector<2x64xf32>
    %cst_59 = arith.constant 1.000000e+00 : f32
    %252 = vector.broadcast %cst_59 : f32 to vector<2x64xf32>
    %253 = arith.addf %252, %251 : vector<2x64xf32>
    %254 = arith.divf %252, %253 : vector<2x64xf32>
    %255 = arith.mulf %246, %217 : vector<2x64xf32>
    %256 = arith.mulf %240, %248 : vector<2x64xf32>
    %257 = arith.addf %255, %256 : vector<2x64xf32>
    %258 = math.tanh %257 : vector<2x64xf32>
    %259 = arith.mulf %254, %258 : vector<2x64xf32>
    %260 = vector.extract_strided_slice %259 {offsets = [0, 0], sizes = [1, 32], strides = [1, 1]} : vector<2x64xf32> to vector<1x32xf32>
    %c5_60 = arith.constant 5 : index
    %c0_61 = arith.constant 0 : index
    %261 = vector.load %arg11[%c5_60, %c0_61] : memref<16x64xf32, #tpu.memory_space<vmem>>, vector<1x32xf32>
    tpu.vector_store %arg11[%c5_60, %c0_61], %260 {strides = array<i32>} : memref<16x64xf32, #tpu.memory_space<vmem>>, vector<1x32xf32>,
    %262 = vector.extract_strided_slice %259 {offsets = [0, 32], sizes = [1, 32], strides = [1, 1]} : vector<2x64xf32> to vector<1x32xf32>
    %c2_62 = arith.constant 2 : index
    %c32_63 = arith.constant 32 : index
    %263 = vector.load %arg11[%c2_62, %c32_63] : memref<16x64xf32, #tpu.memory_space<vmem>>, vector<1x32xf32>
    tpu.vector_store %arg11[%c2_62, %c32_63], %262 {strides = array<i32>} : memref<16x64xf32, #tpu.memory_space<vmem>>, vector<1x32xf32>,
    %264 = vector.extract_strided_slice %259 {offsets = [1, 0], sizes = [1, 32], strides = [1, 1]} : vector<2x64xf32> to vector<1x32xf32>
    %c13_64 = arith.constant 13 : index
    %c0_65 = arith.constant 0 : index
    %265 = vector.load %arg11[%c13_64, %c0_65] : memref<16x64xf32, #tpu.memory_space<vmem>>, vector<1x32xf32>
    tpu.vector_store %arg11[%c13_64, %c0_65], %264 {strides = array<i32>} : memref<16x64xf32, #tpu.memory_space<vmem>>, vector<1x32xf32>,
    %266 = vector.extract_strided_slice %259 {offsets = [1, 32], sizes = [1, 32], strides = [1, 1]} : vector<2x64xf32> to vector<1x32xf32>
    %c10_66 = arith.constant 10 : index
    %c32_67 = arith.constant 32 : index
    %267 = vector.load %arg11[%c10_66, %c32_67] : memref<16x64xf32, #tpu.memory_space<vmem>>, vector<1x32xf32>
    tpu.vector_store %arg11[%c10_66, %c32_67], %266 {strides = array<i32>} : memref<16x64xf32, #tpu.memory_space<vmem>>, vector<1x32xf32>,
    %268 = vector.extract_strided_slice %5 {offsets = [12, 0], sizes = [2, 256], strides = [1, 1]} : vector<16x256xf32> to vector<2x256xf32>
    %269 = vector.extract_strided_slice %5 {offsets = [2, 0], sizes = [2, 256], strides = [1, 1]} : vector<16x256xf32> to vector<2x256xf32>
    %270 = vector.shape_cast %24 : vector<1x256xi1> to vector<1x256xi1>
    %271 = vector.broadcast %270 : vector<1x256xi1> to vector<2x256xi1>
    %272 = arith.select %271, %268, %269 : vector<2x256xi1>, vector<2x256xf32>
    %cst_68 = arith.constant dense<0.000000e+00> : vector<2x256xf32>
    %273 = tpu.matmul %259, %25, %cst_68 {dimension_numbers = #tpu.dot_dimension_numbers<[1], [0], [0], [1], [0, 0, 1, 1], [], []>} : vector<2x64xf32>, vector<64x256xf32>, vector<2x256xf32> -> vector<2x256xf32>
    %274 = arith.addf %272, %273 : vector<2x256xf32>
    %275 = vector.extract_strided_slice %274 {offsets = [0, 0], sizes = [2, 64], strides = [1, 1]} : vector<2x256xf32> to vector<2x64xf32>
    %276 = arith.negf %275 : vector<2x64xf32>
    %277 = math.exp %276 : vector<2x64xf32>
    %cst_69 = arith.constant 1.000000e+00 : f32
    %278 = vector.broadcast %cst_69 : f32 to vector<2x64xf32>
    %279 = arith.addf %278, %277 : vector<2x64xf32>
    %280 = arith.divf %278, %279 : vector<2x64xf32>
    %281 = vector.extract_strided_slice %274 {offsets = [0, 64], sizes = [2, 64], strides = [1, 1]} : vector<2x256xf32> to vector<2x64xf32>
    %282 = arith.negf %281 : vector<2x64xf32>
    %283 = math.exp %282 : vector<2x64xf32>
    %cst_70 = arith.constant 1.000000e+00 : f32
    %284 = vector.broadcast %cst_70 : f32 to vector<2x64xf32>
    %285 = arith.addf %284, %283 : vector<2x64xf32>
    %286 = arith.divf %284, %285 : vector<2x64xf32>
    %287 = vector.extract_strided_slice %274 {offsets = [0, 128], sizes = [2, 64], strides = [1, 1]} : vector<2x256xf32> to vector<2x64xf32>
    %288 = math.tanh %287 : vector<2x64xf32>
    %289 = vector.extract_strided_slice %274 {offsets = [0, 192], sizes = [2, 64], strides = [1, 1]} : vector<2x256xf32> to vector<2x64xf32>
    %290 = arith.negf %289 : vector<2x64xf32>
    %291 = math.exp %290 : vector<2x64xf32>
    %cst_71 = arith.constant 1.000000e+00 : f32
    %292 = vector.broadcast %cst_71 : f32 to vector<2x64xf32>
    %293 = arith.addf %292, %291 : vector<2x64xf32>
    %294 = arith.divf %292, %293 : vector<2x64xf32>
    %295 = arith.mulf %286, %257 : vector<2x64xf32>
    %296 = arith.mulf %280, %288 : vector<2x64xf32>
    %297 = arith.addf %295, %296 : vector<2x64xf32>
    %298 = math.tanh %297 : vector<2x64xf32>
    %299 = arith.mulf %294, %298 : vector<2x64xf32>
    %300 = vector.extract_strided_slice %299 {offsets = [0, 0], sizes = [1, 32], strides = [1, 1]} : vector<2x64xf32> to vector<1x32xf32>
    %c6_72 = arith.constant 6 : index
    %c0_73 = arith.constant 0 : index
    %301 = vector.load %arg11[%c6_72, %c0_73] : memref<16x64xf32, #tpu.memory_space<vmem>>, vector<1x32xf32>
    tpu.vector_store %arg11[%c6_72, %c0_73], %300 {strides = array<i32>} : memref<16x64xf32, #tpu.memory_space<vmem>>, vector<1x32xf32>,
    %302 = vector.extract_strided_slice %299 {offsets = [0, 32], sizes = [1, 32], strides = [1, 1]} : vector<2x64xf32> to vector<1x32xf32>
    %c1_74 = arith.constant 1 : index
    %c32_75 = arith.constant 32 : index
    %303 = vector.load %arg11[%c1_74, %c32_75] : memref<16x64xf32, #tpu.memory_space<vmem>>, vector<1x32xf32>
    tpu.vector_store %arg11[%c1_74, %c32_75], %302 {strides = array<i32>} : memref<16x64xf32, #tpu.memory_space<vmem>>, vector<1x32xf32>,
    %304 = vector.extract_strided_slice %299 {offsets = [1, 0], sizes = [1, 32], strides = [1, 1]} : vector<2x64xf32> to vector<1x32xf32>
    %c14_76 = arith.constant 14 : index
    %c0_77 = arith.constant 0 : index
    %305 = vector.load %arg11[%c14_76, %c0_77] : memref<16x64xf32, #tpu.memory_space<vmem>>, vector<1x32xf32>
    tpu.vector_store %arg11[%c14_76, %c0_77], %304 {strides = array<i32>} : memref<16x64xf32, #tpu.memory_space<vmem>>, vector<1x32xf32>,
    %306 = vector.extract_strided_slice %299 {offsets = [1, 32], sizes = [1, 32], strides = [1, 1]} : vector<2x64xf32> to vector<1x32xf32>
    %c9_78 = arith.constant 9 : index
    %c32_79 = arith.constant 32 : index
    %307 = vector.load %arg11[%c9_78, %c32_79] : memref<16x64xf32, #tpu.memory_space<vmem>>, vector<1x32xf32>
    tpu.vector_store %arg11[%c9_78, %c32_79], %306 {strides = array<i32>} : memref<16x64xf32, #tpu.memory_space<vmem>>, vector<1x32xf32>,
    %308 = vector.extract_strided_slice %5 {offsets = [14, 0], sizes = [2, 256], strides = [1, 1]} : vector<16x256xf32> to vector<2x256xf32>
    %309 = vector.extract_strided_slice %5 {offsets = [0, 0], sizes = [2, 256], strides = [1, 1]} : vector<16x256xf32> to vector<2x256xf32>
    %310 = vector.shape_cast %24 : vector<1x256xi1> to vector<1x256xi1>
    %311 = vector.broadcast %310 : vector<1x256xi1> to vector<2x256xi1>
    %312 = arith.select %311, %308, %309 : vector<2x256xi1>, vector<2x256xf32>
    %cst_80 = arith.constant dense<0.000000e+00> : vector<2x256xf32>
    %313 = tpu.matmul %299, %25, %cst_80 {dimension_numbers = #tpu.dot_dimension_numbers<[1], [0], [0], [1], [0, 0, 1, 1], [], []>} : vector<2x64xf32>, vector<64x256xf32>, vector<2x256xf32> -> vector<2x256xf32>
    %314 = arith.addf %312, %313 : vector<2x256xf32>
    %315 = vector.extract_strided_slice %314 {offsets = [0, 0], sizes = [2, 64], strides = [1, 1]} : vector<2x256xf32> to vector<2x64xf32>
    %316 = arith.negf %315 : vector<2x64xf32>
    %317 = math.exp %316 : vector<2x64xf32>
    %cst_81 = arith.constant 1.000000e+00 : f32
    %318 = vector.broadcast %cst_81 : f32 to vector<2x64xf32>
    %319 = arith.addf %318, %317 : vector<2x64xf32>
    %320 = arith.divf %318, %319 : vector<2x64xf32>
    %321 = vector.extract_strided_slice %314 {offsets = [0, 64], sizes = [2, 64], strides = [1, 1]} : vector<2x256xf32> to vector<2x64xf32>
    %322 = arith.negf %321 : vector<2x64xf32>
    %323 = math.exp %322 : vector<2x64xf32>
    %cst_82 = arith.constant 1.000000e+00 : f32
    %324 = vector.broadcast %cst_82 : f32 to vector<2x64xf32>
    %325 = arith.addf %324, %323 : vector<2x64xf32>
    %326 = arith.divf %324, %325 : vector<2x64xf32>
    %327 = vector.extract_strided_slice %314 {offsets = [0, 128], sizes = [2, 64], strides = [1, 1]} : vector<2x256xf32> to vector<2x64xf32>
    %328 = math.tanh %327 : vector<2x64xf32>
    %329 = vector.extract_strided_slice %314 {offsets = [0, 192], sizes = [2, 64], strides = [1, 1]} : vector<2x256xf32> to vector<2x64xf32>
    %330 = arith.negf %329 : vector<2x64xf32>
    %331 = math.exp %330 : vector<2x64xf32>
    %cst_83 = arith.constant 1.000000e+00 : f32
    %332 = vector.broadcast %cst_83 : f32 to vector<2x64xf32>
    %333 = arith.addf %332, %331 : vector<2x64xf32>
    %334 = arith.divf %332, %333 : vector<2x64xf32>
    %335 = arith.mulf %326, %297 : vector<2x64xf32>
    %336 = arith.mulf %320, %328 : vector<2x64xf32>
    %337 = arith.addf %335, %336 : vector<2x64xf32>
    %338 = math.tanh %337 : vector<2x64xf32>
    %339 = arith.mulf %334, %338 : vector<2x64xf32>
    %340 = vector.extract_strided_slice %339 {offsets = [0, 0], sizes = [1, 32], strides = [1, 1]} : vector<2x64xf32> to vector<1x32xf32>
    %c7_84 = arith.constant 7 : index
    %c0_85 = arith.constant 0 : index
    %341 = vector.load %arg11[%c7_84, %c0_85] : memref<16x64xf32, #tpu.memory_space<vmem>>, vector<1x32xf32>
    tpu.vector_store %arg11[%c7_84, %c0_85], %340 {strides = array<i32>} : memref<16x64xf32, #tpu.memory_space<vmem>>, vector<1x32xf32>,
    %342 = vector.extract_strided_slice %339 {offsets = [0, 32], sizes = [1, 32], strides = [1, 1]} : vector<2x64xf32> to vector<1x32xf32>
    %c0_86 = arith.constant 0 : index
    %c32_87 = arith.constant 32 : index
    %343 = vector.load %arg11[%c0_86, %c32_87] : memref<16x64xf32, #tpu.memory_space<vmem>>, vector<1x32xf32>
    tpu.vector_store %arg11[%c0_86, %c32_87], %342 {strides = array<i32>} : memref<16x64xf32, #tpu.memory_space<vmem>>, vector<1x32xf32>,
    %344 = vector.extract_strided_slice %339 {offsets = [1, 0], sizes = [1, 32], strides = [1, 1]} : vector<2x64xf32> to vector<1x32xf32>
    %c15_88 = arith.constant 15 : index
    %c0_89 = arith.constant 0 : index
    %345 = vector.load %arg11[%c15_88, %c0_89] : memref<16x64xf32, #tpu.memory_space<vmem>>, vector<1x32xf32>
    tpu.vector_store %arg11[%c15_88, %c0_89], %344 {strides = array<i32>} : memref<16x64xf32, #tpu.memory_space<vmem>>, vector<1x32xf32>,
    %346 = vector.extract_strided_slice %339 {offsets = [1, 32], sizes = [1, 32], strides = [1, 1]} : vector<2x64xf32> to vector<1x32xf32>
    %c8_90 = arith.constant 8 : index
    %c32_91 = arith.constant 32 : index
    %347 = vector.load %arg11[%c8_90, %c32_91] : memref<16x64xf32, #tpu.memory_space<vmem>>, vector<1x32xf32>
    tpu.vector_store %arg11[%c8_90, %c32_91], %346 {strides = array<i32>} : memref<16x64xf32, #tpu.memory_space<vmem>>, vector<1x32xf32>,
    %c0_92 = arith.constant 0 : index
    %c0_93 = arith.constant 0 : index
    %348 = vector.load %arg11[%c0_92, %c0_93] : memref<16x64xf32, #tpu.memory_space<vmem>>, vector<16x64xf32>
    %c0_94 = arith.constant 0 : index
    %c0_95 = arith.constant 0 : index
    %349 = vector.load %arg4[%c0_94, %c0_95] : memref<64x384xf32, #tpu.memory_space<vmem>>, vector<64x384xf32>
    %cst_96 = arith.constant dense<0.000000e+00> : vector<16x384xf32>
    %350 = tpu.matmul %348, %349, %cst_96 {dimension_numbers = #tpu.dot_dimension_numbers<[1], [0], [0], [1], [0, 0, 1, 1], [], []>} : vector<16x64xf32>, vector<64x384xf32>, vector<16x384xf32> -> vector<16x384xf32>
    %c0_97 = arith.constant 0 : index
    %c0_98 = arith.constant 0 : index
    %351 = vector.load %arg5[%c0_97, %c0_98] : memref<1x384xf32, #tpu.memory_space<vmem>>, vector<1x384xf32>
    %352 = vector.broadcast %351 : vector<1x384xf32> to vector<16x384xf32>
    %353 = arith.addf %350, %352 : vector<16x384xf32>
    %354 = math.tanh %353 : vector<16x384xf32>
    %c0_99 = arith.constant 0 : index
    %c0_100 = arith.constant 0 : index
    %355 = vector.load %arg6[%c0_99, %c0_100] : memref<384x32xf32, #tpu.memory_space<vmem>>, vector<384x32xf32>
    %cst_101 = arith.constant dense<0.000000e+00> : vector<16x32xf32>
    %356 = tpu.matmul %354, %355, %cst_101 {dimension_numbers = #tpu.dot_dimension_numbers<[1], [0], [0], [1], [0, 0, 1, 1], [], []>} : vector<16x384xf32>, vector<384x32xf32>, vector<16x32xf32> -> vector<16x32xf32>
    %c0_102 = arith.constant 0 : index
    %c0_103 = arith.constant 0 : index
    %357 = vector.load %arg7[%c0_102, %c0_103] : memref<1x32xf32, #tpu.memory_space<vmem>>, vector<1x32xf32>
    %358 = vector.broadcast %357 : vector<1x32xf32> to vector<16x32xf32>
    %359 = arith.addf %356, %358 : vector<16x32xf32>
    %360 = vector.extract_strided_slice %359 {offsets = [0, 0], sizes = [8, 32], strides = [1, 1]} : vector<16x32xf32> to vector<8x32xf32>
    %cst_104 = arith.constant dense<0xFF800000> : vector<32xf32>
    %361 = vector.multi_reduction <maximumf>, %360, %cst_104 [0] : vector<8x32xf32> to vector<32xf32>
    %362 = vector.shape_cast %361 : vector<32xf32> to vector<1x32xf32>
    %363 = vector.broadcast %362 : vector<1x32xf32> to vector<8x32xf32>
    %364 = arith.subf %360, %363 : vector<8x32xf32>
    %365 = math.exp %364 : vector<8x32xf32>
    %cst_105 = arith.constant dense<0.000000e+00> : vector<32xf32>
    %366 = vector.multi_reduction <add>, %365, %cst_105 [0] : vector<8x32xf32> to vector<32xf32>
    %367 = vector.shape_cast %366 : vector<32xf32> to vector<1x32xf32>
    %368 = vector.broadcast %367 : vector<1x32xf32> to vector<8x32xf32>
    %369 = arith.divf %365, %368 : vector<8x32xf32>
    %370 = vector.extract_strided_slice %348 {offsets = [0, 0], sizes = [8, 64], strides = [1, 1]} : vector<16x64xf32> to vector<8x64xf32>
    %cst_106 = arith.constant dense<0.000000e+00> : vector<32x64xf32>
    %371 = tpu.matmul %369, %370, %cst_106 {dimension_numbers = #tpu.dot_dimension_numbers<[0], [0], [1], [1], [0, 1, 1, 1], [], []>} : vector<8x32xf32>, vector<8x64xf32>, vector<32x64xf32> -> vector<32x64xf32>
    %372 = vector.extract_strided_slice %371 {offsets = [0, 0], sizes = [1, 64], strides = [1, 1]} : vector<32x64xf32> to vector<1x64xf32>
    %c0_107 = arith.constant 0 : index
    %c0_108 = arith.constant 0 : index
    %373 = vector.load %arg12[%c0_107, %c0_108] : memref<2x2048xf32, #tpu.memory_space<vmem>>, vector<1x64xf32>
    tpu.vector_store %arg12[%c0_107, %c0_108], %372 {strides = array<i32>} : memref<2x2048xf32, #tpu.memory_space<vmem>>, vector<1x64xf32>,
    %374 = vector.extract_strided_slice %371 {offsets = [1, 0], sizes = [1, 64], strides = [1, 1]} : vector<32x64xf32> to vector<1x64xf32>
    %c0_109 = arith.constant 0 : index
    %c64 = arith.constant 64 : index
    %375 = vector.load %arg12[%c0_109, %c64] : memref<2x2048xf32, #tpu.memory_space<vmem>>, vector<1x64xf32>
    tpu.vector_store %arg12[%c0_109, %c64], %374 {strides = array<i32>} : memref<2x2048xf32, #tpu.memory_space<vmem>>, vector<1x64xf32>,
    %376 = vector.extract_strided_slice %371 {offsets = [2, 0], sizes = [1, 64], strides = [1, 1]} : vector<32x64xf32> to vector<1x64xf32>
    %c0_110 = arith.constant 0 : index
    %c128 = arith.constant 128 : index
    %377 = vector.load %arg12[%c0_110, %c128] : memref<2x2048xf32, #tpu.memory_space<vmem>>, vector<1x64xf32>
    tpu.vector_store %arg12[%c0_110, %c128], %376 {strides = array<i32>} : memref<2x2048xf32, #tpu.memory_space<vmem>>, vector<1x64xf32>,
    %378 = vector.extract_strided_slice %371 {offsets = [3, 0], sizes = [1, 64], strides = [1, 1]} : vector<32x64xf32> to vector<1x64xf32>
    %c0_111 = arith.constant 0 : index
    %c192 = arith.constant 192 : index
    %379 = vector.load %arg12[%c0_111, %c192] : memref<2x2048xf32, #tpu.memory_space<vmem>>, vector<1x64xf32>
    tpu.vector_store %arg12[%c0_111, %c192], %378 {strides = array<i32>} : memref<2x2048xf32, #tpu.memory_space<vmem>>, vector<1x64xf32>,
    %380 = vector.extract_strided_slice %371 {offsets = [4, 0], sizes = [1, 64], strides = [1, 1]} : vector<32x64xf32> to vector<1x64xf32>
    %c0_112 = arith.constant 0 : index
    %c256 = arith.constant 256 : index
    %381 = vector.load %arg12[%c0_112, %c256] : memref<2x2048xf32, #tpu.memory_space<vmem>>, vector<1x64xf32>
    tpu.vector_store %arg12[%c0_112, %c256], %380 {strides = array<i32>} : memref<2x2048xf32, #tpu.memory_space<vmem>>, vector<1x64xf32>,
    %382 = vector.extract_strided_slice %371 {offsets = [5, 0], sizes = [1, 64], strides = [1, 1]} : vector<32x64xf32> to vector<1x64xf32>
    %c0_113 = arith.constant 0 : index
    %c320 = arith.constant 320 : index
    %383 = vector.load %arg12[%c0_113, %c320] : memref<2x2048xf32, #tpu.memory_space<vmem>>, vector<1x64xf32>
    tpu.vector_store %arg12[%c0_113, %c320], %382 {strides = array<i32>} : memref<2x2048xf32, #tpu.memory_space<vmem>>, vector<1x64xf32>,
    %384 = vector.extract_strided_slice %371 {offsets = [6, 0], sizes = [1, 64], strides = [1, 1]} : vector<32x64xf32> to vector<1x64xf32>
    %c0_114 = arith.constant 0 : index
    %c384 = arith.constant 384 : index
    %385 = vector.load %arg12[%c0_114, %c384] : memref<2x2048xf32, #tpu.memory_space<vmem>>, vector<1x64xf32>
    tpu.vector_store %arg12[%c0_114, %c384], %384 {strides = array<i32>} : memref<2x2048xf32, #tpu.memory_space<vmem>>, vector<1x64xf32>,
    %386 = vector.extract_strided_slice %371 {offsets = [7, 0], sizes = [1, 64], strides = [1, 1]} : vector<32x64xf32> to vector<1x64xf32>
    %c0_115 = arith.constant 0 : index
    %c448 = arith.constant 448 : index
    %387 = vector.load %arg12[%c0_115, %c448] : memref<2x2048xf32, #tpu.memory_space<vmem>>, vector<1x64xf32>
    tpu.vector_store %arg12[%c0_115, %c448], %386 {strides = array<i32>} : memref<2x2048xf32, #tpu.memory_space<vmem>>, vector<1x64xf32>,
    %388 = vector.extract_strided_slice %371 {offsets = [8, 0], sizes = [1, 64], strides = [1, 1]} : vector<32x64xf32> to vector<1x64xf32>
    %c0_116 = arith.constant 0 : index
    %c512 = arith.constant 512 : index
    %389 = vector.load %arg12[%c0_116, %c512] : memref<2x2048xf32, #tpu.memory_space<vmem>>, vector<1x64xf32>
    tpu.vector_store %arg12[%c0_116, %c512], %388 {strides = array<i32>} : memref<2x2048xf32, #tpu.memory_space<vmem>>, vector<1x64xf32>,
    %390 = vector.extract_strided_slice %371 {offsets = [9, 0], sizes = [1, 64], strides = [1, 1]} : vector<32x64xf32> to vector<1x64xf32>
    %c0_117 = arith.constant 0 : index
    %c576 = arith.constant 576 : index
    %391 = vector.load %arg12[%c0_117, %c576] : memref<2x2048xf32, #tpu.memory_space<vmem>>, vector<1x64xf32>
    tpu.vector_store %arg12[%c0_117, %c576], %390 {strides = array<i32>} : memref<2x2048xf32, #tpu.memory_space<vmem>>, vector<1x64xf32>,
    %392 = vector.extract_strided_slice %371 {offsets = [10, 0], sizes = [1, 64], strides = [1, 1]} : vector<32x64xf32> to vector<1x64xf32>
    %c0_118 = arith.constant 0 : index
    %c640 = arith.constant 640 : index
    %393 = vector.load %arg12[%c0_118, %c640] : memref<2x2048xf32, #tpu.memory_space<vmem>>, vector<1x64xf32>
    tpu.vector_store %arg12[%c0_118, %c640], %392 {strides = array<i32>} : memref<2x2048xf32, #tpu.memory_space<vmem>>, vector<1x64xf32>,
    %394 = vector.extract_strided_slice %371 {offsets = [11, 0], sizes = [1, 64], strides = [1, 1]} : vector<32x64xf32> to vector<1x64xf32>
    %c0_119 = arith.constant 0 : index
    %c704 = arith.constant 704 : index
    %395 = vector.load %arg12[%c0_119, %c704] : memref<2x2048xf32, #tpu.memory_space<vmem>>, vector<1x64xf32>
    tpu.vector_store %arg12[%c0_119, %c704], %394 {strides = array<i32>} : memref<2x2048xf32, #tpu.memory_space<vmem>>, vector<1x64xf32>,
    %396 = vector.extract_strided_slice %371 {offsets = [12, 0], sizes = [1, 64], strides = [1, 1]} : vector<32x64xf32> to vector<1x64xf32>
    %c0_120 = arith.constant 0 : index
    %c768 = arith.constant 768 : index
    %397 = vector.load %arg12[%c0_120, %c768] : memref<2x2048xf32, #tpu.memory_space<vmem>>, vector<1x64xf32>
    tpu.vector_store %arg12[%c0_120, %c768], %396 {strides = array<i32>} : memref<2x2048xf32, #tpu.memory_space<vmem>>, vector<1x64xf32>,
    %398 = vector.extract_strided_slice %371 {offsets = [13, 0], sizes = [1, 64], strides = [1, 1]} : vector<32x64xf32> to vector<1x64xf32>
    %c0_121 = arith.constant 0 : index
    %c832 = arith.constant 832 : index
    %399 = vector.load %arg12[%c0_121, %c832] : memref<2x2048xf32, #tpu.memory_space<vmem>>, vector<1x64xf32>
    tpu.vector_store %arg12[%c0_121, %c832], %398 {strides = array<i32>} : memref<2x2048xf32, #tpu.memory_space<vmem>>, vector<1x64xf32>,
    %400 = vector.extract_strided_slice %371 {offsets = [14, 0], sizes = [1, 64], strides = [1, 1]} : vector<32x64xf32> to vector<1x64xf32>
    %c0_122 = arith.constant 0 : index
    %c896 = arith.constant 896 : index
    %401 = vector.load %arg12[%c0_122, %c896] : memref<2x2048xf32, #tpu.memory_space<vmem>>, vector<1x64xf32>
    tpu.vector_store %arg12[%c0_122, %c896], %400 {strides = array<i32>} : memref<2x2048xf32, #tpu.memory_space<vmem>>, vector<1x64xf32>,
    %402 = vector.extract_strided_slice %371 {offsets = [15, 0], sizes = [1, 64], strides = [1, 1]} : vector<32x64xf32> to vector<1x64xf32>
    %c0_123 = arith.constant 0 : index
    %c960 = arith.constant 960 : index
    %403 = vector.load %arg12[%c0_123, %c960] : memref<2x2048xf32, #tpu.memory_space<vmem>>, vector<1x64xf32>
    tpu.vector_store %arg12[%c0_123, %c960], %402 {strides = array<i32>} : memref<2x2048xf32, #tpu.memory_space<vmem>>, vector<1x64xf32>,
    %404 = vector.extract_strided_slice %371 {offsets = [16, 0], sizes = [1, 64], strides = [1, 1]} : vector<32x64xf32> to vector<1x64xf32>
    %c0_124 = arith.constant 0 : index
    %c1024 = arith.constant 1024 : index
    %405 = vector.load %arg12[%c0_124, %c1024] : memref<2x2048xf32, #tpu.memory_space<vmem>>, vector<1x64xf32>
    tpu.vector_store %arg12[%c0_124, %c1024], %404 {strides = array<i32>} : memref<2x2048xf32, #tpu.memory_space<vmem>>, vector<1x64xf32>,
    %406 = vector.extract_strided_slice %371 {offsets = [17, 0], sizes = [1, 64], strides = [1, 1]} : vector<32x64xf32> to vector<1x64xf32>
    %c0_125 = arith.constant 0 : index
    %c1088 = arith.constant 1088 : index
    %407 = vector.load %arg12[%c0_125, %c1088] : memref<2x2048xf32, #tpu.memory_space<vmem>>, vector<1x64xf32>
    tpu.vector_store %arg12[%c0_125, %c1088], %406 {strides = array<i32>} : memref<2x2048xf32, #tpu.memory_space<vmem>>, vector<1x64xf32>,
    %408 = vector.extract_strided_slice %371 {offsets = [18, 0], sizes = [1, 64], strides = [1, 1]} : vector<32x64xf32> to vector<1x64xf32>
    %c0_126 = arith.constant 0 : index
    %c1152 = arith.constant 1152 : index
    %409 = vector.load %arg12[%c0_126, %c1152] : memref<2x2048xf32, #tpu.memory_space<vmem>>, vector<1x64xf32>
    tpu.vector_store %arg12[%c0_126, %c1152], %408 {strides = array<i32>} : memref<2x2048xf32, #tpu.memory_space<vmem>>, vector<1x64xf32>,
    %410 = vector.extract_strided_slice %371 {offsets = [19, 0], sizes = [1, 64], strides = [1, 1]} : vector<32x64xf32> to vector<1x64xf32>
    %c0_127 = arith.constant 0 : index
    %c1216 = arith.constant 1216 : index
    %411 = vector.load %arg12[%c0_127, %c1216] : memref<2x2048xf32, #tpu.memory_space<vmem>>, vector<1x64xf32>
    tpu.vector_store %arg12[%c0_127, %c1216], %410 {strides = array<i32>} : memref<2x2048xf32, #tpu.memory_space<vmem>>, vector<1x64xf32>,
    %412 = vector.extract_strided_slice %371 {offsets = [20, 0], sizes = [1, 64], strides = [1, 1]} : vector<32x64xf32> to vector<1x64xf32>
    %c0_128 = arith.constant 0 : index
    %c1280 = arith.constant 1280 : index
    %413 = vector.load %arg12[%c0_128, %c1280] : memref<2x2048xf32, #tpu.memory_space<vmem>>, vector<1x64xf32>
    tpu.vector_store %arg12[%c0_128, %c1280], %412 {strides = array<i32>} : memref<2x2048xf32, #tpu.memory_space<vmem>>, vector<1x64xf32>,
    %414 = vector.extract_strided_slice %371 {offsets = [21, 0], sizes = [1, 64], strides = [1, 1]} : vector<32x64xf32> to vector<1x64xf32>
    %c0_129 = arith.constant 0 : index
    %c1344 = arith.constant 1344 : index
    %415 = vector.load %arg12[%c0_129, %c1344] : memref<2x2048xf32, #tpu.memory_space<vmem>>, vector<1x64xf32>
    tpu.vector_store %arg12[%c0_129, %c1344], %414 {strides = array<i32>} : memref<2x2048xf32, #tpu.memory_space<vmem>>, vector<1x64xf32>,
    %416 = vector.extract_strided_slice %371 {offsets = [22, 0], sizes = [1, 64], strides = [1, 1]} : vector<32x64xf32> to vector<1x64xf32>
    %c0_130 = arith.constant 0 : index
    %c1408 = arith.constant 1408 : index
    %417 = vector.load %arg12[%c0_130, %c1408] : memref<2x2048xf32, #tpu.memory_space<vmem>>, vector<1x64xf32>
    tpu.vector_store %arg12[%c0_130, %c1408], %416 {strides = array<i32>} : memref<2x2048xf32, #tpu.memory_space<vmem>>, vector<1x64xf32>,
    %418 = vector.extract_strided_slice %371 {offsets = [23, 0], sizes = [1, 64], strides = [1, 1]} : vector<32x64xf32> to vector<1x64xf32>
    %c0_131 = arith.constant 0 : index
    %c1472 = arith.constant 1472 : index
    %419 = vector.load %arg12[%c0_131, %c1472] : memref<2x2048xf32, #tpu.memory_space<vmem>>, vector<1x64xf32>
    tpu.vector_store %arg12[%c0_131, %c1472], %418 {strides = array<i32>} : memref<2x2048xf32, #tpu.memory_space<vmem>>, vector<1x64xf32>,
    %420 = vector.extract_strided_slice %371 {offsets = [24, 0], sizes = [1, 64], strides = [1, 1]} : vector<32x64xf32> to vector<1x64xf32>
    %c0_132 = arith.constant 0 : index
    %c1536 = arith.constant 1536 : index
    %421 = vector.load %arg12[%c0_132, %c1536] : memref<2x2048xf32, #tpu.memory_space<vmem>>, vector<1x64xf32>
    tpu.vector_store %arg12[%c0_132, %c1536], %420 {strides = array<i32>} : memref<2x2048xf32, #tpu.memory_space<vmem>>, vector<1x64xf32>,
    %422 = vector.extract_strided_slice %371 {offsets = [25, 0], sizes = [1, 64], strides = [1, 1]} : vector<32x64xf32> to vector<1x64xf32>
    %c0_133 = arith.constant 0 : index
    %c1600 = arith.constant 1600 : index
    %423 = vector.load %arg12[%c0_133, %c1600] : memref<2x2048xf32, #tpu.memory_space<vmem>>, vector<1x64xf32>
    tpu.vector_store %arg12[%c0_133, %c1600], %422 {strides = array<i32>} : memref<2x2048xf32, #tpu.memory_space<vmem>>, vector<1x64xf32>,
    %424 = vector.extract_strided_slice %371 {offsets = [26, 0], sizes = [1, 64], strides = [1, 1]} : vector<32x64xf32> to vector<1x64xf32>
    %c0_134 = arith.constant 0 : index
    %c1664 = arith.constant 1664 : index
    %425 = vector.load %arg12[%c0_134, %c1664] : memref<2x2048xf32, #tpu.memory_space<vmem>>, vector<1x64xf32>
    tpu.vector_store %arg12[%c0_134, %c1664], %424 {strides = array<i32>} : memref<2x2048xf32, #tpu.memory_space<vmem>>, vector<1x64xf32>,
    %426 = vector.extract_strided_slice %371 {offsets = [27, 0], sizes = [1, 64], strides = [1, 1]} : vector<32x64xf32> to vector<1x64xf32>
    %c0_135 = arith.constant 0 : index
    %c1728 = arith.constant 1728 : index
    %427 = vector.load %arg12[%c0_135, %c1728] : memref<2x2048xf32, #tpu.memory_space<vmem>>, vector<1x64xf32>
    tpu.vector_store %arg12[%c0_135, %c1728], %426 {strides = array<i32>} : memref<2x2048xf32, #tpu.memory_space<vmem>>, vector<1x64xf32>,
    %428 = vector.extract_strided_slice %371 {offsets = [28, 0], sizes = [1, 64], strides = [1, 1]} : vector<32x64xf32> to vector<1x64xf32>
    %c0_136 = arith.constant 0 : index
    %c1792 = arith.constant 1792 : index
    %429 = vector.load %arg12[%c0_136, %c1792] : memref<2x2048xf32, #tpu.memory_space<vmem>>, vector<1x64xf32>
    tpu.vector_store %arg12[%c0_136, %c1792], %428 {strides = array<i32>} : memref<2x2048xf32, #tpu.memory_space<vmem>>, vector<1x64xf32>,
    %430 = vector.extract_strided_slice %371 {offsets = [29, 0], sizes = [1, 64], strides = [1, 1]} : vector<32x64xf32> to vector<1x64xf32>
    %c0_137 = arith.constant 0 : index
    %c1856 = arith.constant 1856 : index
    %431 = vector.load %arg12[%c0_137, %c1856] : memref<2x2048xf32, #tpu.memory_space<vmem>>, vector<1x64xf32>
    tpu.vector_store %arg12[%c0_137, %c1856], %430 {strides = array<i32>} : memref<2x2048xf32, #tpu.memory_space<vmem>>, vector<1x64xf32>,
    %432 = vector.extract_strided_slice %371 {offsets = [30, 0], sizes = [1, 64], strides = [1, 1]} : vector<32x64xf32> to vector<1x64xf32>
    %c0_138 = arith.constant 0 : index
    %c1920 = arith.constant 1920 : index
    %433 = vector.load %arg12[%c0_138, %c1920] : memref<2x2048xf32, #tpu.memory_space<vmem>>, vector<1x64xf32>
    tpu.vector_store %arg12[%c0_138, %c1920], %432 {strides = array<i32>} : memref<2x2048xf32, #tpu.memory_space<vmem>>, vector<1x64xf32>,
    %434 = vector.extract_strided_slice %371 {offsets = [31, 0], sizes = [1, 64], strides = [1, 1]} : vector<32x64xf32> to vector<1x64xf32>
    %c0_139 = arith.constant 0 : index
    %c1984 = arith.constant 1984 : index
    %435 = vector.load %arg12[%c0_139, %c1984] : memref<2x2048xf32, #tpu.memory_space<vmem>>, vector<1x64xf32>
    tpu.vector_store %arg12[%c0_139, %c1984], %434 {strides = array<i32>} : memref<2x2048xf32, #tpu.memory_space<vmem>>, vector<1x64xf32>,
    %436 = vector.extract_strided_slice %359 {offsets = [8, 0], sizes = [8, 32], strides = [1, 1]} : vector<16x32xf32> to vector<8x32xf32>
    %cst_140 = arith.constant dense<0xFF800000> : vector<32xf32>
    %437 = vector.multi_reduction <maximumf>, %436, %cst_140 [0] : vector<8x32xf32> to vector<32xf32>
    %438 = vector.shape_cast %437 : vector<32xf32> to vector<1x32xf32>
    %439 = vector.broadcast %438 : vector<1x32xf32> to vector<8x32xf32>
    %440 = arith.subf %436, %439 : vector<8x32xf32>
    %441 = math.exp %440 : vector<8x32xf32>
    %cst_141 = arith.constant dense<0.000000e+00> : vector<32xf32>
    %442 = vector.multi_reduction <add>, %441, %cst_141 [0] : vector<8x32xf32> to vector<32xf32>
    %443 = vector.shape_cast %442 : vector<32xf32> to vector<1x32xf32>
    %444 = vector.broadcast %443 : vector<1x32xf32> to vector<8x32xf32>
    %445 = arith.divf %441, %444 : vector<8x32xf32>
    %446 = vector.extract_strided_slice %348 {offsets = [8, 0], sizes = [8, 64], strides = [1, 1]} : vector<16x64xf32> to vector<8x64xf32>
    %cst_142 = arith.constant dense<0.000000e+00> : vector<32x64xf32>
    %447 = tpu.matmul %445, %446, %cst_142 {dimension_numbers = #tpu.dot_dimension_numbers<[0], [0], [1], [1], [0, 1, 1, 1], [], []>} : vector<8x32xf32>, vector<8x64xf32>, vector<32x64xf32> -> vector<32x64xf32>
    %448 = vector.extract_strided_slice %447 {offsets = [0, 0], sizes = [1, 64], strides = [1, 1]} : vector<32x64xf32> to vector<1x64xf32>
    %c1_143 = arith.constant 1 : index
    %c0_144 = arith.constant 0 : index
    %449 = vector.load %arg12[%c1_143, %c0_144] : memref<2x2048xf32, #tpu.memory_space<vmem>>, vector<1x64xf32>
    tpu.vector_store %arg12[%c1_143, %c0_144], %448 {strides = array<i32>} : memref<2x2048xf32, #tpu.memory_space<vmem>>, vector<1x64xf32>,
    %450 = vector.extract_strided_slice %447 {offsets = [1, 0], sizes = [1, 64], strides = [1, 1]} : vector<32x64xf32> to vector<1x64xf32>
    %c1_145 = arith.constant 1 : index
    %c64_146 = arith.constant 64 : index
    %451 = vector.load %arg12[%c1_145, %c64_146] : memref<2x2048xf32, #tpu.memory_space<vmem>>, vector<1x64xf32>
    tpu.vector_store %arg12[%c1_145, %c64_146], %450 {strides = array<i32>} : memref<2x2048xf32, #tpu.memory_space<vmem>>, vector<1x64xf32>,
    %452 = vector.extract_strided_slice %447 {offsets = [2, 0], sizes = [1, 64], strides = [1, 1]} : vector<32x64xf32> to vector<1x64xf32>
    %c1_147 = arith.constant 1 : index
    %c128_148 = arith.constant 128 : index
    %453 = vector.load %arg12[%c1_147, %c128_148] : memref<2x2048xf32, #tpu.memory_space<vmem>>, vector<1x64xf32>
    tpu.vector_store %arg12[%c1_147, %c128_148], %452 {strides = array<i32>} : memref<2x2048xf32, #tpu.memory_space<vmem>>, vector<1x64xf32>,
    %454 = vector.extract_strided_slice %447 {offsets = [3, 0], sizes = [1, 64], strides = [1, 1]} : vector<32x64xf32> to vector<1x64xf32>
    %c1_149 = arith.constant 1 : index
    %c192_150 = arith.constant 192 : index
    %455 = vector.load %arg12[%c1_149, %c192_150] : memref<2x2048xf32, #tpu.memory_space<vmem>>, vector<1x64xf32>
    tpu.vector_store %arg12[%c1_149, %c192_150], %454 {strides = array<i32>} : memref<2x2048xf32, #tpu.memory_space<vmem>>, vector<1x64xf32>,
    %456 = vector.extract_strided_slice %447 {offsets = [4, 0], sizes = [1, 64], strides = [1, 1]} : vector<32x64xf32> to vector<1x64xf32>
    %c1_151 = arith.constant 1 : index
    %c256_152 = arith.constant 256 : index
    %457 = vector.load %arg12[%c1_151, %c256_152] : memref<2x2048xf32, #tpu.memory_space<vmem>>, vector<1x64xf32>
    tpu.vector_store %arg12[%c1_151, %c256_152], %456 {strides = array<i32>} : memref<2x2048xf32, #tpu.memory_space<vmem>>, vector<1x64xf32>,
    %458 = vector.extract_strided_slice %447 {offsets = [5, 0], sizes = [1, 64], strides = [1, 1]} : vector<32x64xf32> to vector<1x64xf32>
    %c1_153 = arith.constant 1 : index
    %c320_154 = arith.constant 320 : index
    %459 = vector.load %arg12[%c1_153, %c320_154] : memref<2x2048xf32, #tpu.memory_space<vmem>>, vector<1x64xf32>
    tpu.vector_store %arg12[%c1_153, %c320_154], %458 {strides = array<i32>} : memref<2x2048xf32, #tpu.memory_space<vmem>>, vector<1x64xf32>,
    %460 = vector.extract_strided_slice %447 {offsets = [6, 0], sizes = [1, 64], strides = [1, 1]} : vector<32x64xf32> to vector<1x64xf32>
    %c1_155 = arith.constant 1 : index
    %c384_156 = arith.constant 384 : index
    %461 = vector.load %arg12[%c1_155, %c384_156] : memref<2x2048xf32, #tpu.memory_space<vmem>>, vector<1x64xf32>
    tpu.vector_store %arg12[%c1_155, %c384_156], %460 {strides = array<i32>} : memref<2x2048xf32, #tpu.memory_space<vmem>>, vector<1x64xf32>,
    %462 = vector.extract_strided_slice %447 {offsets = [7, 0], sizes = [1, 64], strides = [1, 1]} : vector<32x64xf32> to vector<1x64xf32>
    %c1_157 = arith.constant 1 : index
    %c448_158 = arith.constant 448 : index
    %463 = vector.load %arg12[%c1_157, %c448_158] : memref<2x2048xf32, #tpu.memory_space<vmem>>, vector<1x64xf32>
    tpu.vector_store %arg12[%c1_157, %c448_158], %462 {strides = array<i32>} : memref<2x2048xf32, #tpu.memory_space<vmem>>, vector<1x64xf32>,
    %464 = vector.extract_strided_slice %447 {offsets = [8, 0], sizes = [1, 64], strides = [1, 1]} : vector<32x64xf32> to vector<1x64xf32>
    %c1_159 = arith.constant 1 : index
    %c512_160 = arith.constant 512 : index
    %465 = vector.load %arg12[%c1_159, %c512_160] : memref<2x2048xf32, #tpu.memory_space<vmem>>, vector<1x64xf32>
    tpu.vector_store %arg12[%c1_159, %c512_160], %464 {strides = array<i32>} : memref<2x2048xf32, #tpu.memory_space<vmem>>, vector<1x64xf32>,
    %466 = vector.extract_strided_slice %447 {offsets = [9, 0], sizes = [1, 64], strides = [1, 1]} : vector<32x64xf32> to vector<1x64xf32>
    %c1_161 = arith.constant 1 : index
    %c576_162 = arith.constant 576 : index
    %467 = vector.load %arg12[%c1_161, %c576_162] : memref<2x2048xf32, #tpu.memory_space<vmem>>, vector<1x64xf32>
    tpu.vector_store %arg12[%c1_161, %c576_162], %466 {strides = array<i32>} : memref<2x2048xf32, #tpu.memory_space<vmem>>, vector<1x64xf32>,
    %468 = vector.extract_strided_slice %447 {offsets = [10, 0], sizes = [1, 64], strides = [1, 1]} : vector<32x64xf32> to vector<1x64xf32>
    %c1_163 = arith.constant 1 : index
    %c640_164 = arith.constant 640 : index
    %469 = vector.load %arg12[%c1_163, %c640_164] : memref<2x2048xf32, #tpu.memory_space<vmem>>, vector<1x64xf32>
    tpu.vector_store %arg12[%c1_163, %c640_164], %468 {strides = array<i32>} : memref<2x2048xf32, #tpu.memory_space<vmem>>, vector<1x64xf32>,
    %470 = vector.extract_strided_slice %447 {offsets = [11, 0], sizes = [1, 64], strides = [1, 1]} : vector<32x64xf32> to vector<1x64xf32>
    %c1_165 = arith.constant 1 : index
    %c704_166 = arith.constant 704 : index
    %471 = vector.load %arg12[%c1_165, %c704_166] : memref<2x2048xf32, #tpu.memory_space<vmem>>, vector<1x64xf32>
    tpu.vector_store %arg12[%c1_165, %c704_166], %470 {strides = array<i32>} : memref<2x2048xf32, #tpu.memory_space<vmem>>, vector<1x64xf32>,
    %472 = vector.extract_strided_slice %447 {offsets = [12, 0], sizes = [1, 64], strides = [1, 1]} : vector<32x64xf32> to vector<1x64xf32>
    %c1_167 = arith.constant 1 : index
    %c768_168 = arith.constant 768 : index
    %473 = vector.load %arg12[%c1_167, %c768_168] : memref<2x2048xf32, #tpu.memory_space<vmem>>, vector<1x64xf32>
    tpu.vector_store %arg12[%c1_167, %c768_168], %472 {strides = array<i32>} : memref<2x2048xf32, #tpu.memory_space<vmem>>, vector<1x64xf32>,
    %474 = vector.extract_strided_slice %447 {offsets = [13, 0], sizes = [1, 64], strides = [1, 1]} : vector<32x64xf32> to vector<1x64xf32>
    %c1_169 = arith.constant 1 : index
    %c832_170 = arith.constant 832 : index
    %475 = vector.load %arg12[%c1_169, %c832_170] : memref<2x2048xf32, #tpu.memory_space<vmem>>, vector<1x64xf32>
    tpu.vector_store %arg12[%c1_169, %c832_170], %474 {strides = array<i32>} : memref<2x2048xf32, #tpu.memory_space<vmem>>, vector<1x64xf32>,
    %476 = vector.extract_strided_slice %447 {offsets = [14, 0], sizes = [1, 64], strides = [1, 1]} : vector<32x64xf32> to vector<1x64xf32>
    %c1_171 = arith.constant 1 : index
    %c896_172 = arith.constant 896 : index
    %477 = vector.load %arg12[%c1_171, %c896_172] : memref<2x2048xf32, #tpu.memory_space<vmem>>, vector<1x64xf32>
    tpu.vector_store %arg12[%c1_171, %c896_172], %476 {strides = array<i32>} : memref<2x2048xf32, #tpu.memory_space<vmem>>, vector<1x64xf32>,
    %478 = vector.extract_strided_slice %447 {offsets = [15, 0], sizes = [1, 64], strides = [1, 1]} : vector<32x64xf32> to vector<1x64xf32>
    %c1_173 = arith.constant 1 : index
    %c960_174 = arith.constant 960 : index
    %479 = vector.load %arg12[%c1_173, %c960_174] : memref<2x2048xf32, #tpu.memory_space<vmem>>, vector<1x64xf32>
    tpu.vector_store %arg12[%c1_173, %c960_174], %478 {strides = array<i32>} : memref<2x2048xf32, #tpu.memory_space<vmem>>, vector<1x64xf32>,
    %480 = vector.extract_strided_slice %447 {offsets = [16, 0], sizes = [1, 64], strides = [1, 1]} : vector<32x64xf32> to vector<1x64xf32>
    %c1_175 = arith.constant 1 : index
    %c1024_176 = arith.constant 1024 : index
    %481 = vector.load %arg12[%c1_175, %c1024_176] : memref<2x2048xf32, #tpu.memory_space<vmem>>, vector<1x64xf32>
    tpu.vector_store %arg12[%c1_175, %c1024_176], %480 {strides = array<i32>} : memref<2x2048xf32, #tpu.memory_space<vmem>>, vector<1x64xf32>,
    %482 = vector.extract_strided_slice %447 {offsets = [17, 0], sizes = [1, 64], strides = [1, 1]} : vector<32x64xf32> to vector<1x64xf32>
    %c1_177 = arith.constant 1 : index
    %c1088_178 = arith.constant 1088 : index
    %483 = vector.load %arg12[%c1_177, %c1088_178] : memref<2x2048xf32, #tpu.memory_space<vmem>>, vector<1x64xf32>
    tpu.vector_store %arg12[%c1_177, %c1088_178], %482 {strides = array<i32>} : memref<2x2048xf32, #tpu.memory_space<vmem>>, vector<1x64xf32>,
    %484 = vector.extract_strided_slice %447 {offsets = [18, 0], sizes = [1, 64], strides = [1, 1]} : vector<32x64xf32> to vector<1x64xf32>
    %c1_179 = arith.constant 1 : index
    %c1152_180 = arith.constant 1152 : index
    %485 = vector.load %arg12[%c1_179, %c1152_180] : memref<2x2048xf32, #tpu.memory_space<vmem>>, vector<1x64xf32>
    tpu.vector_store %arg12[%c1_179, %c1152_180], %484 {strides = array<i32>} : memref<2x2048xf32, #tpu.memory_space<vmem>>, vector<1x64xf32>,
    %486 = vector.extract_strided_slice %447 {offsets = [19, 0], sizes = [1, 64], strides = [1, 1]} : vector<32x64xf32> to vector<1x64xf32>
    %c1_181 = arith.constant 1 : index
    %c1216_182 = arith.constant 1216 : index
    %487 = vector.load %arg12[%c1_181, %c1216_182] : memref<2x2048xf32, #tpu.memory_space<vmem>>, vector<1x64xf32>
    tpu.vector_store %arg12[%c1_181, %c1216_182], %486 {strides = array<i32>} : memref<2x2048xf32, #tpu.memory_space<vmem>>, vector<1x64xf32>,
    %488 = vector.extract_strided_slice %447 {offsets = [20, 0], sizes = [1, 64], strides = [1, 1]} : vector<32x64xf32> to vector<1x64xf32>
    %c1_183 = arith.constant 1 : index
    %c1280_184 = arith.constant 1280 : index
    %489 = vector.load %arg12[%c1_183, %c1280_184] : memref<2x2048xf32, #tpu.memory_space<vmem>>, vector<1x64xf32>
    tpu.vector_store %arg12[%c1_183, %c1280_184], %488 {strides = array<i32>} : memref<2x2048xf32, #tpu.memory_space<vmem>>, vector<1x64xf32>,
    %490 = vector.extract_strided_slice %447 {offsets = [21, 0], sizes = [1, 64], strides = [1, 1]} : vector<32x64xf32> to vector<1x64xf32>
    %c1_185 = arith.constant 1 : index
    %c1344_186 = arith.constant 1344 : index
    %491 = vector.load %arg12[%c1_185, %c1344_186] : memref<2x2048xf32, #tpu.memory_space<vmem>>, vector<1x64xf32>
    tpu.vector_store %arg12[%c1_185, %c1344_186], %490 {strides = array<i32>} : memref<2x2048xf32, #tpu.memory_space<vmem>>, vector<1x64xf32>,
    %492 = vector.extract_strided_slice %447 {offsets = [22, 0], sizes = [1, 64], strides = [1, 1]} : vector<32x64xf32> to vector<1x64xf32>
    %c1_187 = arith.constant 1 : index
    %c1408_188 = arith.constant 1408 : index
    %493 = vector.load %arg12[%c1_187, %c1408_188] : memref<2x2048xf32, #tpu.memory_space<vmem>>, vector<1x64xf32>
    tpu.vector_store %arg12[%c1_187, %c1408_188], %492 {strides = array<i32>} : memref<2x2048xf32, #tpu.memory_space<vmem>>, vector<1x64xf32>,
    %494 = vector.extract_strided_slice %447 {offsets = [23, 0], sizes = [1, 64], strides = [1, 1]} : vector<32x64xf32> to vector<1x64xf32>
    %c1_189 = arith.constant 1 : index
    %c1472_190 = arith.constant 1472 : index
    %495 = vector.load %arg12[%c1_189, %c1472_190] : memref<2x2048xf32, #tpu.memory_space<vmem>>, vector<1x64xf32>
    tpu.vector_store %arg12[%c1_189, %c1472_190], %494 {strides = array<i32>} : memref<2x2048xf32, #tpu.memory_space<vmem>>, vector<1x64xf32>,
    %496 = vector.extract_strided_slice %447 {offsets = [24, 0], sizes = [1, 64], strides = [1, 1]} : vector<32x64xf32> to vector<1x64xf32>
    %c1_191 = arith.constant 1 : index
    %c1536_192 = arith.constant 1536 : index
    %497 = vector.load %arg12[%c1_191, %c1536_192] : memref<2x2048xf32, #tpu.memory_space<vmem>>, vector<1x64xf32>
    tpu.vector_store %arg12[%c1_191, %c1536_192], %496 {strides = array<i32>} : memref<2x2048xf32, #tpu.memory_space<vmem>>, vector<1x64xf32>,
    %498 = vector.extract_strided_slice %447 {offsets = [25, 0], sizes = [1, 64], strides = [1, 1]} : vector<32x64xf32> to vector<1x64xf32>
    %c1_193 = arith.constant 1 : index
    %c1600_194 = arith.constant 1600 : index
    %499 = vector.load %arg12[%c1_193, %c1600_194] : memref<2x2048xf32, #tpu.memory_space<vmem>>, vector<1x64xf32>
    tpu.vector_store %arg12[%c1_193, %c1600_194], %498 {strides = array<i32>} : memref<2x2048xf32, #tpu.memory_space<vmem>>, vector<1x64xf32>,
    %500 = vector.extract_strided_slice %447 {offsets = [26, 0], sizes = [1, 64], strides = [1, 1]} : vector<32x64xf32> to vector<1x64xf32>
    %c1_195 = arith.constant 1 : index
    %c1664_196 = arith.constant 1664 : index
    %501 = vector.load %arg12[%c1_195, %c1664_196] : memref<2x2048xf32, #tpu.memory_space<vmem>>, vector<1x64xf32>
    tpu.vector_store %arg12[%c1_195, %c1664_196], %500 {strides = array<i32>} : memref<2x2048xf32, #tpu.memory_space<vmem>>, vector<1x64xf32>,
    %502 = vector.extract_strided_slice %447 {offsets = [27, 0], sizes = [1, 64], strides = [1, 1]} : vector<32x64xf32> to vector<1x64xf32>
    %c1_197 = arith.constant 1 : index
    %c1728_198 = arith.constant 1728 : index
    %503 = vector.load %arg12[%c1_197, %c1728_198] : memref<2x2048xf32, #tpu.memory_space<vmem>>, vector<1x64xf32>
    tpu.vector_store %arg12[%c1_197, %c1728_198], %502 {strides = array<i32>} : memref<2x2048xf32, #tpu.memory_space<vmem>>, vector<1x64xf32>,
    %504 = vector.extract_strided_slice %447 {offsets = [28, 0], sizes = [1, 64], strides = [1, 1]} : vector<32x64xf32> to vector<1x64xf32>
    %c1_199 = arith.constant 1 : index
    %c1792_200 = arith.constant 1792 : index
    %505 = vector.load %arg12[%c1_199, %c1792_200] : memref<2x2048xf32, #tpu.memory_space<vmem>>, vector<1x64xf32>
    tpu.vector_store %arg12[%c1_199, %c1792_200], %504 {strides = array<i32>} : memref<2x2048xf32, #tpu.memory_space<vmem>>, vector<1x64xf32>,
    %506 = vector.extract_strided_slice %447 {offsets = [29, 0], sizes = [1, 64], strides = [1, 1]} : vector<32x64xf32> to vector<1x64xf32>
    %c1_201 = arith.constant 1 : index
    %c1856_202 = arith.constant 1856 : index
    %507 = vector.load %arg12[%c1_201, %c1856_202] : memref<2x2048xf32, #tpu.memory_space<vmem>>, vector<1x64xf32>
    tpu.vector_store %arg12[%c1_201, %c1856_202], %506 {strides = array<i32>} : memref<2x2048xf32, #tpu.memory_space<vmem>>, vector<1x64xf32>,
    %508 = vector.extract_strided_slice %447 {offsets = [30, 0], sizes = [1, 64], strides = [1, 1]} : vector<32x64xf32> to vector<1x64xf32>
    %c1_203 = arith.constant 1 : index
    %c1920_204 = arith.constant 1920 : index
    %509 = vector.load %arg12[%c1_203, %c1920_204] : memref<2x2048xf32, #tpu.memory_space<vmem>>, vector<1x64xf32>
    tpu.vector_store %arg12[%c1_203, %c1920_204], %508 {strides = array<i32>} : memref<2x2048xf32, #tpu.memory_space<vmem>>, vector<1x64xf32>,
    %510 = vector.extract_strided_slice %447 {offsets = [31, 0], sizes = [1, 64], strides = [1, 1]} : vector<32x64xf32> to vector<1x64xf32>
    %c1_205 = arith.constant 1 : index
    %c1984_206 = arith.constant 1984 : index
    %511 = vector.load %arg12[%c1_205, %c1984_206] : memref<2x2048xf32, #tpu.memory_space<vmem>>, vector<1x64xf32>
    tpu.vector_store %arg12[%c1_205, %c1984_206], %510 {strides = array<i32>} : memref<2x2048xf32, #tpu.memory_space<vmem>>, vector<1x64xf32>,
    %c0_207 = arith.constant 0 : index
    %c0_208 = arith.constant 0 : index
    %512 = vector.load %arg12[%c0_207, %c0_208] : memref<2x2048xf32, #tpu.memory_space<vmem>>, vector<2x2048xf32>
    %c0_209 = arith.constant 0 : index
    %c0_210 = arith.constant 0 : index
    %513 = vector.load %arg8[%c0_209, %c0_210] : memref<2048x128xf32, #tpu.memory_space<vmem>>, vector<2048x128xf32>
    %cst_211 = arith.constant dense<0.000000e+00> : vector<2x128xf32>
    %514 = tpu.matmul %512, %513, %cst_211 {dimension_numbers = #tpu.dot_dimension_numbers<[1], [0], [0], [1], [0, 0, 1, 1], [], []>} : vector<2x2048xf32>, vector<2048x128xf32>, vector<2x128xf32> -> vector<2x128xf32>
    %c0_212 = arith.constant 0 : index
    %c0_213 = arith.constant 0 : index
    %515 = vector.load %arg9[%c0_212, %c0_213] : memref<1x128xf32, #tpu.memory_space<vmem>>, vector<1x128xf32>
    %516 = vector.broadcast %515 : vector<1x128xf32> to vector<2x128xf32>
    %517 = arith.addf %514, %516 : vector<2x128xf32>
    %c0_214 = arith.constant 0 : index
    %c0_215 = arith.constant 0 : index
    %518 = vector.load %arg10[%c0_214, %c0_215] : memref<2x128xf32, #tpu.memory_space<vmem>>, vector<2x128xf32>
    tpu.vector_store %arg10[%c0_214, %c0_215], %517 {strides = array<i32>} : memref<2x128xf32, #tpu.memory_space<vmem>>, vector<2x128xf32>,
    return
  }
}

</mosaic_0001>

<bundles_post_ra>
// kernel: tpu_custom_call.1
= control target key start
LH: loop header
LB: loop body
LE: loop exit
PB: predicated region body
PF: predicated region fallthrough
CT: control target
= control target key end

     0   :  { %15 = vsyncpa [#allocation5], 0  ;;  %s5295_s0 = inlined_call_operand.vmem [shape: f32[16,32], index: 0, kind: input, shape index: {}]   ;;  %s5296_s1 = inlined_call_operand.vmem [shape: f32[32,256], index: 1, kind: input, shape index: {}]   ;;  %s5297_s2 = inlined_call_operand.vmem [shape: f32[64,256], index: 2, kind: input, shape index: {}]   ;;  %s5298_s3 = inlined_call_operand.vmem [shape: f32[1,256], index: 3, kind: input, shape index: {}]   ;;  %s5299_s4 = inlined_call_operand.vmem [shape: f32[64,384], index: 4, kind: input, shape index: {}]   ;;  %s5300_s5 = inlined_call_operand.vmem [shape: f32[1,384], index: 5, kind: input, shape index: {}]   ;;  %s5301_s6 = inlined_call_operand.vmem [shape: f32[384,32], index: 6, kind: input, shape index: {}]   ;;  %s5302_s7 = inlined_call_operand.vmem [shape: f32[1,32], index: 7, kind: input, shape index: {}]   ;;  %s5303_s8 = inlined_call_operand.hbm [shape: f32[2048,128], index: 8, kind: input, shape index: {}]   ;;  %s5304_s9 = inlined_call_operand.vmem [shape: f32[1,128], index: 9, kind: input, shape index: {}]   ;;  %s5305_s10 = inlined_call_operand.hbm [shape: f32[2,128], index: 10, kind: output, shape index: {}]  }
   0x1   :  { %16 = vsyncpa [#allocation6], 0  ;;  %s4355_s13 = smov [#allocation4]   ;;  %s4307_s17 = scalar_lea.hbm %s5303_s8, 32768 }
   0x2   :  { %s38_s14 = sshll.u32 %s4355_s13, 4  ;;  %p4308_p0 = scmp.ne.s32.totalorder %s5303_s8, %s4307_s17  ;;  %s39_s14 = int_to_ptr.vmem [resolvable:$true] %s38_s14 }
   0x3   :  { %p4311_p1 = scmp.lt.u32.totalorder %s4307_s17, %s5303_s8 }
   0x5   :  { %p4313_p2 = pnand %p4311_p1, %p4308_p0 }
   0x7   :  { %4316 = shalt.err (!%p4313_p2)
}
   0x8   :  { %s4317_s22 = scalar_lea.vmem %s39_s14, 32768  ;;  %p4322_p4 = scmp.lt.s32.totalorder %s39_s14, %s39_s14 }
   0x9   :  { %p4318_p3 = scmp.ne.s32.totalorder %s39_s14, %s4317_s22  ;;  %p4323_p5 = scmp.lt.s32.totalorder %s4317_s22, %s4317_s22 }
   0xb   :  { %p4324_p6 = por %p4323_p5, %p4322_p4 }
   0xd   :  { %p4325_p7 = pnand %p4324_p6, %p4318_p3 }
   0xf   :  { %4328 = shalt.err (!%p4325_p7)
}
  0x10   :  { %s4356_s23 = smov 128   ;;  %s4357_s24 = smov 8  }
  0x11   :  { %44 = dma.hbm_to_vmem [thread:$0]  %s5303_s8, 32768, %s39_s14, [#allocation5], %s4356_s23, %s4356_s23, %s4357_s24  }
  0x12   :  { %4351 = dma.done.wait [#allocation5], 32768  }
  0x13   :  { %4352 = vsyncadd [#allocation5], 4294934528  ;;  %v4358_v0 = vmov 0.0   ;;  %v53_v1 = vld [vmem:[%s5296_s1 + $0x8] sm:$0xff]  ;;  %v55_v2 = vld [vmem:[%s5296_s1 + $0x18] sm:$0xff]  ;;  %vm5306_vm0 = vcmask 261120   ;;  %v62_v39 = vlaneseq }
  0x14   :  { %143 = vmatprep.mubr.f32.mxu0 %v4358_v0  ;;  %281 = vmatprep.mubr.f32.mxu1 %v4358_v0  ;;  %v186_v3 = vld [vmem:[%s5297_s2 + $0x8] sm:$0xff]  ;;  %v3694_v4 = vpack.c.bf16 %v55_v2, %v53_v1  ;;  %v188_v5 = vld [vmem:[%s5297_s2 + $0x18] sm:$0xff]  ;;  %v52_v6 = vld [vmem:[%s5296_s1] sm:$0xff]  ;;  %vm316_vm3 = vcmask 253952   ;;  %vm318_vm4 = vcmask 516352   ;;  %vm320_vm5 = vcmask 254977  }
  0x15   :  { %v54_v7 = vld [vmem:[%s5296_s1 + $0x10] sm:$0xff]  ;;  %v4449_v8 = vpack.c.bf16 %v188_v5, %v186_v3  ;;  %v185_v10 = vld [vmem:[%s5297_s2] sm:$0xff]  ;;  %v57_v12 = vld [vmem:[%s5296_s1 + $0x28] sm:$0xff]  ;;  %v4557_v40 = vshrl.u32 %v62_v39, 7  ;;  %v157_v42 = vand.u32 127, %v62_v39  ;;  %vm322_vm6 = vcmask 517377  }
  0x16   :  { %v3696_v9 = vpack.c.bf16 %v54_v7, %v52_v6  ;;  %v187_v11 = vld [vmem:[%s5297_s2 + $0x10] sm:$0xff]  ;;  %3695 = vmatprep.subr.bf16.mxu0 %v3694_v4  ;;  %v59_v14 = vld [vmem:[%s5296_s1 + $0x38] sm:$0xff]  ;;  %v190_v15 = vld [vmem:[%s5297_s2 + $0x28] sm:$0xff]  ;;  %vm5307_vm7 = vcmask 523264   ;;  %vm440_vm8 = vcmask 256002   ;;  %vm442_vm9 = vcmask 518402  }
  0x17   :  { %v4460_v13 = vpack.c.bf16 %v187_v11, %v185_v10  ;;  %v192_v16 = vld [vmem:[%s5297_s2 + $0x38] sm:$0xff]  ;;  %3703 = vmatprep.subr.bf16.mxu1 %v4449_v8  ;;  %v3698_v17 = vpack.c.bf16 %v59_v14, %v57_v12  ;;  %v56_v19 = vld [vmem:[%s5296_s1 + $0x20] sm:$0xff]  ;;  %v58_v20 = vld [vmem:[%s5296_s1 + $0x30] sm:$0xff]  ;;  %v64_v41 = vsub.s32 0, %v4557_v40  ;;  %v68_v44 = vsub.s32 1, %v4557_v40 }
  0x18   :  { %3697 = vmatpush1.bf16.msra.mxu0 %v3696_v9  ;;  %v4472_v18 = vpack.c.bf16 %v192_v16, %v190_v15  ;;  %v189_v21 = vld [vmem:[%s5297_s2 + $0x20] sm:$0xff]  ;;  %v3700_v22 = vpack.c.bf16 %v58_v20, %v56_v19  ;;  %v191_v23 = vld [vmem:[%s5297_s2 + $0x30] sm:$0xff]  ;;  %v194_v24 = vld [vmem:[%s5297_s2 + $0x48] sm:$0xff]  ;;  %v158_v46 = vadd.s32 128, %v157_v42  ;;  %v163_v49 = vand.u32 63, %v157_v42 }
  0x19   :  { %3705 = vmatpush1.bf16.msra.mxu1 %v4460_v13  ;;  %3699 = vmatprep.subr.bf16.mxu0 %v3698_v17  ;;  %v4491_v25 = vpack.c.bf16 %v191_v23, %v189_v21  ;;  %v196_v26 = vld [vmem:[%s5297_s2 + $0x58] sm:$0xff]  ;;  %v193_v27 = vld [vmem:[%s5297_s2 + $0x40] sm:$0xff]  ;;  %v195_v28 = vld [vmem:[%s5297_s2 + $0x50] sm:$0xff]  ;;  %vm444_vm10 = vcmask 257027   ;;  %vm446_vm11 = vcmask 519427   ;;  %vm682_vm12 = vcmask 260102  }
  0x1a   :  { %3707 = vmatprep.subr.bf16.mxu1 %v4472_v18  ;;  %v4502_v29 = vpack.c.bf16 %v196_v26, %v194_v24  ;;  %v198_v30 = vld [vmem:[%s5297_s2 + $0x68] sm:$0xff]  ;;  %v200_v31 = vld [vmem:[%s5297_s2 + $0x78] sm:$0xff]  ;;  %v50_v32 = vld [vmem:[%s5295_s0] sm:$0xff]  ;;  %v4514_v33 = vpack.c.bf16 %v195_v28, %v193_v27  ;;  %v170_v52 = vand.u32 63, %v158_v46  ;;  %vm4568_vm1 = vcmp.lt.s32.totalorder %v163_v49, 32 }
  0x1b   :  { %v4518_v34 = vpack.c.bf16 %v200_v31, %v198_v30  ;;  %v197_v35 = vld [vmem:[%s5297_s2 + $0x60] sm:$0xff]  ;;  %v199_v36 = vld [vmem:[%s5297_s2 + $0x70] sm:$0xff]  ;;  %v51_v37 = vld [vmem:[%s5295_s0 + $0x8] sm:$0xff]  ;;  %vm684_vm13 = vcmask 522502   ;;  %vm686_vm14 = vcmask 261127   ;;  %vm688_vm15 = vcmask 523527  }
  0x1c   :  { %3701 = vmatpush1.bf16.msra.mxu0 %v3700_v22  ;;  %v4533_v38 = vpack.c.bf16 %v199_v36, %v197_v35  ;;  %v60_v43 = vld [vmem:[%s5298_s3] sm:$0x3]  ;;  %vm4572_vm2 = vcmp.lt.s32.totalorder %v170_v52, 32  ;;  %s4359_s3 = smov 64  }
  0x1d   :  { %3709 = vmatpush1.bf16.msra.mxu1 %v4491_v25  ;;  %3719 = vmatprep.subr.bf16.mxu0 %v4449_v8  ;;  %v65_v45 = vrot.slane %v60_v43, %v64_v41  ;;  %v69_v47 = vrot.slane %v60_v43, %v68_v44 }
  0x1e   :  { %3711 = vmatprep.subr.bf16.mxu1 %v4502_v29 }
  0x1f   :  { %3197 = vmatmul.mubr.msk.f32.vlgmr.msra.gmra.mrb[0].mxu0 %vm5306_vm0, %v50_v32 }
  0x20   :  { %149 = vmatprep.mubr.f32.mxu0 %v4358_v0  ;;  %3721 = vmatpush1.bf16.msra.mxu0 %v4460_v13 }
  0x21   :  { %3713 = vmatpush1.bf16.msra.mxu1 %v4514_v33  ;;  %3723 = vmatprep.subr.bf16.mxu0 %v4472_v18 }
  0x22   :  { %3715 = vmatprep.subr.bf16.mxu1 %v4518_v34 }
  0x23   :  { %3198 = vmatmul.mubr.msk.f32.gmra.mrb[2].mxu0 %vm5306_vm0, %v51_v37  ;;  %vm565_vm0 = vcmask 259077  }
  0x24   :  { %3725 = vmatpush1.bf16.msra.mxu0 %v4491_v25  ;;  %396 = vmatprep.mubr.f32.mxu0 %v4358_v0 }
  0x25   :  { %3717 = vmatpush1.bf16.msra.mxu1 %v4533_v38  ;;  %3727 = vmatprep.subr.bf16.mxu0 %v4502_v29 }
  0x26   :  { %3735 = vmatprep.subr.bf16.mxu1 %v4449_v8 }
  0x28   :  { %282 = vmatmul.mubr.f32.vlgmr.msra.gmra.mrb[0].mxu1 %v4358_v0  ;;  %3729 = vmatpush1.bf16.msra.mxu0 %v4514_v33 }
  0x29   :  { %3731 = vmatprep.subr.bf16.mxu0 %v4518_v34  ;;  %3737 = vmatpush1.bf16.msra.mxu1 %v4460_v13 }
  0x2a   :  { %3739 = vmatprep.subr.bf16.mxu1 %v4472_v18  ;;  %517 = vmatprep.mubr.f32.mxu1 %v4358_v0 }
  0x2c   :  { %3733 = vmatpush1.bf16.msra.mxu0 %v4533_v38 }
  0x2d   :  { %3741 = vmatpush1.bf16.msra.mxu1 %v4491_v25  ;;  %3751 = vmatprep.subr.bf16.mxu0 %v4449_v8 }
  0x2e   :  { %3743 = vmatprep.subr.bf16.mxu1 %v4502_v29 }
  0x31   :  { %3745 = vmatpush1.bf16.msra.mxu1 %v4514_v33 }
  0x32   :  { %3747 = vmatprep.subr.bf16.mxu1 %v4518_v34 }
  0x35   :  { %3749 = vmatpush1.bf16.msra.mxu1 %v4533_v38 }
  0x36   :  { %3767 = vmatprep.subr.bf16.mxu1 %v4449_v8 }
  0xf2   :  { %v145_v48 = vpop.f32.mrb[0].mxu0 }
  0xf3   :  { %v146_v50 = vadd.f32 %v145_v48, %v65_v45  ;;  %v147_v51 = vpop.f32.mrb[1].mxu0 }
  0xf4   :  { %v148_v53 = vadd.f32 %v147_v51, %v69_v47 }
  0xf5   :  { %v692_v59 = vrot.slane %v146_v50, 6  ;;  %v809_v60 = vrot.slane %v146_v50, 2 }
  0xf6   :  { %v151_v54 = vpop.f32.mrb[2].mxu0  ;;  %v693_v62 = vrot.slane %v148_v53, 6  ;;  %v810_v63 = vrot.slane %v148_v53, 2 }
  0xf7   :  { %v152_v56 = vadd.f32 %v151_v54, %v65_v45  ;;  %v153_v57 = vpop.f32.mrb[3].mxu0 }
  0xf8   :  { %v154_v61 = vadd.f32 %v153_v57, %v69_v47 }
  0xf9   :  { %v207_v1 = vrot.slane %v152_v56, 6  ;;  %v324_v2 = vrot.slane %v152_v56, 2  ;;  %v4578_v3 = vsel %vm4568_vm1, %v152_v56, %v692_v59  ;;  %v4582_v4 = vsel %vm4568_vm1, %v152_v56, %v809_v60 }
  0xfa   :  { %v208_v5 = vrot.slane %v154_v61, 6  ;;  %v325_v6 = vrot.slane %v154_v61, 2  ;;  %v4586_v7 = vsel %vm4572_vm2, %v154_v61, %v693_v62  ;;  %v4590_v9 = vsel %vm4572_vm2, %v154_v61, %v810_v63 }
  0xfb   :  { %v4594_v10 = vsel %vm4568_vm1, %v146_v50, %v207_v1  ;;  %v283_v11 = vpop.f32.mrb[0].mxu1  ;;  %v4598_v12 = vsel %vm4568_vm1, %v146_v50, %v324_v2  ;;  %vm561_vm1 = vcmask 258052  }
  0xfc   :  { %v288_v14 = vadd.f32 %v283_v11, %v4594_v10  ;;  %v4603_v15 = vsel %vm4572_vm2, %v148_v53, %v208_v5  ;;  %v285_v16 = vpop.f32.mrb[1].mxu1  ;;  %v4607_v17 = vsel %vm4572_vm2, %v148_v53, %v325_v6  ;;  %vm563_vm2 = vcmask 520452  }
  0xfd   :  { %v289_v20 = vadd.f32 %v285_v16, %v4603_v15 }
  0xfe   :  { %v3199_v19 = vmul.f32 -1.442695, %v288_v14 }
  0xff   :  { %v3200_v27 = vmul.f32 -1.442695, %v289_v20 }
 0x100   :  { %4191 = vpow2.f32 %v3199_v19 }
 0x101   :  { %4193 = vtanh.f32 %v289_v20 }
 0x10a   :  { %v4192_v21 = vpop.eup %4191 }
 0x10b   :  { %v293_v22 = vadd.f32 1.0, %v4192_v21  ;;  %v4194_v23 = vpop.eup %4193 }
 0x10d   :  { %4195 = vrcp.f32 %v293_v22 }
 0x10e   :  { %4197 = vpow2.f32 %v3200_v27 }
 0x117   :  { %v4196_v24 = vpop.eup %4195 }
 0x118   :  { %v304_v26 = vmul.f32 %v4196_v24, %v4194_v23  ;;  %v4198_v28 = vpop.eup %4197  ;;  %v303_v31 = vmul.f32 0.0, %v4196_v24 }
 0x119   :  { %v300_v30 = vadd.f32 1.0, %v4198_v28 }
 0x11a   :  { %306 = vrot.lane.b32.xlu0 %v304_v26, %s4359_s3 }
 0x11b   :  { %4199 = vrcp.f32 %v300_v30 }
 0x125   :  { %v4200_v36 = vpop.eup %4199 }
 0x18c   :  { %v307_v32 = vpop.permute.xlu0 %306 }
 0x18d   :  { %v309_v35 = vadd.f32 %v307_v32, %v303_v31 }
 0x18f   :  { %4201 = vtanh.f32 %v309_v35  ;;  %v425_v54 = vrot.slane %v309_v35, 6 }
 0x199   :  { %v4202_v37 = vpop.eup %4201 }
 0x19a   :  { %v311_v39 = vmul.f32 %v4202_v37, %v4200_v36 }
 0x19c   :  { %313 = vrot.lane.b32.xlu0 %v311_v39, %s4359_s3 }
 0x20e   :  { %v314_v42 = vpop.permute.xlu0 %313 }
 0x20f   :  { %317 = vst.msk [vmem:[#allocation2] sm:$0x1] %vm316_vm3, %v314_v42  ;;  %3201 = vmatmul.mubr.msk.f32.vlgmr.msra.gmra.mrb[4].mxu0 %vm5307_vm7, %v314_v42 }
 0x210   :  { %319 = vst.msk [vmem:[#allocation2 + $0x7] sm:$0x1] %vm318_vm4, %v314_v42  ;;  %3753 = vmatpush1.bf16.msra.mxu0 %v4460_v13  ;;  %638 = vmatprep.mubr.f32.mxu0 %v4358_v0 }
 0x211   :  { %321 = vst.msk [vmem:[#allocation2 + $0x7] sm:$0x2] %vm320_vm5, %v314_v42  ;;  %3755 = vmatprep.subr.bf16.mxu0 %v4472_v18 }
 0x212   :  { %323 = vst.msk [vmem:[#allocation2 + $0xe] sm:$0x2] %vm322_vm6, %v314_v42 }
 0x214   :  { %3757 = vmatpush1.bf16.msra.mxu0 %v4491_v25 }
 0x215   :  { %3759 = vmatprep.subr.bf16.mxu0 %v4502_v29 }
 0x218   :  { %3761 = vmatpush1.bf16.msra.mxu0 %v4514_v33 }
 0x219   :  { %3763 = vmatprep.subr.bf16.mxu0 %v4518_v34 }
 0x21c   :  { %3765 = vmatpush1.bf16.msra.mxu0 %v4533_v38 }
 0x21d   :  { %3783 = vmatprep.subr.bf16.mxu0 %v4449_v8 }
 0x2e2   :  { %v398_v43 = vpop.f32.mrb[4].mxu0 }
 0x2e3   :  { %v405_v45 = vrot.slane %v398_v43, 6  ;;  %v400_v46 = vpop.f32.mrb[5].mxu0 }
 0x2e4   :  { %v406_v49 = vrot.slane %v400_v46, 6 }
 0x2e5   :  { %v409_v47 = vadd.f32 %v405_v45, %v4598_v12 }
 0x2e6   :  { %v410_v50 = vadd.f32 %v406_v49, %v4607_v17 }
 0x2e7   :  { %v3202_v48 = vmul.f32 -1.442695, %v409_v47 }
 0x2e8   :  { %v3203_v58 = vmul.f32 -1.442695, %v410_v50 }
 0x2e9   :  { %4203 = vpow2.f32 %v3202_v48 }
 0x2ea   :  { %4205 = vtanh.f32 %v410_v50 }
 0x2f3   :  { %v4204_v51 = vpop.eup %4203 }
 0x2f4   :  { %v414_v52 = vadd.f32 1.0, %v4204_v51  ;;  %v4206_v53 = vpop.eup %4205 }
 0x2f6   :  { %4207 = vrcp.f32 %v414_v52 }
 0x2f7   :  { %4209 = vpow2.f32 %v3203_v58 }
 0x300   :  { %v4208_v55 = vpop.eup %4207 }
 0x301   :  { %v428_v56 = vmul.f32 %v4208_v55, %v4206_v53  ;;  %v427_v57 = vmul.f32 %v4208_v55, %v425_v54  ;;  %v4210_v59 = vpop.eup %4209 }
 0x302   :  { %v421_v60 = vadd.f32 1.0, %v4210_v59 }
 0x303   :  { %430 = vrot.lane.b32.xlu1 %v428_v56, %s4359_s3 }
 0x304   :  { %4211 = vrcp.f32 %v421_v60 }
 0x30e   :  { %v4212_v63 = vpop.eup %4211 }
 0x375   :  { %v431_v61 = vpop.permute.xlu1 %430 }
 0x376   :  { %v433_v62 = vadd.f32 %v431_v61, %v427_v57 }
 0x378   :  { %4213 = vtanh.f32 %v433_v62  ;;  %v546_v27 = vrot.slane %v433_v62, 6 }
 0x382   :  { %v4214_v1 = vpop.eup %4213 }
 0x383   :  { %v4629_v2 = vmul.f32 %v4214_v1, %v4212_v63 }
 0x385   :  { %v448_v5 = vrot.slane %v4629_v2, 2 }
 0x387   :  { %449 = vrot.lane.b32.xlu1 %v448_v5, %s4359_s3 }
 0x3f9   :  { %v450_v6 = vpop.permute.xlu1 %449 }
 0x3fa   :  { %3204 = vmatmul.mubr.msk.f32.vlgmr.msra.gmra.mrb[2].mxu1 %vm5307_vm7, %v450_v6 }
 0x3fb   :  { %3769 = vmatpush1.bf16.msra.mxu1 %v4460_v13  ;;  %767 = vmatprep.mubr.f32.mxu1 %v4358_v0 }
 0x3fc   :  { %3771 = vmatprep.subr.bf16.mxu1 %v4472_v18 }
 0x3ff   :  { %3773 = vmatpush1.bf16.msra.mxu1 %v4491_v25 }
 0x400   :  { %3775 = vmatprep.subr.bf16.mxu1 %v4502_v29 }
 0x403   :  { %3777 = vmatpush1.bf16.msra.mxu1 %v4514_v33 }
 0x404   :  { %3779 = vmatprep.subr.bf16.mxu1 %v4518_v34 }
 0x407   :  { %3781 = vmatpush1.bf16.msra.mxu1 %v4533_v38 }
 0x408   :  { %3799 = vmatprep.subr.bf16.mxu1 %v4449_v8 }
 0x4cd   :  { %v519_v11 = vpop.f32.mrb[2].mxu1 }
 0x4ce   :  { %v526_v14 = vrot.slane %v519_v11, 4  ;;  %v521_v16 = vpop.f32.mrb[3].mxu1 }
 0x4cf   :  { %v527_v21 = vrot.slane %v521_v16, 4 }
 0x4d0   :  { %v530_v19 = vadd.f32 %v526_v14, %v4594_v10 }
 0x4d1   :  { %v531_v22 = vadd.f32 %v527_v21, %v4603_v15 }
 0x4d2   :  { %v3205_v20 = vmul.f32 -1.442695, %v530_v19 }
 0x4d3   :  { %v3206_v32 = vmul.f32 -1.442695, %v531_v22 }
 0x4d4   :  { %4215 = vpow2.f32 %v3205_v20 }
 0x4d5   :  { %4217 = vtanh.f32 %v531_v22 }
 0x4de   :  { %v4216_v23 = vpop.eup %4215 }
 0x4df   :  { %v535_v24 = vadd.f32 1.0, %v4216_v23  ;;  %v4218_v26 = vpop.eup %4217 }
 0x4e1   :  { %4219 = vrcp.f32 %v535_v24 }
 0x4e2   :  { %4221 = vpow2.f32 %v3206_v32 }
 0x4eb   :  { %v4220_v28 = vpop.eup %4219 }
 0x4ec   :  { %v549_v30 = vmul.f32 %v4220_v28, %v4218_v26  ;;  %v548_v31 = vmul.f32 %v4220_v28, %v546_v27  ;;  %v4222_v35 = vpop.eup %4221 }
 0x4ed   :  { %v542_v10 = vadd.f32 1.0, %v4222_v35 }
 0x4ee   :  { %551 = vrot.lane.b32.xlu0 %v549_v30, %s4359_s3 }
 0x4ef   :  { %4223 = vrcp.f32 %v542_v10 }
 0x4f9   :  { %v4224_v15 = vpop.eup %4223 }
 0x560   :  { %v552_v36 = vpop.permute.xlu0 %551 }
 0x561   :  { %v554_v37 = vadd.f32 %v552_v36, %v548_v31 }
 0x563   :  { %4225 = vtanh.f32 %v554_v37  ;;  %v667_v56 = vrot.slane %v554_v37, 6 }
 0x56d   :  { %v4226_v39 = vpop.eup %4225 }
 0x56e   :  { %v4646_v42 = vmul.f32 %v4226_v39, %v4224_v15 }
 0x570   :  { %v569_v43 = vrot.slane %v4646_v42, 4 }
 0x572   :  { %570 = vrot.lane.b32.xlu1 %v569_v43, %s4359_s3 }
 0x5e4   :  { %v571_v45 = vpop.permute.xlu1 %570 }
 0x5e5   :  { %3207 = vmatmul.mubr.msk.f32.vlgmr.msra.gmra.mrb[6].mxu0 %vm5307_vm7, %v571_v45 }
 0x5e6   :  { %3785 = vmatpush1.bf16.msra.mxu0 %v4460_v13  ;;  %881 = vmatprep.mubr.f32.mxu0 %v4358_v0 }
 0x5e7   :  { %3787 = vmatprep.subr.bf16.mxu0 %v4472_v18 }
 0x5ea   :  { %3789 = vmatpush1.bf16.msra.mxu0 %v4491_v25 }
 0x5eb   :  { %3791 = vmatprep.subr.bf16.mxu0 %v4502_v29 }
 0x5ee   :  { %3793 = vmatpush1.bf16.msra.mxu0 %v4514_v33 }
 0x5ef   :  { %3795 = vmatprep.subr.bf16.mxu0 %v4518_v34 }
 0x5f2   :  { %3797 = vmatpush1.bf16.msra.mxu0 %v4533_v38 }
 0x5f3   :  { %3815 = vmatprep.subr.bf16.mxu0 %v4449_v8 }
 0x6b8   :  { %v640_v46 = vpop.f32.mrb[6].mxu0 }
 0x6b9   :  { %v647_v47 = vrot.slane %v640_v46, 2  ;;  %v642_v48 = vpop.f32.mrb[7].mxu0 }
 0x6ba   :  { %v648_v51 = vrot.slane %v642_v48, 2 }
 0x6bb   :  { %v651_v49 = vadd.f32 %v647_v47, %v4598_v12 }
 0x6bc   :  { %v652_v52 = vadd.f32 %v648_v51, %v4607_v17 }
 0x6bd   :  { %v3208_v50 = vmul.f32 -1.442695, %v651_v49 }
 0x6be   :  { %v3209_v8 = vmul.f32 -1.442695, %v652_v52 }
 0x6bf   :  { %4227 = vpow2.f32 %v3208_v50 }
 0x6c0   :  { %4229 = vtanh.f32 %v652_v52 }
 0x6c9   :  { %v4228_v53 = vpop.eup %4227 }
 0x6ca   :  { %v656_v54 = vadd.f32 1.0, %v4228_v53  ;;  %v4230_v55 = vpop.eup %4229 }
 0x6cc   :  { %4231 = vrcp.f32 %v656_v54 }
 0x6cd   :  { %4233 = vpow2.f32 %v3209_v8 }
 0x6d6   :  { %v4232_v57 = vpop.eup %4231 }
 0x6d7   :  { %v670_v58 = vmul.f32 %v4232_v57, %v4230_v55  ;;  %v669_v59 = vmul.f32 %v4232_v57, %v667_v56  ;;  %v4234_v60 = vpop.eup %4233 }
 0x6d8   :  { %v663_v12 = vadd.f32 1.0, %v4234_v60 }
 0x6d9   :  { %672 = vrot.lane.b32.xlu0 %v670_v58, %s4359_s3 }
 0x6da   :  { %4235 = vrcp.f32 %v663_v12 }
 0x6e4   :  { %v4236_v17 = vpop.eup %4235 }
 0x74b   :  { %v673_v61 = vpop.permute.xlu0 %672 }
 0x74c   :  { %v675_v62 = vadd.f32 %v673_v61, %v669_v59 }
 0x74e   :  { %4237 = vtanh.f32 %v675_v62  ;;  %v790_v24 = vrot.slane %v675_v62, 6 }
 0x758   :  { %v4238_v63 = vpop.eup %4237 }
 0x759   :  { %v4663_v1 = vmul.f32 %v4238_v63, %v4236_v17 }
 0x75b   :  { %v698_v5 = vrot.slane %v4663_v1, 6 }
 0x75d   :  { %699 = vrot.lane.b32.xlu1 %v698_v5, %s4359_s3 }
 0x7cf   :  { %v700_v6 = vpop.permute.xlu1 %699 }
 0x7d0   :  { %3210 = vmatmul.mubr.msk.f32.vlgmr.msra.gmra.mrb[4].mxu1 %vm5307_vm7, %v700_v6 }
 0x7d1   :  { %3801 = vmatpush1.bf16.msra.mxu1 %v4460_v13  ;;  %998 = vmatprep.mubr.f32.mxu1 %v4358_v0 }
 0x7d2   :  { %3803 = vmatprep.subr.bf16.mxu1 %v4472_v18 }
 0x7d5   :  { %3805 = vmatpush1.bf16.msra.mxu1 %v4491_v25 }
 0x7d6   :  { %3807 = vmatprep.subr.bf16.mxu1 %v4502_v29 }
 0x7d9   :  { %3809 = vmatpush1.bf16.msra.mxu1 %v4514_v33 }
 0x7da   :  { %3811 = vmatprep.subr.bf16.mxu1 %v4518_v34 }
 0x7dd   :  { %3813 = vmatpush1.bf16.msra.mxu1 %v4533_v38 }
 0x8a3   :  { %v769_v11 = vpop.f32.mrb[4].mxu1 }
 0x8a4   :  { %v774_v14 = vadd.f32 %v769_v11, %v4578_v3  ;;  %v771_v16 = vpop.f32.mrb[5].mxu1 }
 0x8a5   :  { %v775_v20 = vadd.f32 %v771_v16, %v4586_v7 }
 0x8a6   :  { %v3211_v19 = vmul.f32 -1.442695, %v774_v14 }
 0x8a7   :  { %v3212_v30 = vmul.f32 -1.442695, %v775_v20 }
 0x8a8   :  { %4239 = vpow2.f32 %v3211_v19 }
 0x8a9   :  { %4241 = vtanh.f32 %v775_v20 }
 0x8b2   :  { %v4240_v21 = vpop.eup %4239 }
 0x8b3   :  { %v779_v22 = vadd.f32 1.0, %v4240_v21  ;;  %v4242_v23 = vpop.eup %4241 }
 0x8b5   :  { %4243 = vrcp.f32 %v779_v22 }
 0x8b6   :  { %4245 = vpow2.f32 %v3212_v30 }
 0x8bf   :  { %v4244_v26 = vpop.eup %4243 }
 0x8c0   :  { %v793_v27 = vmul.f32 %v4244_v26, %v4242_v23  ;;  %v792_v28 = vmul.f32 %v4244_v26, %v790_v24  ;;  %v4246_v31 = vpop.eup %4245 }
 0x8c1   :  { %v786_v32 = vadd.f32 1.0, %v4246_v31 }
 0x8c2   :  { %795 = vrot.lane.b32.xlu0 %v793_v27, %s4359_s3 }
 0x8c3   :  { %4247 = vrcp.f32 %v786_v32 }
 0x8cd   :  { %v4248_v36 = vpop.eup %4247 }
 0x934   :  { %v796_v35 = vpop.permute.xlu0 %795 }
 0x935   :  { %v798_v10 = vadd.f32 %v796_v35, %v792_v28 }
 0x937   :  { %4249 = vtanh.f32 %v798_v10 }
 0x941   :  { %v4250_v37 = vpop.eup %4249 }
 0x942   :  { %v800_v15 = vmul.f32 %v4250_v37, %v4248_v36 }
 0x944   :  { %802 = vrot.lane.b32.xlu1 %v800_v15, %s4359_s3 }
 0x9b6   :  { %v4680_v39 = vpop.permute.xlu1 %802 }
 0x9b7   :  { %3213 = vmatmul.mubr.msk.f32.vlgmr.msra.gmra.mrb[8].mxu0 %vm5307_vm7, %v4680_v39 }
 0x9b8   :  { %3817 = vmatpush1.bf16.msra.mxu0 %v4460_v13  ;;  %1115 = vmatprep.mubr.f32.mxu0 %v4358_v0 }
 0x9b9   :  { %3819 = vmatprep.subr.bf16.mxu0 %v4472_v18 }
 0x9bc   :  { %3821 = vmatpush1.bf16.msra.mxu0 %v4491_v25 }
 0x9bd   :  { %3823 = vmatprep.subr.bf16.mxu0 %v4502_v29 }
 0x9c0   :  { %3825 = vmatpush1.bf16.msra.mxu0 %v4514_v33  ;;  %v910_v33 = vrot.slane %v798_v10, 6 }
 0x9c1   :  { %3827 = vmatprep.subr.bf16.mxu0 %v4518_v34 }
 0x9c4   :  { %3829 = vmatpush1.bf16.msra.mxu0 %v4533_v38 }
 0xa8a   :  { %v883_v43 = vpop.f32.mrb[8].mxu0 }
 0xa8b   :  { %v890_v45 = vrot.slane %v883_v43, 6  ;;  %v885_v46 = vpop.f32.mrb[9].mxu0 }
 0xa8c   :  { %v891_v48 = vrot.slane %v885_v46, 6 }
 0xa8d   :  { %v894_v47 = vadd.f32 %v890_v45, %v4582_v4 }
 0xa8e   :  { %v895_v18 = vadd.f32 %v891_v48, %v4590_v9 }
 0xa8f   :  { %v3214_v13 = vmul.f32 -1.442695, %v894_v47 }
 0xa90   :  { %v3215_v38 = vmul.f32 -1.442695, %v895_v18 }
 0xa91   :  { %4251 = vpow2.f32 %v3214_v13 }
 0xa92   :  { %4253 = vtanh.f32 %v895_v18 }
 0xa9b   :  { %v4252_v49 = vpop.eup %4251 }
 0xa9c   :  { %v899_v25 = vadd.f32 1.0, %v4252_v49  ;;  %v4254_v29 = vpop.eup %4253 }
 0xa9e   :  { %4255 = vrcp.f32 %v899_v25  ;;  %v1169_v25 = vld [vmem:[%s5299_s4 + $0x20] sm:$0xff] }
 0xa9f   :  { %4257 = vpow2.f32 %v3215_v38 }
 0xaa8   :  { %v4256_v50 = vpop.eup %4255 }
 0xaa9   :  { %v913_v34 = vmul.f32 %v4256_v50, %v4254_v29  ;;  %v912_v51 = vmul.f32 %v4256_v50, %v910_v33  ;;  %v4258_v52 = vpop.eup %4257  ;;  %v1168_v33 = vld [vmem:[%s5299_s4 + $0x18] sm:$0xff]  ;;  %v1167_v50 = vld [vmem:[%s5299_s4 + $0x10] sm:$0xff] }
 0xaaa   :  { %v906_v53 = vadd.f32 1.0, %v4258_v52  ;;  %v1172_v52 = vld [vmem:[%s5299_s4 + $0x38] sm:$0xff] }
 0xaab   :  { %915 = vrot.lane.b32.xlu0 %v913_v34, %s4359_s3  ;;  %v1170_v34 = vld [vmem:[%s5299_s4 + $0x28] sm:$0xff] }
 0xaac   :  { %4259 = vrcp.f32 %v906_v53  ;;  %v3846_v38 = vpack.c.bf16 %v1170_v34, %v1167_v50  ;;  %v1175_v53 = vld [vmem:[%s5299_s4 + $0x50] sm:$0xff] }
 0xaae   :  { %3847 = vmatprep.subr.bf16.mxu0 %v3846_v38 }
 0xab6   :  { %v4260_v56 = vpop.eup %4259 }
 0xb1d   :  { %v916_v54 = vpop.permute.xlu0 %915 }
 0xb1e   :  { %v918_v55 = vadd.f32 %v916_v54, %v912_v51  ;;  %v1171_v54 = vld [vmem:[%s5299_s4 + $0x30] sm:$0xff] }
 0xb20   :  { %4261 = vtanh.f32 %v918_v55  ;;  %v1027_v16 = vrot.slane %v918_v55, 6  ;;  %v3834_v55 = vpack.c.bf16 %v1175_v53, %v1172_v52  ;;  %v1407_v52 = vld [vmem:[%s5301_s6 + $0x128] sm:$0xff] }
 0xb2a   :  { %v4262_v57 = vpop.eup %4261 }
 0xb2b   :  { %v4695_v58 = vmul.f32 %v4262_v57, %v4260_v56  ;;  %v1173_v56 = vld [vmem:[%s5299_s4 + $0x40] sm:$0xff]  ;;  %v1176_v57 = vld [vmem:[%s5299_s4 + $0x58] sm:$0xff] }
 0xb2d   :  { %v929_v59 = vrot.slane %v4695_v58, 2 }
 0xb2f   :  { %930 = vrot.lane.b32.xlu1 %v929_v59, %s4359_s3 }
 0xba1   :  { %v931_v8 = vpop.permute.xlu1 %930 }
 0xba2   :  { %3216 = vmatmul.mubr.msk.f32.vlgmr.msra.gmra.mrb[6].mxu1 %vm5307_vm7, %v931_v8  ;;  %v3850_v8 = vpack.c.bf16 %v1176_v57, %v1173_v56  ;;  %v1392_v57 = vld [vmem:[%s5301_s6 + $0xb0] sm:$0xff] }
 0xba3   :  { %1276 = vmatprep.mubr.f32.mxu1 %v4358_v0 }
 0xc75   :  { %v1000_v60 = vpop.f32.mrb[6].mxu1 }
 0xc76   :  { %v1007_v12 = vrot.slane %v1000_v60, 4  ;;  %v1002_v61 = vpop.f32.mrb[7].mxu1  ;;  %v1178_v60 = vld [vmem:[%s5299_s4 + $0x68] sm:$0xff] }
 0xc77   :  { %v1008_v63 = vrot.slane %v1002_v61, 4 }
 0xc78   :  { %v1011_v62 = vadd.f32 %v1007_v12, %v4578_v3  ;;  %v1181_v12 = vld [vmem:[%s5299_s4 + $0x80] sm:$0xff] }
 0xc79   :  { %v1012_v5 = vadd.f32 %v1008_v63, %v4586_v7  ;;  %v3838_v61 = vpack.c.bf16 %v1181_v12, %v1178_v60 }
 0xc7a   :  { %v3217_v17 = vmul.f32 -1.442695, %v1011_v62 }
 0xc7b   :  { %v3218_v22 = vmul.f32 -1.442695, %v1012_v5 }
 0xc7c   :  { %4263 = vpow2.f32 %v3217_v17 }
 0xc7d   :  { %4265 = vtanh.f32 %v1012_v5 }
 0xc86   :  { %v4264_v6 = vpop.eup %4263 }
 0xc87   :  { %v1016_v11 = vadd.f32 1.0, %v4264_v6  ;;  %v4266_v14 = vpop.eup %4265 }
 0xc89   :  { %4267 = vrcp.f32 %v1016_v11  ;;  %v1177_v11 = vld [vmem:[%s5299_s4 + $0x60] sm:$0xff] }
 0xc8a   :  { %4269 = vpow2.f32 %v3218_v22  ;;  %v1187_v22 = vld [vmem:[%s5299_s4 + $0xb0] sm:$0xff] }
 0xc93   :  { %v4268_v19 = vpop.eup %4267 }
 0xc94   :  { %v1030_v20 = vmul.f32 %v4268_v19, %v4266_v14  ;;  %v1029_v21 = vmul.f32 %v4268_v19, %v1027_v16  ;;  %v4270_v23 = vpop.eup %4269  ;;  %v1180_v14 = vld [vmem:[%s5299_s4 + $0x78] sm:$0xff]  ;;  %v1182_v19 = vld [vmem:[%s5299_s4 + $0x88] sm:$0xff] }
 0xc95   :  { %v1023_v3 = vadd.f32 1.0, %v4270_v23  ;;  %v3840_v16 = vpack.c.bf16 %v1180_v14, %v1177_v11  ;;  %v1183_v23 = vld [vmem:[%s5299_s4 + $0x90] sm:$0xff]  ;;  %v1411_v11 = vld [vmem:[%s5301_s6 + $0x148] sm:$0xff] }
 0xc96   :  { %1032 = vrot.lane.b32.xlu0 %v1030_v20, %s4359_s3 }
 0xc97   :  { %4271 = vrcp.f32 %v1023_v3 }
 0xca1   :  { %v4272_v7 = vpop.eup %4271 }
 0xd08   :  { %v1033_v24 = vpop.permute.xlu0 %1032 }
 0xd09   :  { %v1035_v26 = vadd.f32 %v1033_v24, %v1029_v21  ;;  %v1184_v21 = vld [vmem:[%s5299_s4 + $0x98] sm:$0xff] }
 0xd0a   :  { %v3842_v24 = vpack.c.bf16 %v1187_v22, %v1184_v21  ;;  %v1396_v21 = vld [vmem:[%s5301_s6 + $0xd0] sm:$0xff]  ;;  %v1397_v22 = vld [vmem:[%s5301_s6 + $0xd8] sm:$0xff] }
 0xd0b   :  { %4273 = vtanh.f32 %v1035_v26  ;;  %v1144_v13 = vrot.slane %v1035_v26, 6  ;;  %v1186_v26 = vld [vmem:[%s5299_s4 + $0xa8] sm:$0xff] }
 0xd15   :  { %v4274_v27 = vpop.eup %4273 }
 0xd16   :  { %v1037_v28 = vmul.f32 %v4274_v27, %v4272_v7  ;;  %v1185_v7 = vld [vmem:[%s5299_s4 + $0xa0] sm:$0xff]  ;;  %v1188_v27 = vld [vmem:[%s5299_s4 + $0xb8] sm:$0xff] }
 0xd18   :  { %v1046_v30 = vrot.slane %v1037_v28, 4 }
 0xd1a   :  { %1047 = vrot.lane.b32.xlu1 %v1046_v30, %s4359_s3  ;;  %v3858_v30 = vpack.c.bf16 %v1188_v27, %v1185_v7  ;;  %v1380_v7 = vld [vmem:[%s5301_s6 + $0x50] sm:$0xff]  ;;  %v1381_v27 = vld [vmem:[%s5301_s6 + $0x58] sm:$0xff] }
 0xd1e   :  { %437 = vrot.lane.b32.xlu1 %v4629_v2, %s4359_s3 }
 0xd22   :  { %679 = vrot.lane.b32.xlu1 %v4663_v1, %s4359_s3 }
 0xd26   :  { %1039 = vrot.lane.b32.xlu1 %v1037_v28, %s4359_s3  ;;  %v3844_v28 = vpack.c.bf16 %v1186_v26, %v1183_v23  ;;  %v1412_v23 = vld [vmem:[%s5301_s6 + $0x150] sm:$0xff]  ;;  %v3882_v26 = vpack.c.bf16 %v1397_v22, %v1396_v21 }
 0xd8c   :  { %v1048_v31 = vpop.permute.xlu1 %1047 }
 0xd8d   :  { %3219 = vmatmul.mubr.msk.f32.vlgmr.msra.gmra.mrb[10].mxu0 %vm5307_vm7, %v1048_v31  ;;  %vm567_vm7 = vcmask 521477   ;;  %v1386_v31 = vld [vmem:[%s5301_s6 + $0x80] sm:$0xff] }
 0xd8e   :  { %3849 = vmatpush3.bf16.msra.mxu0 %v3846_v38  ;;  %v1406_v38 = vld [vmem:[%s5301_s6 + $0x120] sm:$0xff] }
 0xd8f   :  { %3851 = vmatprep.subr.bf16.mxu0 %v3850_v8  ;;  %v3902_v56 = vpack.c.bf16 %v1407_v52, %v1406_v38 }
 0xd90   :  { %v438_v32 = vpop.permute.xlu1 %437 }
 0xd91   :  { %441 = vst.msk [vmem:[#allocation2 - $0x1] sm:$0x4] %vm440_vm8, %v438_v32 }
 0xd92   :  { %443 = vst.msk [vmem:[#allocation2 + $0x4] sm:$0x4] %vm442_vm9, %v438_v32  ;;  %3853 = vmatpush3.bf16.msra.mxu0 %v3850_v8  ;;  %v1409_v8 = vld [vmem:[%s5301_s6 + $0x138] sm:$0xff] }
 0xd93   :  { %445 = vst.msk [vmem:[#allocation2 + $0x6] sm:$0x8] %vm444_vm10, %v438_v32 }
 0xd94   :  { %447 = vst.msk [vmem:[#allocation2 + $0xb] sm:$0x8] %vm446_vm11, %v438_v32  ;;  %v680_v2 = vpop.permute.xlu1 %679  ;;  %v1387_v32 = vld [vmem:[%s5301_s6 + $0x88] sm:$0xff] }
 0xd95   :  { %683 = vst.msk [vmem:[#allocation2 - $0x3] sm:$0x40] %vm682_vm12, %v680_v2 }
 0xd96   :  { %685 = vst.msk [vmem:[#allocation2 - $0x2] sm:$0x40] %vm684_vm13, %v680_v2 }
 0xd97   :  { %687 = vst.msk [vmem:[#allocation2 + $0x4] sm:$0x80] %vm686_vm14, %v680_v2 }
 0xd98   :  { %689 = vst.msk [vmem:[#allocation2 + $0x5] sm:$0x80] %vm688_vm15, %v680_v2  ;;  %v1040_v1 = vpop.permute.xlu1 %1039  ;;  %v3862_v2 = vpack.c.bf16 %v1387_v32, %v1386_v31  ;;  %v1399_v31 = vld [vmem:[%s5301_s6 + $0xe8] sm:$0xff]  ;;  %v1414_v32 = vld [vmem:[%s5301_s6 + $0x160] sm:$0xff] }
 0xd99   :  { %805 = vst.msk [vmem:[#allocation2 + $0x4] sm:$0x1] %vm316_vm3, %v4680_v39 }
 0xd9a   :  { %806 = vst.msk [vmem:[#allocation2 + $0x3] sm:$0x1] %vm318_vm4, %v4680_v39 }
 0xd9b   :  { %807 = vst.msk [vmem:[#allocation2 + $0xb] sm:$0x2] %vm320_vm5, %v4680_v39 }
 0xd9c   :  { %808 = vst.msk [vmem:[#allocation2 + $0xa] sm:$0x2] %vm322_vm6, %v4680_v39  ;;  %vm5316_vm6 = vcmask 261120  }
 0xd9d   :  { %1042 = vst.msk [vmem:[#allocation2 + $0x2] sm:$0x10] %vm561_vm1, %v1040_v1 }
 0xd9e   :  { %1043 = vst.msk [vmem:[#allocation2 - $0x3] sm:$0x10] %vm563_vm2, %v1040_v1 }
 0xd9f   :  { %1044 = vst.msk [vmem:[#allocation2 + $0x9] sm:$0x20] %vm565_vm0, %v1040_v1 }
 0xda0   :  { %1045 = vst.msk [vmem:[#allocation2 + $0x4] sm:$0x20] %vm567_vm7, %v1040_v1 }
 0xe60   :  { %v1117_v35 = vpop.f32.mrb[10].mxu0 }
 0xe61   :  { %v1124_v10 = vrot.slane %v1117_v35, 2  ;;  %v1119_v36 = vpop.f32.mrb[11].mxu0  ;;  %v1402_v35 = vld [vmem:[%s5301_s6 + $0x100] sm:$0xff] }
 0xe62   :  { %v1125_v39 = vrot.slane %v1119_v36, 2 }
 0xe63   :  { %v1128_v37 = vadd.f32 %v1124_v10, %v4582_v4  ;;  %v1166_v4 = vld [vmem:[%s5299_s4 + $0x8] sm:$0xff] }
 0xe64   :  { %v1129_v43 = vadd.f32 %v1125_v39, %v4590_v9  ;;  %v1165_v9 = vld [vmem:[%s5299_s4] sm:$0xff]  ;;  %v3830_v29 = vpack.c.bf16 %v1169_v25, %v1166_v4  ;;  %v1403_v10 = vld [vmem:[%s5301_s6 + $0x108] sm:$0xff]  ;;  %v1372_v4 = vld [vmem:[%s5301_s6 + $0x10] sm:$0xff] }
 0xe65   :  { %v3220_v15 = vmul.f32 -1.442695, %v1128_v37  ;;  %v3832_v51 = vpack.c.bf16 %v1168_v33, %v1165_v9  ;;  %v3894_v36 = vpack.c.bf16 %v1403_v10, %v1402_v35  ;;  %v1373_v25 = vld [vmem:[%s5301_s6 + $0x18] sm:$0xff]  ;;  %v1390_v9 = vld [vmem:[%s5301_s6 + $0xa0] sm:$0xff] }
 0xe66   :  { %3831 = vmatprep.subr.bf16.mxu1 %v3830_v29  ;;  %v3221_v62 = vmul.f32 -1.442695, %v1129_v43  ;;  %v3868_v53 = vpack.c.bf16 %v1373_v25, %v1372_v4  ;;  %v1382_v10 = vld [vmem:[%s5301_s6 + $0x60] sm:$0xff]  ;;  %v1201_v25 = vsub.s32 2, %v4557_v40 }
 0xe67   :  { %4275 = vpow2.f32 %v3220_v15  ;;  %3833 = vmatpush1.bf16.msra.mxu1 %v3832_v51  ;;  %v1391_v51 = vld [vmem:[%s5301_s6 + $0xa8] sm:$0xff]  ;;  %v1189_v4 = vld [vmem:[%s5300_s5] sm:$0x7] }
 0xe68   :  { %4277 = vtanh.f32 %v1129_v43  ;;  %3835 = vmatprep.subr.bf16.mxu1 %v3834_v55  ;;  %v1374_v55 = vld [vmem:[%s5301_s6 + $0x20] sm:$0xff] }
 0xe71   :  { %v4276_v45 = vpop.eup %4275 }
 0xe72   :  { %v1133_v46 = vadd.f32 1.0, %v4276_v45  ;;  %v4278_v47 = vpop.eup %4277  ;;  %v1370_v45 = vld [vmem:[%s5301_s6] sm:$0xff] }
 0xe74   :  { %4279 = vrcp.f32 %v1133_v46  ;;  %v1371_v46 = vld [vmem:[%s5301_s6 + $0x8] sm:$0xff] }
 0xe75   :  { %4281 = vpow2.f32 %v3221_v62  ;;  %v1377_v62 = vld [vmem:[%s5301_s6 + $0x38] sm:$0xff] }
 0xe7e   :  { %v4280_v48 = vpop.eup %4279 }
 0xe7f   :  { %v1147_v18 = vmul.f32 %v4280_v48, %v4278_v47  ;;  %v1146_v49 = vmul.f32 %v4280_v48, %v1144_v13  ;;  %v4282_v17 = vpop.eup %4281  ;;  %v1388_v47 = vld [vmem:[%s5301_s6 + $0x90] sm:$0xff]  ;;  %v1389_v13 = vld [vmem:[%s5301_s6 + $0x98] sm:$0xff] }
 0xe80   :  { %v1140_v63 = vadd.f32 1.0, %v4282_v17  ;;  %v1404_v48 = vld [vmem:[%s5301_s6 + $0x110] sm:$0xff]  ;;  %v3866_v50 = vpack.c.bf16 %v1389_v13, %v1388_v47 }
 0xe81   :  { %1149 = vrot.lane.b32.xlu0 %v1147_v18, %s4359_s3  ;;  %v1405_v18 = vld [vmem:[%s5301_s6 + $0x118] sm:$0xff]  ;;  %v1384_v13 = vld [vmem:[%s5301_s6 + $0x70] sm:$0xff] }
 0xe82   :  { %4283 = vrcp.f32 %v1140_v63  ;;  %v3898_v34 = vpack.c.bf16 %v1405_v18, %v1404_v48  ;;  %v1394_v63 = vld [vmem:[%s5301_s6 + $0xc0] sm:$0xff]  ;;  %v1385_v48 = vld [vmem:[%s5301_s6 + $0x78] sm:$0xff] }
 0xe85   :  { %558 = vrot.lane.b32.xlu0 %v4646_v42, %s4359_s3  ;;  %v1174_v42 = vld [vmem:[%s5299_s4 + $0x48] sm:$0xff] }
 0xe86   :  { %v3836_v59 = vpack.c.bf16 %v1174_v42, %v1171_v54  ;;  %v3870_v54 = vpack.c.bf16 %v1391_v51, %v1390_v9  ;;  %v1375_v42 = vld [vmem:[%s5301_s6 + $0x28] sm:$0xff]  ;;  %v1194_v9 = vrot.slane %v1189_v4, %v64_v41 }
 0xe87   :  { %v3872_v60 = vpack.c.bf16 %v1375_v42, %v1374_v55 }
 0xe88   :  { %3837 = vmatpush1.bf16.msra.mxu1 %v3836_v59  ;;  %v1408_v59 = vld [vmem:[%s5301_s6 + $0x130] sm:$0xff] }
 0xe89   :  { %922 = vrot.lane.b32.xlu0 %v4695_v58, %s4359_s3  ;;  %3839 = vmatprep.subr.bf16.mxu1 %v3838_v61  ;;  %v1179_v58 = vld [vmem:[%s5299_s4 + $0x70] sm:$0xff]  ;;  %v3906_v17 = vpack.c.bf16 %v1409_v8, %v1408_v59 }
 0xe8a   :  { %v3854_v20 = vpack.c.bf16 %v1182_v19, %v1179_v58  ;;  %v1376_v61 = vld [vmem:[%s5301_s6 + $0x30] sm:$0xff]  ;;  %v1379_v19 = vld [vmem:[%s5301_s6 + $0x48] sm:$0xff] }
 0xe8b   :  { %v3876_v14 = vpack.c.bf16 %v1377_v62, %v1376_v61 }
 0xe8c   :  { %3841 = vmatpush1.bf16.msra.mxu1 %v3840_v16  ;;  %3855 = vmatprep.subr.bf16.mxu0 %v3854_v20  ;;  %v4284_v37 = vpop.eup %4283  ;;  %v1378_v16 = vld [vmem:[%s5301_s6 + $0x40] sm:$0xff] }
 0xe8d   :  { %3857 = vmatpush3.bf16.msra.mxu0 %v3854_v20  ;;  %3843 = vmatprep.subr.bf16.mxu1 %v3842_v24  ;;  %v3880_v24 = vpack.c.bf16 %v1379_v19, %v1378_v16 }
 0xe8e   :  { %3859 = vmatprep.subr.bf16.mxu0 %v3858_v30 }
 0xe90   :  { %3845 = vmatpush1.bf16.msra.mxu1 %v3844_v28 }
 0xe91   :  { %3863 = vmatprep.subr.bf16.mxu1 %v3862_v2  ;;  %3861 = vmatpush3.bf16.msra.mxu0 %v3858_v30  ;;  %v1398_v30 = vld [vmem:[%s5301_s6 + $0xe0] sm:$0xff]  ;;  %v1415_v2 = vld [vmem:[%s5301_s6 + $0x168] sm:$0xff] }
 0xe92   :  { %3895 = vmatprep.subr.bf16.mxu0 %v3894_v36  ;;  %v3886_v35 = vpack.c.bf16 %v1399_v31, %v1398_v30 }
 0xef3   :  { %v1150_v5 = vpop.permute.xlu0 %1149 }
 0xef4   :  { %v1152_v6 = vadd.f32 %v1150_v5, %v1146_v49  ;;  %v3864_v49 = vpack.c.bf16 %v1371_v46, %v1370_v45  ;;  %v1395_v5 = vld [vmem:[%s5301_s6 + $0xc8] sm:$0xff]  ;;  %v1417_v45 = vld [vmem:[%s5301_s6 + $0x178] sm:$0xff] }
 0xef5   :  { %v3878_v58 = vpack.c.bf16 %v1395_v5, %v1394_v63  ;;  %v3226_v5 = vld [vmem:[%s5302_s7] ss:$0 sm:$0xff] }
 0xef6   :  { %4285 = vtanh.f32 %v1152_v6  ;;  %v1410_v6 = vld [vmem:[%s5301_s6 + $0x140] sm:$0xff] }
 0xef7   :  { %v559_v3 = vpop.permute.xlu0 %558  ;;  %v3910_v20 = vpack.c.bf16 %v1411_v11, %v1410_v6 }
 0xef8   :  { %562 = vst.msk [vmem:[#allocation2 - $0x2] sm:$0x10] %vm561_vm1, %v559_v3 }
 0xef9   :  { %564 = vst.msk [vmem:[#allocation2 + $0x1] sm:$0x10] %vm563_vm2, %v559_v3 }
 0xefa   :  { %566 = vst.msk [vmem:[#allocation2 + $0x5] sm:$0x20] %vm565_vm0, %v559_v3  ;;  %vm5312_vm0 = vcmask 523264  }
 0xefb   :  { %568 = vst.msk [vmem:[#allocation2 + $0x8] sm:$0x20] %vm567_vm7, %v559_v3  ;;  %v923_v1 = vpop.permute.xlu0 %922  ;;  %vm5313_vm3 = vmmov %vm5312_vm0  ;;  %v1413_v3 = vld [vmem:[%s5301_s6 + $0x158] sm:$0xff] }
 0xefc   :  { %925 = vst.msk [vmem:[#allocation2 + $0x3] sm:$0x4] %vm440_vm8, %v923_v1  ;;  %vm5314_vm4 = vmmov %vm5312_vm0  ;;  %v3914_v28 = vpack.c.bf16 %v1413_v3, %v1412_v23 }
 0xefd   :  { %926 = vst.msk [vmem:[#allocation2] sm:$0x4] %vm442_vm9, %v923_v1  ;;  %vm5315_vm5 = vmmov %vm5312_vm0 }
 0xefe   :  { %927 = vst.msk [vmem:[#allocation2 + $0xa] sm:$0x8] %vm444_vm10, %v923_v1  ;;  %vm5317_vm7 = vmmov %vm5316_vm6  ;;  %vm1626_vm10 = vcmask 64512  }
 0xeff   :  { %928 = vst.msk [vmem:[#allocation2 + $0x7] sm:$0x8] %vm446_vm11, %v923_v1  ;;  %v3884_v1 = vpack.c.bf16 %v1381_v27, %v1380_v7  ;;  %vm5318_vm8 = vmmov %vm5316_vm6  ;;  %vm1724_vm11 = vcmask 516096  }
 0xf00   :  { %v4286_v15 = vpop.eup %4285  ;;  %vm5319_vm9 = vmmov %vm5316_vm6 }
 0xf01   :  { %v1154_v39 = vmul.f32 %v4286_v15, %v4284_v37  ;;  %v3918_v37 = vpack.c.bf16 %v1415_v2, %v1414_v32  ;;  %v1400_v15 = vld [vmem:[%s5301_s6 + $0xf0] sm:$0xff] }
 0xf03   :  { %1156 = vrot.lane.b32.xlu0 %v1154_v39, %s4359_s3  ;;  %v1401_v39 = vld [vmem:[%s5301_s6 + $0xf8] sm:$0xff] }
 0xf04   :  { %v3890_v47 = vpack.c.bf16 %v1401_v39, %v1400_v15 }
 0xf75   :  { %v1157_v43 = vpop.permute.xlu0 %1156 }
 0xf76   :  { %1159 = vst.msk [vmem:[#allocation2 + $0x1] sm:$0x40] %vm682_vm12, %v1157_v43  ;;  %vm1739_vm12 = vcmask 1040896  }
 0xf77   :  { %1160 = vst.msk [vmem:[#allocation2 - $0x6] sm:$0x40] %vm684_vm13, %v1157_v43 }
 0xf78   :  { %1161 = vst.msk [vmem:[#allocation2 + $0x8] sm:$0x80] %vm686_vm14, %v1157_v43 }
 0xf79   :  { %1162 = vst.msk [vmem:[#allocation2 + $0x1] sm:$0x80] %vm688_vm15, %v1157_v43  ;;  %v1416_v43 = vld [vmem:[%s5301_s6 + $0x170] sm:$0xff] }
 0xf7a   :  { %v3922_v18 = vpack.c.bf16 %v1417_v45, %v1416_v43 }
 0xf7e   :  { %v4862_v29 = vld [vmem:[#allocation2] sm:$0xff] }
 0xf7f   :  { %3222 = vmatmul.mubr.msk.f32.vlgmr.msra.gmra.mrb[8].mxu1 %vm5312_vm0, %v4862_v29  ;;  %3640 = vmatprep.mubr.msk.f32.mxu0 %vm5313_vm3, %v4862_v29 }
 0xf80   :  { %v4864_v33 = vld [vmem:[#allocation2 + $0x8] sm:$0xff]  ;;  %3865 = vmatpush3.bf16.msra.mxu1 %v3864_v49  ;;  %1282 = vmatprep.mubr.f32.mxu1 %v4358_v0  ;;  %v1393_v0 = vld [vmem:[%s5301_s6 + $0xb8] sm:$0xff]  ;;  %v3892_v49 = vpack.c.bf16 %v1385_v48, %v1384_v13 }
 0xf81   :  { %3641 = vmatmul.mubr.msk.f32.vlgmr.msra.gmra.mrb[12].mxu0 %vm5314_vm4, %v4864_v33  ;;  %3867 = vmatprep.subr.bf16.mxu1 %v3866_v50  ;;  %v3874_v12 = vpack.c.bf16 %v1393_v0, %v1392_v57  ;;  %v1198_v50 = vrot.slane %v1189_v4, %v68_v44 }
 0xf82   :  { %3897 = vmatpush3.bf16.msra.mxu0 %v3894_v36  ;;  %v1383_v36 = vld [vmem:[%s5301_s6 + $0x68] sm:$0xff] }
 0xf83   :  { %3899 = vmatprep.subr.bf16.mxu0 %v3898_v34  ;;  %3223 = vmatmul.mubr.msk.f32.gmra.mrb[10].mxu1 %vm5315_vm5, %v4864_v33  ;;  %v3888_v46 = vpack.c.bf16 %v1383_v36, %v1382_v10 }
 0xf84   :  { %3869 = vmatpush3.bf16.msra.mxu1 %v3868_v53 }
 0xf85   :  { %3871 = vmatprep.subr.bf16.mxu1 %v3870_v54 }
 0xf86   :  { %3901 = vmatpush3.bf16.msra.mxu0 %v3898_v34  ;;  %v1202_v34 = vrot.slane %v1189_v4, %v1201_v25 }
 0xf87   :  { %3903 = vmatprep.subr.bf16.mxu0 %v3902_v56 }
 0xf88   :  { %3873 = vmatpush3.bf16.msra.mxu1 %v3872_v60 }
 0xf89   :  { %3875 = vmatprep.subr.bf16.mxu1 %v3874_v12 }
 0xf8a   :  { %3905 = vmatpush3.bf16.msra.mxu0 %v3902_v56 }
 0xf8b   :  { %3907 = vmatprep.subr.bf16.mxu0 %v3906_v17 }
 0xf8c   :  { %3877 = vmatpush3.bf16.msra.mxu1 %v3876_v14 }
 0xf8d   :  { %3879 = vmatprep.subr.bf16.mxu1 %v3878_v58 }
 0xf8e   :  { %3909 = vmatpush3.bf16.msra.mxu0 %v3906_v17 }
 0xf8f   :  { %3911 = vmatprep.subr.bf16.mxu0 %v3910_v20 }
 0xf90   :  { %3881 = vmatpush3.bf16.msra.mxu1 %v3880_v24 }
 0xf91   :  { %3883 = vmatprep.subr.bf16.mxu1 %v3882_v26 }
 0xf92   :  { %3913 = vmatpush3.bf16.msra.mxu0 %v3910_v20 }
 0xf93   :  { %3915 = vmatprep.subr.bf16.mxu0 %v3914_v28 }
 0xf94   :  { %3885 = vmatpush3.bf16.msra.mxu1 %v3884_v1 }
 0xf95   :  { %3887 = vmatprep.subr.bf16.mxu1 %v3886_v35 }
 0xf96   :  { %3917 = vmatpush3.bf16.msra.mxu0 %v3914_v28 }
 0xf97   :  { %3919 = vmatprep.subr.bf16.mxu0 %v3918_v37 }
 0xf98   :  { %3889 = vmatpush3.bf16.msra.mxu1 %v3888_v46 }
 0xf99   :  { %3891 = vmatprep.subr.bf16.mxu1 %v3890_v47 }
 0xf9a   :  { %3921 = vmatpush3.bf16.msra.mxu0 %v3918_v37 }
 0xf9b   :  { %3923 = vmatprep.subr.bf16.mxu0 %v3922_v18 }
 0xf9c   :  { %3893 = vmatpush3.bf16.msra.mxu1 %v3892_v49 }
 0xf9d   :  { %3678 = vmatprep.subr.mxu1 %v4862_v29 }
 0xf9e   :  { %3925 = vmatpush3.bf16.msra.mxu0 %v3922_v18 }
 0xf9f   :  { %3686 = vmatprep.subr.mxu0 %v4864_v33 }
0x1052   :  { %v1278_v51 = vpop.f32.mrb[8].mxu1 }
0x1053   :  { %v1279_v38 = vadd.f32 %v1278_v51, %v1194_v9  ;;  %v1280_v52 = vpop.f32.mrb[9].mxu1 }
0x1054   :  { %v3642_v53 = vpop.f32.mrb[12].mxu0  ;;  %v1281_v54 = vadd.f32 %v1280_v52, %v1198_v50 }
0x1055   :  { %v1355_v55 = vpop.f32.mrb[13].mxu0  ;;  %v1361_v42 = vadd.f32 %v3642_v53, %v1202_v34 }
0x1056   :  { %v1356_v56 = vadd.f32 %v1355_v55, %v1202_v34  ;;  %4287 = vtanh.f32 %v1281_v54  ;;  %v1284_v57 = vpop.f32.mrb[10].mxu1 }
0x1057   :  { %4289 = vtanh.f32 %v1279_v38  ;;  %v1285_v0 = vadd.f32 %v1284_v57, %v1194_v9  ;;  %v1286_v59 = vpop.f32.mrb[11].mxu1 }
0x1058   :  { %4291 = vtanh.f32 %v1356_v56  ;;  %v1287_v8 = vadd.f32 %v1286_v59, %v1198_v50 }
0x1059   :  { %4293 = vtanh.f32 %v1361_v42 }
0x105a   :  { %4295 = vtanh.f32 %v1287_v8 }
0x105b   :  { %4297 = vtanh.f32 %v1285_v0 }
0x1060   :  { %v4288_v41 = vpop.eup %4287 }
0x1061   :  { %v4290_v44 = vpop.eup %4289  ;;  %1489 = vmatprep.mubr.f32.mxu1 %v4288_v41 }
0x1062   :  { %v4292_v60 = vpop.eup %4291  ;;  %1490 = vmatmul.mubr.f32.vlgmr.msra.gmra.mrb[12].mxu1 %v4290_v44 }
0x1063   :  { %v4294_v12 = vpop.eup %4293  ;;  %3675 = vmatprep.mubr.f32.mxu0 %v4292_v60  ;;  %3679 = vmatpush3.msra.mxu1 %v4862_v29  ;;  %v2286_v60 = vld [vmem:[#allocation4 + $0x80] sm:$0xff] }
0x1064   :  { %v4296_v61 = vpop.eup %4295  ;;  %3676 = vmatmul.mubr.f32.vlgmr.msra.gmra.mrb[14].mxu0 %v4294_v12  ;;  %v2287_v12 = vld [vmem:[#allocation4 + $0x88] sm:$0xff] }
0x1065   :  { %v4298_v62 = vpop.eup %4297  ;;  %3687 = vmatpush3.msra.mxu0 %v4864_v33  ;;  %1494 = vmatprep.mubr.f32.mxu1 %v4296_v61  ;;  %v2270_v61 = vld [vmem:[#allocation4] sm:$0xff] }
0x1066   :  { %1495 = vmatmul.mubr.f32.gmra.mrb[14].mxu1 %v4298_v62  ;;  %v3926_v62 = vpack.c.bf16 %v2287_v12, %v2286_v60 }
0x1068   :  { %3927 = vmatprep.subr.bf16.mxu1 %v3926_v62 }
0x1135   :  { %v3310_v17 = vpop.f32.mrb[12].mxu1 }
0x1136   :  { %v3311_v63 = vpop.f32.mrb[13].mxu1 }
0x1137   :  { %v3312_v6 = vadd.f32 %v3311_v63, %v3310_v17  ;;  %v3677_v11 = vpop.f32.mrb[14].mxu0  ;;  %v2271_v17 = vld [vmem:[#allocation4 + $0x8] sm:$0xff]  ;;  %v2318_v63 = vld [vmem:[#allocation4 + $0x180] sm:$0xff] }
0x1138   :  { %v1566_v14 = vpop.f32.mrb[15].mxu0 }
0x1139   :  { %v1492_v58 = vadd.f32 %v3312_v6, %v3226_v5  ;;  %v3313_v16 = vpop.f32.mrb[14].mxu1  ;;  %v3928_v6 = vpack.c.bf16 %v2271_v17, %v2270_v61 }
0x113a   :  { %v3314_v19 = vpop.f32.mrb[15].mxu1 }
0x113b   :  { %v1567_v29 = vadd.f32 %v1566_v14, %v1492_v58  ;;  %v3315_v20 = vadd.f32 %v3314_v19, %v3313_v16  ;;  %v2302_v14 = vld [vmem:[#allocation4 + $0x100] sm:$0xff]  ;;  %v2303_v58 = vld [vmem:[#allocation4 + $0x108] sm:$0xff]  ;;  %v2288_v16 = vld [vmem:[#allocation4 + $0x90] sm:$0xff] }
0x113c   :  { %v3960_v19 = vpack.c.bf16 %v2303_v58, %v2302_v14 }
0x113d   :  { %v1575_v21 = vsel %vm5316_vm6, %v1567_v29, -inf  ;;  %v1497_v22 = vadd.f32 %v3315_v20, %v3226_v5  ;;  %v2319_v5 = vld [vmem:[#allocation4 + $0x188] sm:$0xff]  ;;  %v2272_v20 = vld [vmem:[#allocation4 + $0x10] sm:$0xff] }
0x113e   :  { %v1576_v33 = vrot.slane %v1575_v21, 4 }
0x113f   :  { %v1572_v23 = vadd.f32 %v3677_v11, %v1497_v22  ;;  %v3958_v11 = vpack.c.bf16 %v2319_v5, %v2318_v63 }
0x1140   :  { %v1577_v3 = vmax.f32 %v1575_v21, %v1576_v33  ;;  %v2273_v21 = vld [vmem:[#allocation4 + $0x18] sm:$0xff] }
0x1141   :  { %v1922_v24 = vsel %vm5317_vm7, %v1572_v23, -inf  ;;  %3959 = vmatprep.subr.bf16.mxu0 %v3958_v11  ;;  %v3932_v33 = vpack.c.bf16 %v2273_v21, %v2272_v20 }
0x1142   :  { %v1578_v26 = vrot.slane %v1577_v3, 2  ;;  %v1923_v7 = vrot.slane %v1922_v24, 4 }
0x1144   :  { %v1579_v27 = vmax.f32 %v1577_v3, %v1578_v26  ;;  %v1924_v28 = vmax.f32 %v1922_v24, %v1923_v7  ;;  %v2320_v26 = vld [vmem:[#allocation4 + $0x190] sm:$0xff]  ;;  %v2321_v7 = vld [vmem:[#allocation4 + $0x198] sm:$0xff] }
0x1146   :  { %v1580_v30 = vrot.slane %v1579_v27, 1  ;;  %v1925_v31 = vrot.slane %v1924_v28, 2 }
0x1148   :  { %v1581_v32 = vmax.f32 %v1579_v27, %v1580_v30  ;;  %v1926_v2 = vmax.f32 %v1924_v28, %v1925_v31  ;;  %v2304_v27 = vld [vmem:[#allocation4 + $0x110] sm:$0xff]  ;;  %v3962_v28 = vpack.c.bf16 %v2321_v7, %v2320_v26  ;;  %v2305_v30 = vld [vmem:[#allocation4 + $0x118] sm:$0xff] }
0x1149   :  { %v3964_v31 = vpack.c.bf16 %v2305_v30, %v2304_v27 }
0x114a   :  { %v1582_v1 = vsub.f32 %v1567_v29, %v1581_v32  ;;  %v1927_v35 = vrot.slane %v1926_v2, 1  ;;  %v2289_v29 = vld [vmem:[#allocation4 + $0x98] sm:$0xff]  ;;  %v2290_v32 = vld [vmem:[#allocation4 + $0xa0] sm:$0xff] }
0x114b   :  { %v3930_v22 = vpack.c.bf16 %v2289_v29, %v2288_v16 }
0x114c   :  { %v1583_v10 = vmul.f32 1.442695, %v1582_v1  ;;  %v1928_v36 = vmax.f32 %v1926_v2, %v1927_v35  ;;  %v2291_v2 = vld [vmem:[#allocation4 + $0xa8] sm:$0xff]  ;;  %v2274_v1 = vld [vmem:[#allocation4 + $0x20] sm:$0xff] }
0x114d   :  { %v3934_v35 = vpack.c.bf16 %v2291_v2, %v2290_v32 }
0x114e   :  { %4299 = vpow2.f32 %v1583_v10  ;;  %v1929_v37 = vsub.f32 %v1572_v23, %v1928_v36  ;;  %v4360_v23 = vmov 1983009808   ;;  %v2275_v10 = vld [vmem:[#allocation4 + $0x28] sm:$0xff] }
0x114f   :  { %v1728_v3 = vunpack.c.l.s4 %v4360_v23 }
0x1150   :  { %v1930_v15 = vmul.f32 1.442695, %v1929_v37  ;;  %v3936_v37 = vpack.c.bf16 %v2275_v10, %v2274_v1 }
0x1151   :  { %v1729_v24 = vunpack.c.0.s8 %v1728_v3 }
0x1152   :  { %4301 = vpow2.f32 %v1930_v15  ;;  %v2322_v15 = vld [vmem:[#allocation4 + $0x1a0] sm:$0xff] }
0x1153   :  { %v5008_v36 = vsub.s32 %v1729_v24, %v4557_v40 }
0x1158   :  { %v4300_v39 = vpop.eup %4299 }
0x1159   :  { %v1585_v43 = vsel %vm5318_vm8, %v4300_v39, 0.0 }
0x115a   :  { %v1586_v45 = vrot.slane %v1585_v43, 4 }
0x115c   :  { %v4302_v46 = vpop.eup %4301  ;;  %v1587_v47 = vadd.f32 %v1586_v45, %v1585_v43  ;;  %v2306_v43 = vld [vmem:[#allocation4 + $0x120] sm:$0xff] }
0x115d   :  { %v1932_v13 = vsel %vm5319_vm9, %v4302_v46, 0.0 }
0x115e   :  { %v1588_v48 = vrot.slane %v1587_v47, 2  ;;  %v1933_v18 = vrot.slane %v1932_v13, 4 }
0x1160   :  { %v1589_v49 = vadd.f32 %v1588_v48, %v1587_v47  ;;  %v1934_v4 = vadd.f32 %v1933_v18, %v1932_v13  ;;  %v2292_v13 = vld [vmem:[#allocation4 + $0xb0] sm:$0xff]  ;;  %v2293_v48 = vld [vmem:[#allocation4 + $0xb8] sm:$0xff] }
0x1161   :  { %v2276_v18 = vld [vmem:[#allocation4 + $0x30] sm:$0xff] }
0x1162   :  { %v1590_v25 = vrot.slane %v1589_v49, 1  ;;  %v1935_v9 = vrot.slane %v1934_v4, 2 }
0x1164   :  { %v1591_v50 = vadd.f32 %v1590_v25, %v1589_v49  ;;  %v1936_v34 = vadd.f32 %v1935_v9, %v1934_v4  ;;  %v3938_v4 = vpack.c.bf16 %v2293_v48, %v2292_v13  ;;  %v2277_v25 = vld [vmem:[#allocation4 + $0x38] sm:$0xff]  ;;  %v2278_v48 = vld [vmem:[#allocation4 + $0x40] sm:$0xff] }
0x1166   :  { %4303 = vrcp.f32 %v1591_v50  ;;  %v1937_v51 = vrot.slane %v1936_v34, 1 }
0x1168   :  { %v1938_v38 = vadd.f32 %v1937_v51, %v1936_v34  ;;  %v3940_v34 = vpack.c.bf16 %v2277_v25, %v2276_v18  ;;  %v2324_v51 = vld [vmem:[#allocation4 + $0x1b0] sm:$0xff]  ;;  %v2279_v25 = vld [vmem:[#allocation4 + $0x48] sm:$0xff] }
0x116a   :  { %4305 = vrcp.f32 %v1938_v38  ;;  %v2325_v38 = vld [vmem:[#allocation4 + $0x1b8] sm:$0xff] }
0x1170   :  { %v4304_v52 = vpop.eup %4303 }
0x1171   :  { %v1593_v53 = vmul.f32 %v4304_v52, %v4300_v39  ;;  %v2323_v39 = vld [vmem:[#allocation4 + $0x1a8] sm:$0xff]  ;;  %v2308_v52 = vld [vmem:[#allocation4 + $0x130] sm:$0xff] }
0x1172   :  { %v3966_v45 = vpack.c.bf16 %v2323_v39, %v2322_v15 }
0x1173   :  { %1594 = vxpose.xlu1.b32.start.end [1/1] (short) (narrow) %v1593_v53, 32 }
0x1174   :  { %v4306_v54 = vpop.eup %4305 }
0x1175   :  { %v1940_v55 = vmul.f32 %v4306_v54, %v4302_v46  ;;  %v2307_v46 = vld [vmem:[#allocation4 + $0x128] sm:$0xff] }
0x1176   :  { %v3968_v47 = vpack.c.bf16 %v2307_v46, %v2306_v43 }
0x1177   :  { %1941 = vxpose.xlu0.b32.start.end [1/1] (short) (narrow) %v1940_v55, 32  ;;  %v3970_v55 = vpack.c.bf16 %v2325_v38, %v2324_v51  ;;  %v2310_v51 = vld [vmem:[#allocation4 + $0x140] sm:$0xff]  ;;  %v2311_v38 = vld [vmem:[#allocation4 + $0x148] sm:$0xff] }
0x11f3   :  { %v1610_v42 = vpop.trf.xlu1 }
0x11f4   :  { %3680 = vmatprep.mubr.msk.f32.mxu1 %vm1626_vm10, %v1610_v42  ;;  %v2309_v42 = vld [vmem:[#allocation4 + $0x138] sm:$0xff] }
0x11f7   :  { %v1611_v56 = vpop.trf.xlu1  ;;  %v1957_v57 = vpop.trf.xlu0 }
0x11f8   :  { %3681 = vmatmul.mubr.msk.f32.vlgmr.msra.gmra.mrb[16].mxu1 %vm1626_vm10, %v1611_v56  ;;  %3688 = vmatprep.mubr.msk.f32.mxu0 %vm1626_vm10, %v1957_v57 }
0x11f9   :  { %3929 = vmatpush3.bf16.msra.mxu1 %v3928_v6 }
0x11fa   :  { %3931 = vmatprep.subr.bf16.mxu1 %v3930_v22 }
0x11fb   :  { %v1958_v0 = vpop.trf.xlu0  ;;  %v1612_v59 = vpop.trf.xlu1 }
0x11fc   :  { %3689 = vmatmul.mubr.msk.f32.vlgmr.msra.gmra.mrb[16].mxu0 %vm1626_vm10, %v1958_v0  ;;  %3683 = vmatprep.mubr.msk.f32.mxu1 %vm1626_vm10, %v1612_v59  ;;  %v3972_v0 = vpack.c.bf16 %v2309_v42, %v2308_v52  ;;  %v2294_v59 = vld [vmem:[#allocation4 + $0xc0] sm:$0xff]  ;;  %v2296_v52 = vld [vmem:[#allocation4 + $0xd0] sm:$0xff] }
0x11fd   :  { %3961 = vmatpush3.bf16.msra.mxu0 %v3960_v19  ;;  %3933 = vmatpush3.bf16.msra.mxu1 %v3932_v33  ;;  %v2328_v42 = vld [vmem:[#allocation4 + $0x1d0] sm:$0xff] }
0x11fe   :  { %3963 = vmatprep.subr.bf16.mxu0 %v3962_v28  ;;  %3935 = vmatprep.subr.bf16.mxu1 %v3934_v35 }
0x11ff   :  { %v1613_v8 = vpop.trf.xlu1  ;;  %v1959_v41 = vpop.trf.xlu0 }
0x1200   :  { %3684 = vmatmul.mubr.msk.f32.gmra.mrb[18].mxu1 %vm1626_vm10, %v1613_v8  ;;  %3691 = vmatprep.mubr.msk.f32.mxu0 %vm1626_vm10, %v1959_v41  ;;  %v2295_v8 = vld [vmem:[#allocation4 + $0xc8] sm:$0xff] }
0x1201   :  { %3965 = vmatpush3.bf16.msra.mxu0 %v3964_v31  ;;  %3937 = vmatpush3.bf16.msra.mxu1 %v3936_v37  ;;  %v3942_v61 = vpack.c.bf16 %v2295_v8, %v2294_v59  ;;  %v2280_v8 = vld [vmem:[#allocation4 + $0x50] sm:$0xff] }
0x1202   :  { %3967 = vmatprep.subr.bf16.mxu0 %v3966_v45  ;;  %3939 = vmatprep.subr.bf16.mxu1 %v3938_v4 }
0x1203   :  { %v1960_v44 = vpop.trf.xlu0 }
0x1204   :  { %3692 = vmatmul.mubr.msk.f32.gmra.mrb[18].mxu0 %vm1626_vm10, %v1960_v44 }
0x1205   :  { %3969 = vmatpush3.bf16.msra.mxu0 %v3968_v47  ;;  %3941 = vmatpush3.bf16.msra.mxu1 %v3940_v34 }
0x1206   :  { %3971 = vmatprep.subr.bf16.mxu0 %v3970_v55  ;;  %3943 = vmatprep.subr.bf16.mxu1 %v3942_v61  ;;  %v2297_v55 = vld [vmem:[#allocation4 + $0xd8] sm:$0xff]  ;;  %v3976_v61 = vpack.c.bf16 %v2311_v38, %v2310_v51  ;;  %v2350_v51 = vld [vmem:[#allocation4 + $0x280] sm:$0xff]  ;;  %v2351_v38 = vld [vmem:[#allocation4 + $0x288] sm:$0xff] }
0x1209   :  { %3973 = vmatpush3.bf16.msra.mxu0 %v3972_v0  ;;  %v2329_v0 = vld [vmem:[#allocation4 + $0x1d8] sm:$0xff] }
0x12cb   :  { %v3682_v49 = vpop.f32.mrb[16].mxu1 }
0x12cc   :  { %1775 = vst.msk [vmem:[#allocation3 + $0x8] sm:$0x1] %vm1724_vm11, %v3682_v49  ;;  %v5012_v40 = vrot.slane %v3682_v49, %v5008_v36  ;;  %v1799_v9 = vcombine.high %v3682_v49, %v3682_v49  ;;  %v1705_v50 = vpop.f32.mrb[17].mxu1 }
0x12cd   :  { %1725 = vst.msk [vmem:[#allocation3] sm:$0x1] %vm1724_vm11, %v1705_v50  ;;  %v1733_v53 = vrot.slane %v1705_v50, %v5008_v36  ;;  %v1750_v54 = vcombine.high %v1705_v50, %v1705_v50  ;;  %v2327_v50 = vld [vmem:[#allocation4 + $0x1c8] sm:$0xff] }
0x12ce   :  { %v5018_v56 = vcombine.high %v5012_v40, %v5012_v40  ;;  %v5021_v57 = vrot.slane %v1799_v9, %v5008_v36  ;;  %v2326_v9 = vld [vmem:[#allocation4 + $0x1c0] sm:$0xff] }
0x12cf   :  { %v1741_v41 = vcombine.high %v1733_v53, %v1733_v53  ;;  %v1757_v44 = vrot.slane %v1750_v54, %v5008_v36  ;;  %v3690_v60 = vpop.f32.mrb[16].mxu0  ;;  %v3231_v12 = vrot.slane %v1733_v53, 9 }
0x12d0   :  { %1792 = vst.msk [vmem:[#allocation3 + $0xa] sm:$0x1] %vm1724_vm11, %v5018_v56  ;;  %1808 = vst.msk [vmem:[#allocation3 + $0xc] sm:$0x1] %vm1724_vm11, %v5021_v57  ;;  %v5030_v62 = vrot.slane %v3690_v60, %v5008_v36  ;;  %v2143_v17 = vcombine.high %v3690_v60, %v3690_v60  ;;  %v2051_v63 = vpop.f32.mrb[17].mxu0  ;;  %v5034_v5 = vcombine.high %v5021_v57, %v5021_v57 }
0x12d1   :  { %2119 = vst.msk [vmem:[#allocation3 + $0x9] sm:$0x1] %vm1724_vm11, %v3690_v60  ;;  %1743 = vst.msk [vmem:[#allocation3 + $0x2] sm:$0x1] %vm1724_vm11, %v1741_v41  ;;  %1736 = vrot.lane.b32.xlu0 %v3231_v12, %s4359_s3  ;;  %v2078_v6 = vrot.slane %v2051_v63, %v5008_v36  ;;  %v2094_v11 = vcombine.high %v2051_v63, %v2051_v63  ;;  %v3232_v14 = vrot.slane %v1741_v41, 9  ;;  %v3233_v3 = vrot.slane %v1757_v44, 9 }
0x12d2   :  { %1759 = vst.msk [vmem:[#allocation3 + $0x4] sm:$0x1] %vm1724_vm11, %v1757_v44  ;;  %2070 = vst.msk [vmem:[#allocation3 + $0x1] sm:$0x1] %vm1724_vm11, %v2051_v63  ;;  %v1766_v58 = vcombine.high %v1757_v44, %v1757_v44  ;;  %v5043_v16 = vcombine.high %v5030_v62, %v5030_v62  ;;  %v5046_v19 = vrot.slane %v2143_v17, %v5008_v36  ;;  %v2281_v41 = vld [vmem:[#allocation4 + $0x58] sm:$0xff]  ;;  %v3236_v44 = vrot.slane %v5018_v56, 9 }
0x12d3   :  { %1817 = vst.msk [vmem:[#allocation3 + $0xe] sm:$0x1] %vm1724_vm11, %v5034_v5  ;;  %v2085_v29 = vcombine.high %v2078_v6, %v2078_v6  ;;  %v5051_v20 = vrot.slane %v2094_v11, %v5008_v36  ;;  %1746 = vrot.lane.b32.xlu1 %v3232_v14, %s4359_s3  ;;  %v3685_v22 = vpop.f32.mrb[18].mxu1  ;;  %v3251_v1 = vrot.slane %v2078_v6, 9  ;;  %v3944_v60 = vpack.c.bf16 %v2279_v25, %v2278_v48  ;;  %v2298_v17 = vld [vmem:[#allocation4 + $0xe0] sm:$0xff]  ;;  %v2299_v63 = vld [vmem:[#allocation4 + $0xe8] sm:$0xff] }
0x12d4   :  { %v3234_v21 = vrot.slane %v1766_v58, 9  ;;  %1768 = vst.msk [vmem:[#allocation3 + $0x6] sm:$0x1] %vm1724_vm11, %v1766_v58  ;;  %2136 = vst.msk [vmem:[#allocation3 + $0xb] sm:$0x1] %vm1724_vm11, %v5043_v16  ;;  %v5061_v33 = vrot.slane %v3685_v22, %v5008_v36  ;;  %v1715_v23 = vpop.f32.mrb[19].mxu1  ;;  %v1897_v7 = vcombine.high %v3685_v22, %v3685_v22  ;;  %v5076_v28 = vcombine.high %v5046_v19, %v5046_v19 }
0x12d5   :  { %2152 = vst.msk [vmem:[#allocation3 + $0xd] sm:$0x1] %vm1724_vm11, %v5046_v19  ;;  %1873 = vst.msk [vmem:[#allocation3 + $0x18] sm:$0x1] %vm1724_vm11, %v3685_v22  ;;  %v3252_v24 = vrot.slane %v2085_v29, 9  ;;  %v2110_v26 = vcombine.high %v5051_v20, %v5051_v20  ;;  %v5079_v30 = vrot.slane %v1715_v23, %v5008_v36  ;;  %v1848_v31 = vcombine.high %v1715_v23, %v1715_v23  ;;  %v2312_v14 = vld [vmem:[#allocation4 + $0x150] sm:$0xff] }
0x12d6   :  { %2087 = vst.msk [vmem:[#allocation3 + $0x3] sm:$0x1] %vm1724_vm11, %v2085_v29  ;;  %2103 = vst.msk [vmem:[#allocation3 + $0x5] sm:$0x1] %vm1724_vm11, %v5051_v20  ;;  %1771 = vrot.lane.b32.xlu0 %v3234_v21, %s4359_s3  ;;  %v5072_v27 = vcombine.high %v5061_v33, %v5061_v33  ;;  %v5084_v32 = vrot.slane %v1897_v7, %v5008_v36  ;;  %v3253_v53 = vrot.slane %v5051_v20, 9  ;;  %v2313_v58 = vld [vmem:[#allocation4 + $0x158] sm:$0xff]  ;;  %3945 = vmatpush3.bf16.msra.mxu1 %v3944_v60 }
0x12d7   :  { %1824 = vst.msk [vmem:[#allocation3 + $0x10] sm:$0x1] %vm1724_vm11, %v1715_v23  ;;  %1762 = vrot.lane.b32.xlu1 %v3233_v3, %s4359_s3  ;;  %2112 = vst.msk [vmem:[#allocation3 + $0x7] sm:$0x1] %vm1724_vm11, %v2110_v26  ;;  %v3693_v2 = vpop.f32.mrb[18].mxu0  ;;  %v5092_v35 = vcombine.high %v5079_v30, %v5079_v30  ;;  %v5095_v10 = vrot.slane %v1848_v31, %v5008_v36  ;;  %v3254_v39 = vrot.slane %v2110_v26, 9 }
0x12d8   :  { %1890 = vst.msk [vmem:[#allocation3 + $0x1a] sm:$0x1] %vm1724_vm11, %v5072_v27  ;;  %2161 = vst.msk [vmem:[#allocation3 + $0xf] sm:$0x1] %vm1724_vm11, %v5076_v28  ;;  %v5099_v37 = vrot.slane %v3693_v2, %v5008_v36  ;;  %v2061_v15 = vpop.f32.mrb[19].mxu0  ;;  %v2241_v43 = vcombine.high %v3693_v2, %v3693_v2  ;;  %v5137_v34 = vcombine.high %v5084_v32, %v5084_v32  ;;  %v3235_v29 = vrot.slane %v5012_v40, 9 }
0x12d9   :  { %2217 = vst.msk [vmem:[#allocation3 + $0x19] sm:$0x1] %vm1724_vm11, %v3693_v2  ;;  %1906 = vst.msk [vmem:[#allocation3 + $0x1c] sm:$0x1] %vm1724_vm11, %v5084_v32  ;;  %v5106_v45 = vrot.slane %v2061_v15, %v5008_v36  ;;  %v2192_v46 = vcombine.high %v2061_v15, %v2061_v15  ;;  %v5118_v13 = vcombine.high %v5095_v10, %v5095_v10  ;;  %v2330_v20 = vld [vmem:[#allocation4 + $0x1e0] sm:$0xff]  ;;  %v2331_v21 = vld [vmem:[#allocation4 + $0x1e8] sm:$0xff] }
0x12da   :  { %2090 = vrot.lane.b32.xlu0 %v3252_v24, %s4359_s3  ;;  %2168 = vst.msk [vmem:[#allocation3 + $0x11] sm:$0x1] %vm1724_vm11, %v2061_v15  ;;  %1841 = vst.msk [vmem:[#allocation3 + $0x12] sm:$0x1] %vm1724_vm11, %v5092_v35  ;;  %v5114_v47 = vcombine.high %v5099_v37, %v5099_v37  ;;  %v5122_v18 = vrot.slane %v2241_v43, %v5008_v36  ;;  %v3974_v12 = vpack.c.bf16 %v2327_v50, %v2326_v9  ;;  %v2282_v23 = vld [vmem:[#allocation4 + $0x60] sm:$0xff]  ;;  %v2283_v3 = vld [vmem:[#allocation4 + $0x68] sm:$0xff] }
0x12db   :  { %1857 = vst.msk [vmem:[#allocation3 + $0x14] sm:$0x1] %vm1724_vm11, %v5095_v10  ;;  %2081 = vrot.lane.b32.xlu1 %v3251_v1, %s4359_s3  ;;  %v5126_v49 = vcombine.high %v5106_v45, %v5106_v45  ;;  %v5129_v4 = vrot.slane %v2192_v46, %v5008_v36  ;;  %1866 = vst.msk [vmem:[#allocation3 + $0x16] sm:$0x1] %vm1724_vm11, %v5118_v13  ;;  %v3946_v6 = vpack.c.bf16 %v2297_v55, %v2296_v52  ;;  %v2300_v7 = vld [vmem:[#allocation4 + $0xf0] sm:$0xff]  ;;  %v2301_v31 = vld [vmem:[#allocation4 + $0xf8] sm:$0xff] }
0x12dc   :  { %2234 = vst.msk [vmem:[#allocation3 + $0x1b] sm:$0x1] %vm1724_vm11, %v5114_v47  ;;  %2250 = vst.msk [vmem:[#allocation3 + $0x1d] sm:$0x1] %vm1724_vm11, %v5122_v18  ;;  %v5155_v59 = vcombine.high %v5122_v18, %v5122_v18  ;;  %v3978_v11 = vpack.c.bf16 %v2329_v0, %v2328_v42  ;;  %v3948_v56 = vpack.c.bf16 %v2281_v41, %v2280_v8  ;;  %3975 = vmatprep.subr.bf16.mxu0 %v3974_v12  ;;  %v2314_v40 = vld [vmem:[#allocation4 + $0x160] sm:$0xff]  ;;  %v2315_v1 = vld [vmem:[#allocation4 + $0x168] sm:$0xff] }
0x12dd   :  { %2185 = vst.msk [vmem:[#allocation3 + $0x13] sm:$0x1] %vm1724_vm11, %v5126_v49  ;;  %2201 = vst.msk [vmem:[#allocation3 + $0x15] sm:$0x1] %vm1724_vm11, %v5129_v4  ;;  %v5149_v54 = vcombine.high %v5129_v4, %v5129_v4  ;;  %3947 = vmatprep.subr.bf16.mxu1 %v3946_v6  ;;  %v3950_v22 = vpack.c.bf16 %v2299_v63, %v2298_v17  ;;  %v3238_v24 = vrot.slane %v5034_v5, 9  ;;  %3977 = vmatpush3.bf16.msra.mxu0 %v3976_v61  ;;  %v2332_v43 = vld [vmem:[#allocation4 + $0x1f0] sm:$0xff] }
0x12de   :  { %2115 = vrot.lane.b32.xlu0 %v3254_v39, %s4359_s3  ;;  %1915 = vst.msk [vmem:[#allocation3 + $0x1e] sm:$0x1] %vm1724_vm11, %v5137_v34  ;;  %2259 = vst.msk [vmem:[#allocation3 + $0x1f] sm:$0x1] %vm1724_vm11, %v5155_v59  ;;  %v3980_v26 = vpack.c.bf16 %v2313_v58, %v2312_v14  ;;  %3979 = vmatprep.subr.bf16.mxu0 %v3978_v11  ;;  %v3982_v2 = vpack.c.bf16 %v2331_v21, %v2330_v20  ;;  %v3237_v15 = vrot.slane %v5021_v57, 9  ;;  %v2333_v46 = vld [vmem:[#allocation4 + $0x1f8] sm:$0xff] }
0x12df   :  { %2106 = vrot.lane.b32.xlu1 %v3253_v53, %s4359_s3  ;;  %2210 = vst.msk [vmem:[#allocation3 + $0x17] sm:$0x1] %vm1724_vm11, %v5149_v54  ;;  %3949 = vmatpush3.bf16.msra.mxu1 %v3948_v56  ;;  %v3952_v39 = vpack.c.bf16 %v2283_v3, %v2282_v23  ;;  %v3954_v48 = vpack.c.bf16 %v2301_v31, %v2300_v7  ;;  %v2284_v25 = vld [vmem:[#allocation4 + $0x70] sm:$0xff]  ;;  %v2285_v5 = vld [vmem:[#allocation4 + $0x78] sm:$0xff]  ;;  %v3256_v9 = vrot.slane %v5043_v16, 9  ;;  %v3255_v55 = vrot.slane %v5030_v62, 9 }
0x12e0   :  { %3951 = vmatprep.subr.bf16.mxu1 %v3950_v22  ;;  %v3984_v50 = vpack.c.bf16 %v2315_v1, %v2314_v40  ;;  %v3986_v52 = vpack.c.bf16 %v2333_v46, %v2332_v43  ;;  %v2316_v53 = vld [vmem:[#allocation4 + $0x170] sm:$0xff]  ;;  %v2317_v57 = vld [vmem:[#allocation4 + $0x178] sm:$0xff]  ;;  %v3956_v42 = vpack.c.bf16 %v2285_v5, %v2284_v25  ;;  %v2382_v0 = vld [vmem:[#allocation4 + $0x380] sm:$0xff]  ;;  %v3990_v41 = vpack.c.bf16 %v2351_v38, %v2350_v51 }
0x12e1   :  { %3981 = vmatpush3.bf16.msra.mxu0 %v3980_v26  ;;  %v2383_v8 = vld [vmem:[#allocation4 + $0x388] sm:$0xff]  ;;  %v3258_v16 = vrot.slane %v5076_v28, 9  ;;  %v3257_v12 = vrot.slane %v5046_v19, 9  ;;  %v3240_v62 = vrot.slane %v5092_v35, 9  ;;  %v3239_v61 = vrot.slane %v5079_v30, 9  ;;  %v2334_v21 = vld [vmem:[#allocation4 + $0x200] sm:$0xff] }
0x12e2   :  { %1795 = vrot.lane.b32.xlu0 %v3236_v44, %s4359_s3  ;;  %3983 = vmatprep.subr.bf16.mxu0 %v3982_v2  ;;  %v3988_v44 = vpack.c.bf16 %v2317_v57, %v2316_v53  ;;  %v4022_v60 = vpack.c.bf16 %v2383_v8, %v2382_v0  ;;  %v3242_v28 = vrot.slane %v5118_v13, 9  ;;  %v3241_v17 = vrot.slane %v5095_v10, 9  ;;  %v2335_v22 = vld [vmem:[#allocation4 + $0x208] sm:$0xff]  ;;  %v2353_v26 = vld [vmem:[#allocation4 + $0x298] sm:$0xff]  ;;  %v2366_v31 = vld [vmem:[#allocation4 + $0x300] sm:$0xff] }
0x12e3   :  { %1786 = vrot.lane.b32.xlu1 %v3235_v29, %s4359_s3  ;;  %3953 = vmatpush3.bf16.msra.mxu1 %v3952_v39  ;;  %v3260_v19 = vrot.slane %v5126_v49, 9  ;;  %v3259_v35 = vrot.slane %v5106_v45, 9  ;;  %v3262_v30 = vrot.slane %v5149_v54, 9  ;;  %v3261_v13 = vrot.slane %v5129_v4, 9  ;;  %v2367_v2 = vld [vmem:[#allocation4 + $0x308] sm:$0xff]  ;;  %v2384_v39 = vld [vmem:[#allocation4 + $0x390] sm:$0xff] }
0x12e4   :  { %3955 = vmatprep.subr.bf16.mxu1 %v3954_v48  ;;  %v3244_v10 = vrot.slane %v5072_v27, 9  ;;  %v3243_v49 = vrot.slane %v5061_v33, 9  ;;  %v3246_v45 = vrot.slane %v5137_v34, 9  ;;  %v3245_v54 = vrot.slane %v5084_v32, 9  ;;  %v2385_v43 = vld [vmem:[#allocation4 + $0x398] sm:$0xff]  ;;  %v2336_v25 = vld [vmem:[#allocation4 + $0x210] sm:$0xff] }
0x12e5   :  { %3985 = vmatpush3.bf16.msra.mxu0 %v3984_v50  ;;  %v3264_v4 = vrot.slane %v5114_v47, 9  ;;  %v3263_v27 = vrot.slane %v5099_v37, 9  ;;  %v3266_v33 = vrot.slane %v5155_v59, 9  ;;  %v3265_v34 = vrot.slane %v5122_v18, 9  ;;  %v2337_v5 = vld [vmem:[#allocation4 + $0x218] sm:$0xff]  ;;  %v2354_v51 = vld [vmem:[#allocation4 + $0x2a0] sm:$0xff] }
0x12e6   :  { %1820 = vrot.lane.b32.xlu0 %v3238_v24, %s4359_s3  ;;  %3987 = vmatprep.subr.bf16.mxu0 %v3986_v52  ;;  %v2352_v24 = vld [vmem:[#allocation4 + $0x290] sm:$0xff]  ;;  %v3992_v1 = vpack.c.bf16 %v2335_v22, %v2334_v21  ;;  %v4024_v50 = vpack.c.bf16 %v2367_v2, %v2366_v31  ;;  %v2355_v38 = vld [vmem:[#allocation4 + $0x2a8] sm:$0xff]  ;;  %v4026_v53 = vpack.c.bf16 %v2385_v43, %v2384_v39  ;;  %v2386_v0 = vld [vmem:[#allocation4 + $0x3a0] sm:$0xff] }
0x12e7   :  { %1811 = vrot.lane.b32.xlu1 %v3237_v15, %s4359_s3  ;;  %3957 = vmatpush3.bf16.msra.mxu1 %v3956_v42  ;;  %v3994_v48 = vpack.c.bf16 %v2353_v26, %v2352_v24  ;;  %v2368_v57 = vld [vmem:[#allocation4 + $0x310] sm:$0xff]  ;;  %v3996_v42 = vpack.c.bf16 %v2337_v5, %v2336_v25  ;;  %v2387_v8 = vld [vmem:[#allocation4 + $0x3a8] sm:$0xff]  ;;  %v2393_v39 = vld [vmem:[#allocation4 + $0x3d8] sm:$0xff] }
0x12e8   :  { %3991 = vmatprep.subr.bf16.mxu1 %v3990_v41  ;;  %v2375_v31 = vld [vmem:[#allocation4 + $0x348] sm:$0xff]  ;;  %v2345_v25 = vld [vmem:[#allocation4 + $0x258] sm:$0xff] }
0x12e9   :  { %3989 = vmatpush3.bf16.msra.mxu0 %v3988_v44  ;;  %v2338_v44 = vld [vmem:[#allocation4 + $0x220] sm:$0xff] }
0x12ea   :  { %2139 = vrot.lane.b32.xlu0 %v3256_v9, %s4359_s3  ;;  %4023 = vmatprep.subr.bf16.mxu0 %v4022_v60  ;;  %v2339_v60 = vld [vmem:[#allocation4 + $0x228] sm:$0xff] }
0x12eb   :  { %2130 = vrot.lane.b32.xlu1 %v3255_v55, %s4359_s3  ;;  %v2369_v55 = vld [vmem:[#allocation4 + $0x318] sm:$0xff] }
0x12ee   :  { %2164 = vrot.lane.b32.xlu0 %v3258_v16, %s4359_s3  ;;  %v3998_v16 = vpack.c.bf16 %v2355_v38, %v2354_v51  ;;  %v2363_v51 = vld [vmem:[#allocation4 + $0x2e8] sm:$0xff] }
0x12ef   :  { %2155 = vrot.lane.b32.xlu1 %v3257_v12, %s4359_s3  ;;  %v4028_v12 = vpack.c.bf16 %v2369_v55, %v2368_v57  ;;  %v2377_v57 = vld [vmem:[#allocation4 + $0x358] sm:$0xff] }
0x12f2   :  { %1844 = vrot.lane.b32.xlu0 %v3240_v62, %s4359_s3  ;;  %v2356_v62 = vld [vmem:[#allocation4 + $0x2b0] sm:$0xff] }
0x12f3   :  { %1835 = vrot.lane.b32.xlu1 %v3239_v61, %s4359_s3  ;;  %v2357_v61 = vld [vmem:[#allocation4 + $0x2b8] sm:$0xff] }
0x12f6   :  { %1869 = vrot.lane.b32.xlu0 %v3242_v28, %s4359_s3 }
0x12f7   :  { %1860 = vrot.lane.b32.xlu1 %v3241_v17, %s4359_s3  ;;  %v4030_v17 = vpack.c.bf16 %v2387_v8, %v2386_v0  ;;  %v2395_v0 = vld [vmem:[#allocation4 + $0x3e8] sm:$0xff] }
0x12fa   :  { %2188 = vrot.lane.b32.xlu0 %v3260_v19, %s4359_s3  ;;  %v2370_v19 = vld [vmem:[#allocation4 + $0x320] sm:$0xff] }
0x12fb   :  { %2179 = vrot.lane.b32.xlu1 %v3259_v35, %s4359_s3  ;;  %v2371_v35 = vld [vmem:[#allocation4 + $0x328] sm:$0xff] }
0x12fe   :  { %2213 = vrot.lane.b32.xlu0 %v3262_v30, %s4359_s3  ;;  %v4000_v30 = vpack.c.bf16 %v2339_v60, %v2338_v44  ;;  %v2347_v44 = vld [vmem:[#allocation4 + $0x268] sm:$0xff] }
0x12ff   :  { %2204 = vrot.lane.b32.xlu1 %v3261_v13, %s4359_s3  ;;  %v2388_v13 = vld [vmem:[#allocation4 + $0x3b0] sm:$0xff] }
0x1302   :  { %1893 = vrot.lane.b32.xlu0 %v3244_v10, %s4359_s3  ;;  %v2389_v10 = vld [vmem:[#allocation4 + $0x3b8] sm:$0xff] }
0x1303   :  { %1884 = vrot.lane.b32.xlu1 %v3243_v49, %s4359_s3 }
0x1306   :  { %1918 = vrot.lane.b32.xlu0 %v3246_v45, %s4359_s3  ;;  %v4002_v45 = vpack.c.bf16 %v2357_v61, %v2356_v62  ;;  %v2365_v62 = vld [vmem:[#allocation4 + $0x2f8] sm:$0xff] }
0x1307   :  { %1909 = vrot.lane.b32.xlu1 %v3245_v54, %s4359_s3  ;;  %v2340_v54 = vld [vmem:[#allocation4 + $0x230] sm:$0xff] }
0x130a   :  { %2237 = vrot.lane.b32.xlu0 %v3264_v4, %s4359_s3  ;;  %v2341_v4 = vld [vmem:[#allocation4 + $0x238] sm:$0xff] }
0x130b   :  { %2228 = vrot.lane.b32.xlu1 %v3263_v27, %s4359_s3  ;;  %v4032_v27 = vpack.c.bf16 %v2371_v35, %v2370_v19  ;;  %v2379_v19 = vld [vmem:[#allocation4 + $0x368] sm:$0xff] }
0x130e   :  { %2262 = vrot.lane.b32.xlu0 %v3266_v33, %s4359_s3  ;;  %v2358_v33 = vld [vmem:[#allocation4 + $0x2c0] sm:$0xff] }
0x130f   :  { %2253 = vrot.lane.b32.xlu1 %v3265_v34, %s4359_s3  ;;  %v2359_v34 = vld [vmem:[#allocation4 + $0x2c8] sm:$0xff] }
0x1343   :  { %v1737_v32 = vpop.permute.xlu0 %1736 }
0x1344   :  { %1740 = vst.msk [vmem:[#allocation3] sm:$0x1] %vm1739_vm12, %v1737_v32 }
0x1345   :  { %v1747_v47 = vpop.permute.xlu1 %1746 }
0x1346   :  { %1749 = vst.msk [vmem:[#allocation3 + $0x2] sm:$0x1] %vm1739_vm12, %v1747_v47  ;;  %v4034_v47 = vpack.c.bf16 %v2389_v10, %v2388_v13  ;;  %v2397_v13 = vld [vmem:[#allocation4 + $0x3f8] sm:$0xff] }
0x1348   :  { %v1772_v37 = vpop.permute.xlu0 %1771 }
0x1349   :  { %1774 = vst.msk [vmem:[#allocation3 + $0x6] sm:$0x1] %vm1739_vm12, %v1772_v37  ;;  %v1763_v63 = vpop.permute.xlu1 %1762  ;;  %v2372_v37 = vld [vmem:[#allocation4 + $0x330] sm:$0xff] }
0x134a   :  { %1765 = vst.msk [vmem:[#allocation3 + $0x4] sm:$0x1] %vm1739_vm12, %v1763_v63  ;;  %v2373_v63 = vld [vmem:[#allocation4 + $0x338] sm:$0xff] }
0x134c   :  { %v2091_v59 = vpop.permute.xlu0 %2090 }
0x134d   :  { %2093 = vst.msk [vmem:[#allocation3 + $0x3] sm:$0x1] %vm1739_vm12, %v2091_v59  ;;  %v2082_v18 = vpop.permute.xlu1 %2081  ;;  %v4004_v59 = vpack.c.bf16 %v2341_v4, %v2340_v54  ;;  %v2349_v54 = vld [vmem:[#allocation4 + $0x278] sm:$0xff] }
0x134e   :  { %2084 = vst.msk [vmem:[#allocation3 + $0x1] sm:$0x1] %vm1739_vm12, %v2082_v18  ;;  %v2390_v18 = vld [vmem:[#allocation4 + $0x3c0] sm:$0xff] }
0x1350   :  { %v2116_v6 = vpop.permute.xlu0 %2115 }
0x1351   :  { %2118 = vst.msk [vmem:[#allocation3 + $0x7] sm:$0x1] %vm1739_vm12, %v2116_v6  ;;  %v2107_v11 = vpop.permute.xlu1 %2106  ;;  %v2391_v6 = vld [vmem:[#allocation4 + $0x3c8] sm:$0xff] }
0x1352   :  { %2109 = vst.msk [vmem:[#allocation3 + $0x5] sm:$0x1] %vm1739_vm12, %v2107_v11  ;;  %v4038_v26 = vpack.c.bf16 %v2391_v6, %v2390_v18  ;;  %v2447_v18 = vld [vmem:[#allocation4 + $0x588] sm:$0xff] }
0x1354   :  { %v1796_v14 = vpop.permute.xlu0 %1795 }
0x1355   :  { %1798 = vst.msk [vmem:[#allocation3 + $0xa] sm:$0x1] %vm1739_vm12, %v1796_v14  ;;  %v1787_v58 = vpop.permute.xlu1 %1786  ;;  %v4006_v14 = vpack.c.bf16 %v2359_v34, %v2358_v33  ;;  %v2415_v33 = vld [vmem:[#allocation4 + $0x488] sm:$0xff] }
0x1356   :  { %1789 = vst.msk [vmem:[#allocation3 + $0x8] sm:$0x1] %vm1739_vm12, %v1787_v58 }
0x1358   :  { %v1821_v29 = vpop.permute.xlu0 %1820 }
0x1359   :  { %1823 = vst.msk [vmem:[#allocation3 + $0xe] sm:$0x1] %vm1739_vm12, %v1821_v29  ;;  %v1812_v56 = vpop.permute.xlu1 %1811  ;;  %v2266_v20 = vld [vmem:[#allocation3] sm:$0xff] }
0x135a   :  { %1814 = vst.msk [vmem:[#allocation3 + $0xc] sm:$0x1] %vm1739_vm12, %v1812_v56  ;;  %v2544_v23 = vrot.slane %v2266_v20, %v5008_v36  ;;  %v2537_v3 = vcombine.high %v2266_v20, %v2266_v20  ;;  %v2342_v29 = vld [vmem:[#allocation4 + $0x240] sm:$0xff]  ;;  %v2343_v56 = vld [vmem:[#allocation4 + $0x248] sm:$0xff]  ;;  %v4036_v20 = vpack.c.bf16 %v2373_v63, %v2372_v37  ;;  %v2381_v37 = vld [vmem:[#allocation4 + $0x378] sm:$0xff] }
0x135c   :  { %v2140_v7 = vpop.permute.xlu0 %2139  ;;  %v2552_v40 = vcombine.high %v2544_v23, %v2544_v23  ;;  %v2551_v15 = vrot.slane %v2537_v3, %v5008_v36  ;;  %v2361_v3 = vld [vmem:[#allocation4 + $0x2d8] sm:$0xff] }
0x135d   :  { %2142 = vst.msk [vmem:[#allocation3 + $0xb] sm:$0x1] %vm1739_vm12, %v2140_v7  ;;  %v2131_v46 = vpop.permute.xlu1 %2130  ;;  %v2374_v7 = vld [vmem:[#allocation4 + $0x340] sm:$0xff] }
0x135e   :  { %2133 = vst.msk [vmem:[#allocation3 + $0x9] sm:$0x1] %vm1739_vm12, %v2131_v46  ;;  %2685 = vmatprep.mubr.f32.mxu1 %v2552_v40  ;;  %v2553_v9 = vcombine.high %v2551_v15, %v2551_v15  ;;  %v4008_v40 = vpack.c.bf16 %v2343_v56, %v2342_v29 }
0x135f   :  { %2686 = vmatmul.mubr.f32.vlgmr.msra.gmra.mrb[20].mxu1 %v2544_v23  ;;  %v2360_v23 = vld [vmem:[#allocation4 + $0x2d0] sm:$0xff] }
0x1360   :  { %v2165_v52 = vpop.permute.xlu0 %2164  ;;  %3993 = vmatpush3.bf16.msra.mxu1 %v3992_v1  ;;  %2755 = vmatprep.mubr.f32.mxu0 %v2553_v9  ;;  %v4010_v46 = vpack.c.bf16 %v2361_v3, %v2360_v23  ;;  %v4040_v9 = vpack.c.bf16 %v2375_v31, %v2374_v7  ;;  %v2430_v7 = vld [vmem:[#allocation4 + $0x500] sm:$0xff]  ;;  %v2431_v31 = vld [vmem:[#allocation4 + $0x508] sm:$0xff] }
0x1361   :  { %2167 = vst.msk [vmem:[#allocation3 + $0xf] sm:$0x1] %vm1739_vm12, %v2165_v52  ;;  %2756 = vmatmul.mubr.f32.vlgmr.msra.gmra.mrb[20].mxu0 %v2551_v15  ;;  %v2156_v41 = vpop.permute.xlu1 %2155  ;;  %3995 = vmatprep.subr.bf16.mxu1 %v3994_v48  ;;  %v2392_v15 = vld [vmem:[#allocation4 + $0x3d0] sm:$0xff] }
0x1362   :  { %4025 = vmatpush3.bf16.msra.mxu0 %v4024_v50  ;;  %2158 = vst.msk [vmem:[#allocation3 + $0xd] sm:$0x1] %vm1739_vm12, %v2156_v41  ;;  %v2344_v48 = vld [vmem:[#allocation4 + $0x250] sm:$0xff]  ;;  %v2362_v50 = vld [vmem:[#allocation4 + $0x2e0] sm:$0xff]  ;;  %v4042_v52 = vpack.c.bf16 %v2393_v39, %v2392_v15  ;;  %v2449_v15 = vld [vmem:[#allocation4 + $0x598] sm:$0xff] }
0x1363   :  { %4027 = vmatprep.subr.bf16.mxu0 %v4026_v53  ;;  %v2376_v53 = vld [vmem:[#allocation4 + $0x350] sm:$0xff]  ;;  %v4012_v55 = vpack.c.bf16 %v2345_v25, %v2344_v48  ;;  %v4014_v41 = vpack.c.bf16 %v2363_v51, %v2362_v50  ;;  %v2418_v50 = vld [vmem:[#allocation4 + $0x4a0] sm:$0xff]  ;;  %v2419_v51 = vld [vmem:[#allocation4 + $0x4a8] sm:$0xff] }
0x1364   :  { %v1845_v28 = vpop.permute.xlu0 %1844  ;;  %3997 = vmatpush3.bf16.msra.mxu1 %v3996_v42  ;;  %v2394_v42 = vld [vmem:[#allocation4 + $0x3e0] sm:$0xff]  ;;  %v4044_v60 = vpack.c.bf16 %v2377_v57, %v2376_v53  ;;  %v2400_v25 = vld [vmem:[#allocation4 + $0x410] sm:$0xff] }
0x1365   :  { %1847 = vst.msk [vmem:[#allocation3 + $0x12] sm:$0x1] %vm1739_vm12, %v1845_v28  ;;  %3999 = vmatprep.subr.bf16.mxu1 %v3998_v16  ;;  %v1836_v49 = vpop.permute.xlu1 %1835  ;;  %v2346_v16 = vld [vmem:[#allocation4 + $0x260] sm:$0xff]  ;;  %v4046_v28 = vpack.c.bf16 %v2395_v0, %v2394_v42  ;;  %v2432_v57 = vld [vmem:[#allocation4 + $0x510] sm:$0xff] }
0x1366   :  { %4029 = vmatpush3.bf16.msra.mxu0 %v4028_v12  ;;  %1838 = vst.msk [vmem:[#allocation3 + $0x10] sm:$0x1] %vm1739_vm12, %v1836_v49  ;;  %v2364_v12 = vld [vmem:[#allocation4 + $0x2f0] sm:$0xff]  ;;  %v4016_v35 = vpack.c.bf16 %v2347_v44, %v2346_v16  ;;  %v2450_v0 = vld [vmem:[#allocation4 + $0x5a0] sm:$0xff]  ;;  %v4062_v16 = vpack.c.bf16 %v2419_v51, %v2418_v50  ;;  %v2411_v50 = vld [vmem:[#allocation4 + $0x468] sm:$0xff] }
0x1367   :  { %4031 = vmatprep.subr.bf16.mxu0 %v4030_v17  ;;  %v2378_v17 = vld [vmem:[#allocation4 + $0x360] sm:$0xff]  ;;  %v4018_v49 = vpack.c.bf16 %v2365_v62, %v2364_v12  ;;  %v2420_v12 = vld [vmem:[#allocation4 + $0x4b0] sm:$0xff]  ;;  %v2421_v62 = vld [vmem:[#allocation4 + $0x4b8] sm:$0xff] }
0x1368   :  { %v1870_v32 = vpop.permute.xlu0 %1869  ;;  %4001 = vmatpush3.bf16.msra.mxu1 %v4000_v30  ;;  %v2396_v30 = vld [vmem:[#allocation4 + $0x3f0] sm:$0xff]  ;;  %v4048_v4 = vpack.c.bf16 %v2379_v19, %v2378_v17  ;;  %v2402_v44 = vld [vmem:[#allocation4 + $0x420] sm:$0xff]  ;;  %v2435_v17 = vld [vmem:[#allocation4 + $0x528] sm:$0xff] }
0x1369   :  { %1872 = vst.msk [vmem:[#allocation3 + $0x16] sm:$0x1] %vm1739_vm12, %v1870_v32  ;;  %4003 = vmatprep.subr.bf16.mxu1 %v4002_v45  ;;  %v1861_v11 = vpop.permute.xlu1 %1860  ;;  %v2267_v58 = vld [vmem:[#allocation3 + $0x8] sm:$0xff]  ;;  %v2348_v45 = vld [vmem:[#allocation4 + $0x270] sm:$0xff]  ;;  %v4050_v32 = vpack.c.bf16 %v2397_v13, %v2396_v30  ;;  %v4066_v30 = vpack.c.bf16 %v2421_v62, %v2420_v12  ;;  %v2478_v12 = vld [vmem:[#allocation4 + $0x680] sm:$0xff] }
0x136a   :  { %4033 = vmatpush3.bf16.msra.mxu0 %v4032_v27  ;;  %1863 = vst.msk [vmem:[#allocation3 + $0x14] sm:$0x1] %vm1739_vm12, %v1861_v11  ;;  %v5233_v21 = vrot.slane %v2267_v58, %v5008_v36  ;;  %v2554_v22 = vcombine.high %v2267_v58, %v2267_v58  ;;  %v2414_v27 = vld [vmem:[#allocation4 + $0x480] sm:$0xff]  ;;  %v4020_v63 = vpack.c.bf16 %v2349_v54, %v2348_v45  ;;  %v2399_v58 = vld [vmem:[#allocation4 + $0x408] sm:$0xff]  ;;  %v2404_v13 = vld [vmem:[#allocation4 + $0x430] sm:$0xff] }
0x136b   :  { %4035 = vmatprep.subr.bf16.mxu0 %v4034_v47  ;;  %v2380_v47 = vld [vmem:[#allocation4 + $0x370] sm:$0xff]  ;;  %v4054_v11 = vpack.c.bf16 %v2415_v33, %v2414_v27  ;;  %v2422_v45 = vld [vmem:[#allocation4 + $0x4c0] sm:$0xff]  ;;  %v2423_v54 = vld [vmem:[#allocation4 + $0x4c8] sm:$0xff] }
0x136c   :  { %v2189_v24 = vpop.permute.xlu0 %2188  ;;  %4005 = vmatpush3.bf16.msra.mxu1 %v4004_v59  ;;  %v2569_v2 = vcombine.high %v5233_v21, %v5233_v21  ;;  %v5239_v1 = vrot.slane %v2554_v22, %v5008_v36  ;;  %v2446_v59 = vld [vmem:[#allocation4 + $0x580] sm:$0xff]  ;;  %v4052_v56 = vpack.c.bf16 %v2381_v37, %v2380_v47  ;;  %v2417_v22 = vld [vmem:[#allocation4 + $0x498] sm:$0xff]  ;;  %v2436_v27 = vld [vmem:[#allocation4 + $0x530] sm:$0xff]  ;;  %v4070_v37 = vpack.c.bf16 %v2423_v54, %v2422_v45 }
0x136d   :  { %2191 = vst.msk [vmem:[#allocation3 + $0x13] sm:$0x1] %vm1739_vm12, %v2189_v24  ;;  %4007 = vmatprep.subr.bf16.mxu1 %v4006_v14  ;;  %v2180_v43 = vpop.permute.xlu1 %2179  ;;  %v2398_v14 = vld [vmem:[#allocation4 + $0x400] sm:$0xff]  ;;  %v2437_v33 = vld [vmem:[#allocation4 + $0x538] sm:$0xff]  ;;  %v2455_v47 = vld [vmem:[#allocation4 + $0x5c8] sm:$0xff] }
0x136e   :  { %4037 = vmatpush3.bf16.msra.mxu0 %v4036_v20  ;;  %2825 = vmatprep.mubr.f32.mxu1 %v2569_v2  ;;  %2182 = vst.msk [vmem:[#allocation3 + $0x11] sm:$0x1] %vm1739_vm12, %v2180_v43  ;;  %v2570_v5 = vcombine.high %v5239_v1, %v5239_v1  ;;  %v2416_v20 = vld [vmem:[#allocation4 + $0x490] sm:$0xff]  ;;  %v4056_v2 = vpack.c.bf16 %v2399_v58, %v2398_v14  ;;  %v2438_v58 = vld [vmem:[#allocation4 + $0x540] sm:$0xff]  ;;  %v2479_v62 = vld [vmem:[#allocation4 + $0x688] sm:$0xff] }
0x136f   :  { %4039 = vmatprep.subr.bf16.mxu0 %v4038_v26  ;;  %v4086_v26 = vpack.c.bf16 %v2447_v18, %v2446_v59  ;;  %v4058_v48 = vpack.c.bf16 %v2417_v22, %v2416_v20  ;;  %v2407_v59 = vld [vmem:[#allocation4 + $0x448] sm:$0xff]  ;;  %v4100_v18 = vpack.c.bf16 %v2437_v33, %v2436_v27  ;;  %v2456_v20 = vld [vmem:[#allocation4 + $0x5d0] sm:$0xff]  ;;  %v2457_v22 = vld [vmem:[#allocation4 + $0x5d8] sm:$0xff] }
0x1370   :  { %v2214_v38 = vpop.permute.xlu0 %2213  ;;  %4009 = vmatpush3.bf16.msra.mxu1 %v4008_v40  ;;  %2895 = vmatprep.mubr.f32.mxu0 %v2570_v5  ;;  %v2448_v40 = vld [vmem:[#allocation4 + $0x590] sm:$0xff]  ;;  %v2401_v5 = vld [vmem:[#allocation4 + $0x418] sm:$0xff] }
0x1371   :  { %2216 = vst.msk [vmem:[#allocation3 + $0x17] sm:$0x1] %vm1739_vm12, %v2214_v38  ;;  %4011 = vmatprep.subr.bf16.mxu1 %v4010_v46  ;;  %v2205_v8 = vpop.permute.xlu1 %2204  ;;  %v4090_v53 = vpack.c.bf16 %v2449_v15, %v2448_v40  ;;  %v4060_v42 = vpack.c.bf16 %v2401_v5, %v2400_v25  ;;  %v4106_v40 = vpack.c.bf16 %v2457_v22, %v2456_v20  ;;  %v2440_v15 = vld [vmem:[#allocation4 + $0x550] sm:$0xff]  ;;  %v2459_v25 = vld [vmem:[#allocation4 + $0x5e8] sm:$0xff]  ;;  %v2481_v27 = vld [vmem:[#allocation4 + $0x698] sm:$0xff] }
0x1372   :  { %4041 = vmatpush3.bf16.msra.mxu0 %v4040_v9  ;;  %2207 = vst.msk [vmem:[#allocation3 + $0x15] sm:$0x1] %vm1739_vm12, %v2205_v8  ;;  %v4088_v9 = vpack.c.bf16 %v2431_v31, %v2430_v7  ;;  %v2451_v8 = vld [vmem:[#allocation4 + $0x5a8] sm:$0xff]  ;;  %v2426_v31 = vld [vmem:[#allocation4 + $0x4e0] sm:$0xff]  ;;  %v2496_v22 = vld [vmem:[#allocation4 + $0x710] sm:$0xff] }
0x1373   :  { %4043 = vmatprep.subr.bf16.mxu0 %v4042_v52 }
0x1374   :  { %v1894_v61 = vpop.permute.xlu0 %1893  ;;  %4013 = vmatpush3.bf16.msra.mxu1 %v4012_v55  ;;  %v2433_v55 = vld [vmem:[#allocation4 + $0x518] sm:$0xff] }
0x1375   :  { %1896 = vst.msk [vmem:[#allocation3 + $0x1a] sm:$0x1] %vm1739_vm12, %v1894_v61  ;;  %4015 = vmatprep.subr.bf16.mxu1 %v4014_v41  ;;  %v1885_v10 = vpop.permute.xlu1 %1884  ;;  %v4094_v61 = vpack.c.bf16 %v2451_v8, %v2450_v0  ;;  %v2460_v0 = vld [vmem:[#allocation4 + $0x5f0] sm:$0xff]  ;;  %v2461_v8 = vld [vmem:[#allocation4 + $0x5f8] sm:$0xff] }
0x1376   :  { %4045 = vmatpush3.bf16.msra.mxu0 %v4044_v60  ;;  %1887 = vst.msk [vmem:[#allocation3 + $0x18] sm:$0x1] %vm1739_vm12, %v1885_v10  ;;  %v2403_v60 = vld [vmem:[#allocation4 + $0x428] sm:$0xff]  ;;  %v2405_v10 = vld [vmem:[#allocation4 + $0x438] sm:$0xff] }
0x1377   :  { %4047 = vmatprep.subr.bf16.mxu0 %v4046_v28  ;;  %v2434_v28 = vld [vmem:[#allocation4 + $0x520] sm:$0xff]  ;;  %v4064_v19 = vpack.c.bf16 %v2403_v60, %v2402_v44  ;;  %v2413_v44 = vld [vmem:[#allocation4 + $0x478] sm:$0xff] }
0x1378   :  { %v1919_v34 = vpop.permute.xlu0 %1918  ;;  %4017 = vmatpush3.bf16.msra.mxu1 %v4016_v35  ;;  %v2452_v35 = vld [vmem:[#allocation4 + $0x5b0] sm:$0xff] }
0x1379   :  { %1921 = vst.msk [vmem:[#allocation3 + $0x1e] sm:$0x1] %vm1739_vm12, %v1919_v34  ;;  %4019 = vmatprep.subr.bf16.mxu1 %v4018_v49  ;;  %v1910_v6 = vpop.permute.xlu1 %1909  ;;  %v2268_v29 = vld [vmem:[#allocation3 + $0x10] sm:$0xff]  ;;  %v4096_v49 = vpack.c.bf16 %v2435_v17, %v2434_v28  ;;  %v4068_v34 = vpack.c.bf16 %v2405_v10, %v2404_v13  ;;  %v2445_v17 = vld [vmem:[#allocation4 + $0x578] sm:$0xff]  ;;  %v4118_v13 = vpack.c.bf16 %v2479_v62, %v2478_v12  ;;  %v2462_v10 = vld [vmem:[#allocation4 + $0x600] sm:$0xff] }
0x137a   :  { %4049 = vmatpush3.bf16.msra.mxu0 %v4048_v4  ;;  %1912 = vst.msk [vmem:[#allocation3 + $0x1c] sm:$0x1] %vm1739_vm12, %v1910_v6  ;;  %v5251_v23 = vrot.slane %v2268_v29, %v5008_v36  ;;  %v2571_v3 = vcombine.high %v2268_v29, %v2268_v29  ;;  %v2424_v6 = vld [vmem:[#allocation4 + $0x4d0] sm:$0xff]  ;;  %v2439_v29 = vld [vmem:[#allocation4 + $0x548] sm:$0xff] }
0x137b   :  { %4051 = vmatprep.subr.bf16.mxu0 %v4050_v32  ;;  %v2454_v32 = vld [vmem:[#allocation4 + $0x5c0] sm:$0xff]  ;;  %v4104_v7 = vpack.c.bf16 %v2439_v29, %v2438_v58  ;;  %v2444_v28 = vld [vmem:[#allocation4 + $0x570] sm:$0xff] }
0x137c   :  { %v2238_v24 = vpop.permute.xlu0 %2237  ;;  %4021 = vmatpush3.bf16.msra.mxu1 %v4020_v63  ;;  %v2586_v39 = vcombine.high %v5251_v23, %v5251_v23  ;;  %v5257_v43 = vrot.slane %v2571_v3, %v5008_v36  ;;  %v2406_v63 = vld [vmem:[#allocation4 + $0x440] sm:$0xff]  ;;  %v4102_v14 = vpack.c.bf16 %v2455_v47, %v2454_v32  ;;  %v4116_v45 = vpack.c.bf16 %v2445_v17, %v2444_v28  ;;  %v2495_v32 = vld [vmem:[#allocation4 + $0x708] sm:$0xff]  ;;  %v2488_v62 = vld [vmem:[#allocation4 + $0x6d0] sm:$0xff] }
0x137d   :  { %2240 = vst.msk [vmem:[#allocation3 + $0x1b] sm:$0x1] %vm1739_vm12, %v2238_v24  ;;  %4055 = vmatprep.subr.bf16.mxu1 %v4054_v11  ;;  %v2229_v46 = vpop.permute.xlu1 %2228  ;;  %v2425_v11 = vld [vmem:[#allocation4 + $0x4d8] sm:$0xff]  ;;  %v2408_v24 = vld [vmem:[#allocation4 + $0x450] sm:$0xff]  ;;  %v2482_v29 = vld [vmem:[#allocation4 + $0x6a0] sm:$0xff] }
0x137e   :  { %4053 = vmatpush3.bf16.msra.mxu0 %v4052_v56  ;;  %2231 = vst.msk [vmem:[#allocation3 + $0x19] sm:$0x1] %vm1739_vm12, %v2229_v46  ;;  %v2587_v38 = vcombine.high %v5257_v43, %v5257_v43  ;;  %v4072_v56 = vpack.c.bf16 %v2407_v59, %v2406_v63  ;;  %v4074_v3 = vpack.c.bf16 %v2425_v11, %v2424_v6  ;;  %v2512_v63 = vld [vmem:[#allocation4 + $0x790] sm:$0xff]  ;;  %v2513_v59 = vld [vmem:[#allocation4 + $0x798] sm:$0xff]  ;;  %v2502_v17 = vld [vmem:[#allocation4 + $0x740] sm:$0xff] }
0x137f   :  { %2826 = vmatmul.mubr.f32.vlgmr.msra.gmra.mrb[22].mxu1 %v5233_v21  ;;  %4087 = vmatprep.subr.bf16.mxu0 %v4086_v26  ;;  %v4092_v21 = vpack.c.bf16 %v2433_v55, %v2432_v57  ;;  %v2409_v26 = vld [vmem:[#allocation4 + $0x458] sm:$0xff]  ;;  %v2442_v57 = vld [vmem:[#allocation4 + $0x560] sm:$0xff]  ;;  %v2443_v55 = vld [vmem:[#allocation4 + $0x568] sm:$0xff]  ;;  %v4154_v20 = vpack.c.bf16 %v2513_v59, %v2512_v63 }
0x1380   :  { %v2263_v52 = vpop.permute.xlu0 %2262  ;;  %4057 = vmatpush3.bf16.msra.mxu1 %v4056_v2  ;;  %2965 = vmatprep.mubr.f32.mxu1 %v2586_v39  ;;  %v2427_v2 = vld [vmem:[#allocation4 + $0x4e8] sm:$0xff]  ;;  %v2441_v39 = vld [vmem:[#allocation4 + $0x558] sm:$0xff]  ;;  %v4076_v46 = vpack.c.bf16 %v2409_v26, %v2408_v24  ;;  %v2464_v6 = vld [vmem:[#allocation4 + $0x610] sm:$0xff] }
0x1381   :  { %2265 = vst.msk [vmem:[#allocation3 + $0x1f] sm:$0x1] %vm1739_vm12, %v2263_v52  ;;  %2896 = vmatmul.mubr.f32.vlgmr.msra.gmra.mrb[22].mxu0 %v5239_v1  ;;  %4059 = vmatprep.subr.bf16.mxu1 %v4058_v48  ;;  %v2254_v41 = vpop.permute.xlu1 %2253  ;;  %v2453_v1 = vld [vmem:[#allocation4 + $0x5b8] sm:$0xff]  ;;  %v2458_v48 = vld [vmem:[#allocation4 + $0x5e0] sm:$0xff]  ;;  %v4078_v5 = vpack.c.bf16 %v2427_v2, %v2426_v31  ;;  %v4108_v51 = vpack.c.bf16 %v2441_v39, %v2440_v15  ;;  %v2484_v15 = vld [vmem:[#allocation4 + $0x6b0] sm:$0xff] }
0x1382   :  { %4089 = vmatpush3.bf16.msra.mxu0 %v4088_v9  ;;  %2256 = vst.msk [vmem:[#allocation3 + $0x1d] sm:$0x1] %vm1739_vm12, %v2254_v41  ;;  %3035 = vmatprep.mubr.f32.mxu0 %v2587_v38  ;;  %v4098_v4 = vpack.c.bf16 %v2453_v1, %v2452_v35  ;;  %v2410_v9 = vld [vmem:[#allocation4 + $0x460] sm:$0xff]  ;;  %v2428_v38 = vld [vmem:[#allocation4 + $0x4f0] sm:$0xff]  ;;  %v2429_v52 = vld [vmem:[#allocation4 + $0x4f8] sm:$0xff] }
0x1383   :  { %4091 = vmatprep.subr.bf16.mxu0 %v4090_v53  ;;  %v4110_v53 = vpack.c.bf16 %v2459_v25, %v2458_v48  ;;  %v4082_v41 = vpack.c.bf16 %v2429_v52, %v2428_v38  ;;  %v2510_v35 = vld [vmem:[#allocation4 + $0x780] sm:$0xff]  ;;  %v2511_v1 = vld [vmem:[#allocation4 + $0x788] sm:$0xff]  ;;  %v2465_v11 = vld [vmem:[#allocation4 + $0x618] sm:$0xff] }
0x1384   :  { %4061 = vmatpush3.bf16.msra.mxu1 %v4060_v42  ;;  %v4080_v42 = vpack.c.bf16 %v2411_v50, %v2410_v9  ;;  %v4150_v33 = vpack.c.bf16 %v2511_v1, %v2510_v35  ;;  %v4124_v24 = vpack.c.bf16 %v2465_v11, %v2464_v6  ;;  %v2514_v26 = vld [vmem:[#allocation4 + $0x7a0] sm:$0xff]  ;;  %v2485_v39 = vld [vmem:[#allocation4 + $0x6b8] sm:$0xff]  ;;  %v2499_v25 = vld [vmem:[#allocation4 + $0x728] sm:$0xff] }
0x1385   :  { %4063 = vmatprep.subr.bf16.mxu1 %v4062_v16  ;;  %v2412_v16 = vld [vmem:[#allocation4 + $0x470] sm:$0xff]  ;;  %v2466_v2 = vld [vmem:[#allocation4 + $0x620] sm:$0xff]  ;;  %v2517_v50 = vld [vmem:[#allocation4 + $0x7b8] sm:$0xff] }
0x1386   :  { %4093 = vmatpush3.bf16.msra.mxu0 %v4092_v21  ;;  %v4112_v21 = vpack.c.bf16 %v2443_v55, %v2442_v57  ;;  %v2498_v48 = vld [vmem:[#allocation4 + $0x720] sm:$0xff]  ;;  %v2516_v9 = vld [vmem:[#allocation4 + $0x7b0] sm:$0xff]  ;;  %v2469_v38 = vld [vmem:[#allocation4 + $0x638] sm:$0xff] }
0x1387   :  { %4095 = vmatprep.subr.bf16.mxu0 %v4094_v61  ;;  %v4114_v61 = vpack.c.bf16 %v2461_v8, %v2460_v0  ;;  %v4160_v52 = vpack.c.bf16 %v2499_v25, %v2498_v48  ;;  %v2487_v57 = vld [vmem:[#allocation4 + $0x6c8] sm:$0xff]  ;;  %v4162_v55 = vpack.c.bf16 %v2517_v50, %v2516_v9  ;;  %v2501_v0 = vld [vmem:[#allocation4 + $0x738] sm:$0xff]  ;;  %v2520_v1 = vld [vmem:[#allocation4 + $0x7d0] sm:$0xff] }
0x1388   :  { %4065 = vmatpush3.bf16.msra.mxu1 %v4064_v19  ;;  %v4084_v19 = vpack.c.bf16 %v2413_v44, %v2412_v16  ;;  %v2519_v16 = vld [vmem:[#allocation4 + $0x7c8] sm:$0xff]  ;;  %v2522_v63 = vld [vmem:[#allocation4 + $0x7e0] sm:$0xff]  ;;  %v3267_v25 = vld [vmem:[%s5304_s9] ss:$0 sm:$0xff]  ;;  %s4361_s9 = smov [#allocation7]  }
0x1389   :  { %4067 = vmatprep.subr.bf16.mxu1 %v4066_v30  ;;  %v2269_v60 = vld [vmem:[#allocation3 + $0x18] sm:$0xff]  ;;  %v2523_v59 = vld [vmem:[#allocation4 + $0x7e8] sm:$0xff]  ;;  %v2474_v6 = vld [vmem:[#allocation4 + $0x660] sm:$0xff]  ;;  %s3188_s0 = sshll.u32 %s4361_s9, 4  ;;  %s3189_s0 = int_to_ptr.vmem [resolvable:$true] %s3188_s0 }
0x138a   :  { %4097 = vmatpush3.bf16.msra.mxu0 %v4096_v49  ;;  %v2588_v30 = vcombine.high %v2269_v60, %v2269_v60  ;;  %v2463_v49 = vld [vmem:[#allocation4 + $0x608] sm:$0xff]  ;;  %v5267_v54 = vrot.slane %v2269_v60, %v5008_v36  ;;  %v2470_v60 = vld [vmem:[#allocation4 + $0x640] sm:$0xff]  ;;  %s4329_s2 = scalar_lea.vmem %s3189_s0, 32  ;;  %p4334_p9 = scmp.lt.s32.totalorder %s3189_s0, %s3189_s0 }
0x138b   :  { %4099 = vmatprep.subr.bf16.mxu0 %v4098_v4  ;;  %v2480_v4 = vld [vmem:[#allocation4 + $0x690] sm:$0xff]  ;;  %v4120_v47 = vpack.c.bf16 %v2463_v49, %v2462_v10  ;;  %v2473_v49 = vld [vmem:[#allocation4 + $0x658] sm:$0xff]  ;;  %v2475_v11 = vld [vmem:[#allocation4 + $0x668] sm:$0xff]  ;;  %p4330_p8 = scmp.ne.s32.totalorder %s3189_s0, %s4329_s2  ;;  %p4335_p10 = scmp.lt.s32.totalorder %s4329_s2, %s4329_s2 }
0x138c   :  { %4069 = vmatpush3.bf16.msra.mxu1 %v4068_v34  ;;  %v2494_v34 = vld [vmem:[#allocation4 + $0x700] sm:$0xff]  ;;  %v2472_v10 = vld [vmem:[#allocation4 + $0x650] sm:$0xff] }
0x138d   :  { %4071 = vmatprep.subr.bf16.mxu1 %v4070_v37  ;;  %v5270_v37 = vrot.slane %v2588_v30, %v5008_v36  ;;  %v4152_v58 = vpack.c.bf16 %v2495_v32, %v2494_v34  ;;  %v2497_v36 = vld [vmem:[#allocation4 + $0x718] sm:$0xff]  ;;  %v2504_v34 = vld [vmem:[#allocation4 + $0x750] sm:$0xff]  ;;  %p4336_p11 = por %p4335_p10, %p4334_p9 }
0x138e   :  { %4101 = vmatpush3.bf16.msra.mxu0 %v4100_v18  ;;  %v4122_v18 = vpack.c.bf16 %v2481_v27, %v2480_v4  ;;  %v2521_v30 = vld [vmem:[#allocation4 + $0x7d8] sm:$0xff]  ;;  %v2490_v4 = vld [vmem:[#allocation4 + $0x6e0] sm:$0xff]  ;;  %v2491_v27 = vld [vmem:[#allocation4 + $0x6e8] sm:$0xff] }
0x138f   :  { %4103 = vmatprep.subr.bf16.mxu0 %v4102_v14  ;;  %v2603_v14 = vcombine.high %v5267_v54, %v5267_v54  ;;  %v2505_v32 = vld [vmem:[#allocation4 + $0x758] sm:$0xff]  ;;  %p4337_p12 = pnand %p4336_p11, %p4330_p8 }
0x1390   :  { %4073 = vmatpush3.bf16.msra.mxu1 %v4072_v56  ;;  %v2483_v56 = vld [vmem:[#allocation4 + $0x6a8] sm:$0xff] }
0x1391   :  { %4075 = vmatprep.subr.bf16.mxu1 %v4074_v3  ;;  %v2604_v3 = vcombine.high %v5270_v37, %v5270_v37  ;;  %v4126_v31 = vpack.c.bf16 %v2483_v56, %v2482_v29  ;;  %v2493_v29 = vld [vmem:[#allocation4 + $0x6f8] sm:$0xff]  ;;  %v4174_v56 = vpack.c.bf16 %v2523_v59, %v2522_v63 }
0x1392   :  { %4105 = vmatpush3.bf16.msra.mxu0 %v4104_v7  ;;  %v2515_v7 = vld [vmem:[#allocation4 + $0x7a8] sm:$0xff] }
0x1393   :  { %4107 = vmatprep.subr.bf16.mxu0 %v4106_v40  ;;  %v2467_v40 = vld [vmem:[#allocation4 + $0x628] sm:$0xff] }
0x1394   :  { %4077 = vmatpush3.bf16.msra.mxu1 %v4076_v46  ;;  %v4158_v46 = vpack.c.bf16 %v2515_v7, %v2514_v26  ;;  %v2476_v7 = vld [vmem:[#allocation4 + $0x670] sm:$0xff] }
0x1395   :  { %4079 = vmatprep.subr.bf16.mxu1 %v4078_v5  ;;  %v4128_v5 = vpack.c.bf16 %v2467_v40, %v2466_v2 }
0x1396   :  { %4109 = vmatpush3.bf16.msra.mxu0 %v4108_v51  ;;  %v4130_v51 = vpack.c.bf16 %v2485_v39, %v2484_v15  ;;  %v2509_v15 = vld [vmem:[#allocation4 + $0x778] sm:$0xff] }
0x1397   :  { %4111 = vmatprep.subr.bf16.mxu0 %v4110_v53  ;;  %v2486_v53 = vld [vmem:[#allocation4 + $0x6c0] sm:$0xff] }
0x1398   :  { %4081 = vmatpush3.bf16.msra.mxu1 %v4080_v42  ;;  %v2500_v42 = vld [vmem:[#allocation4 + $0x730] sm:$0xff]  ;;  %v4134_v44 = vpack.c.bf16 %v2487_v57, %v2486_v53 }
0x1399   :  { %4083 = vmatprep.subr.bf16.mxu1 %v4082_v41  ;;  %v2518_v41 = vld [vmem:[#allocation4 + $0x7c0] sm:$0xff]  ;;  %v4164_v12 = vpack.c.bf16 %v2501_v0, %v2500_v42 }
0x139a   :  { %4113 = vmatpush3.bf16.msra.mxu0 %v4112_v21  ;;  %v2471_v21 = vld [vmem:[#allocation4 + $0x648] sm:$0xff]  ;;  %v4166_v28 = vpack.c.bf16 %v2519_v16, %v2518_v41 }
0x139b   :  { %4115 = vmatprep.subr.bf16.mxu0 %v4114_v61  ;;  %v2489_v61 = vld [vmem:[#allocation4 + $0x6d8] sm:$0xff]  ;;  %v4136_v35 = vpack.c.bf16 %v2471_v21, %v2470_v60 }
0x139c   :  { %4085 = vmatpush3.bf16.msra.mxu1 %v4084_v19  ;;  %v2503_v19 = vld [vmem:[#allocation4 + $0x748] sm:$0xff] }
0x139d   :  { %4119 = vmatprep.subr.bf16.mxu1 %v4118_v13  ;;  %v4138_v13 = vpack.c.bf16 %v2489_v61, %v2488_v62 }
0x139e   :  { %4117 = vmatpush3.bf16.msra.mxu0 %v4116_v45  ;;  %v4168_v45 = vpack.c.bf16 %v2503_v19, %v2502_v17 }
0x139f   :  { %2966 = vmatmul.mubr.f32.vlgmr.msra.gmra.mrb[24].mxu1 %v5251_v23  ;;  %4151 = vmatprep.subr.bf16.mxu0 %v4150_v33  ;;  %v4156_v23 = vpack.c.bf16 %v2497_v36, %v2496_v22  ;;  %v4170_v33 = vpack.c.bf16 %v2521_v30, %v2520_v1  ;;  %v2507_v22 = vld [vmem:[#allocation4 + $0x768] sm:$0xff]  ;;  %v4144_v36 = vpack.c.bf16 %v2475_v11, %v2474_v6 }
0x13a0   :  { %4121 = vmatpush3.bf16.msra.mxu1 %v4120_v47  ;;  %3105 = vmatprep.mubr.f32.mxu1 %v2603_v14  ;;  %v4140_v47 = vpack.c.bf16 %v2473_v49, %v2472_v10  ;;  %v4172_v14 = vpack.c.bf16 %v2505_v32, %v2504_v34 }
0x13a1   :  { %3036 = vmatmul.mubr.f32.vlgmr.msra.gmra.mrb[24].mxu0 %v5257_v43  ;;  %4123 = vmatprep.subr.bf16.mxu1 %v4122_v18  ;;  %v2468_v43 = vld [vmem:[#allocation4 + $0x630] sm:$0xff]  ;;  %v4142_v18 = vpack.c.bf16 %v2491_v27, %v2490_v4 }
0x13a2   :  { %4153 = vmatpush3.bf16.msra.mxu0 %v4152_v58  ;;  %3175 = vmatprep.mubr.f32.mxu0 %v2604_v3  ;;  %v4132_v8 = vpack.c.bf16 %v2469_v38, %v2468_v43  ;;  %v2492_v58 = vld [vmem:[#allocation4 + $0x6f0] sm:$0xff] }
0x13a3   :  { %4155 = vmatprep.subr.bf16.mxu0 %v4154_v20  ;;  %v2506_v20 = vld [vmem:[#allocation4 + $0x760] sm:$0xff]  ;;  %v2524_v3 = vld [vmem:[#allocation4 + $0x7f0] sm:$0xff]  ;;  %v4146_v26 = vpack.c.bf16 %v2493_v29, %v2492_v58 }
0x13a4   :  { %4125 = vmatpush3.bf16.msra.mxu1 %v4124_v24  ;;  %v2525_v24 = vld [vmem:[#allocation4 + $0x7f8] sm:$0xff]  ;;  %v4176_v2 = vpack.c.bf16 %v2507_v22, %v2506_v20 }
0x13a5   :  { %4127 = vmatprep.subr.bf16.mxu1 %v4126_v31  ;;  %v2477_v31 = vld [vmem:[#allocation4 + $0x678] sm:$0xff]  ;;  %v4178_v40 = vpack.c.bf16 %v2525_v24, %v2524_v3 }
0x13a6   :  { %4157 = vmatpush3.bf16.msra.mxu0 %v4156_v23  ;;  %v2508_v23 = vld [vmem:[#allocation4 + $0x770] sm:$0xff]  ;;  %v4148_v39 = vpack.c.bf16 %v2477_v31, %v2476_v7 }
0x13a7   :  { %4159 = vmatprep.subr.bf16.mxu0 %v4158_v46  ;;  %v4180_v46 = vpack.c.bf16 %v2509_v15, %v2508_v23 }
0x13a8   :  { %4129 = vmatpush3.bf16.msra.mxu1 %v4128_v5 }
0x13a9   :  { %4131 = vmatprep.subr.bf16.mxu1 %v4130_v51 }
0x13aa   :  { %4161 = vmatpush3.bf16.msra.mxu0 %v4160_v52 }
0x13ab   :  { %4163 = vmatprep.subr.bf16.mxu0 %v4162_v55 }
0x13ac   :  { %4133 = vmatpush3.bf16.msra.mxu1 %v4132_v8 }
0x13ad   :  { %4135 = vmatprep.subr.bf16.mxu1 %v4134_v44 }
0x13ae   :  { %4165 = vmatpush3.bf16.msra.mxu0 %v4164_v12 }
0x13af   :  { %4167 = vmatprep.subr.bf16.mxu0 %v4166_v28 }
0x13b0   :  { %4137 = vmatpush3.bf16.msra.mxu1 %v4136_v35 }
0x13b1   :  { %4139 = vmatprep.subr.bf16.mxu1 %v4138_v13 }
0x13b2   :  { %4169 = vmatpush3.bf16.msra.mxu0 %v4168_v45 }
0x13b3   :  { %4171 = vmatprep.subr.bf16.mxu0 %v4170_v33 }
0x13b4   :  { %4141 = vmatpush3.bf16.msra.mxu1 %v4140_v47 }
0x13b5   :  { %4143 = vmatprep.subr.bf16.mxu1 %v4142_v18 }
0x13b6   :  { %4173 = vmatpush3.bf16.msra.mxu0 %v4172_v14 }
0x13b7   :  { %4175 = vmatprep.subr.bf16.mxu0 %v4174_v56 }
0x13b8   :  { %4145 = vmatpush3.bf16.msra.mxu1 %v4144_v36 }
0x13b9   :  { %4147 = vmatprep.subr.bf16.mxu1 %v4146_v26 }
0x13ba   :  { %4177 = vmatpush3.bf16.msra.mxu0 %v4176_v2 }
0x13bb   :  { %4179 = vmatprep.subr.bf16.mxu0 %v4178_v40 }
0x13bc   :  { %4149 = vmatpush3.bf16.msra.mxu1 %v4148_v39 }
0x13be   :  { %4181 = vmatpush3.bf16.msra.mxu0 %v4180_v46 }
0x13bf   :  { %3106 = vmatmul.mubr.f32.vlgmr.msra.gmra.mrb[26].mxu1 %v5267_v54 }
0x13c1   :  { %3176 = vmatmul.mubr.f32.vlgmr.msra.gmra.mrb[26].mxu0 %v5270_v37 }
0x1432   :  { %v3376_v48 = vpop.f32.mrb[20].mxu1 }
0x1433   :  { %v3377_v5 = vpop.f32.mrb[21].mxu1 }
0x1434   :  { %v3378_v9 = vadd.f32 %v3377_v5, %v3376_v48  ;;  %v3411_v50 = vpop.f32.mrb[20].mxu0 }
0x1435   :  { %v3412_v51 = vpop.f32.mrb[21].mxu0 }
0x1436   :  { %v2688_v43 = vadd.f32 %v3378_v9, %v3267_v25  ;;  %v3413_v38 = vadd.f32 %v3412_v51, %v3411_v50 }
0x1438   :  { %v2758_v52 = vadd.f32 %v3413_v38, %v2688_v43 }
0x1452   :  { %v3446_v53 = vpop.f32.mrb[22].mxu1 }
0x1453   :  { %v3447_v57 = vpop.f32.mrb[23].mxu1 }
0x1454   :  { %v3448_v55 = vadd.f32 %v3447_v57, %v3446_v53  ;;  %v3481_v42 = vpop.f32.mrb[22].mxu0 }
0x1455   :  { %v3482_v0 = vpop.f32.mrb[23].mxu0 }
0x1456   :  { %v2828_v54 = vadd.f32 %v3448_v55, %v2758_v52  ;;  %v3483_v8 = vadd.f32 %v3482_v0, %v3481_v42 }
0x1458   :  { %v2898_v37 = vadd.f32 %v3483_v8, %v2828_v54 }
0x1472   :  { %v3516_v41 = vpop.f32.mrb[24].mxu1 }
0x1473   :  { %v3517_v16 = vpop.f32.mrb[25].mxu1 }
0x1474   :  { %v3518_v44 = vadd.f32 %v3517_v16, %v3516_v41  ;;  %v3551_v60 = vpop.f32.mrb[24].mxu0 }
0x1475   :  { %v3552_v21 = vpop.f32.mrb[25].mxu0 }
0x1476   :  { %v2968_v12 = vadd.f32 %v3518_v44, %v2898_v37  ;;  %v3553_v62 = vadd.f32 %v3552_v21, %v3551_v60 }
0x1478   :  { %v3038_v61 = vadd.f32 %v3553_v62, %v2968_v12 }
0x1492   :  { %v3586_v28 = vpop.f32.mrb[26].mxu1 }
0x1493   :  { %v3587_v17 = vpop.f32.mrb[27].mxu1 }
0x1494   :  { %v3588_v19 = vadd.f32 %v3587_v17, %v3586_v28  ;;  %v3621_v35 = vpop.f32.mrb[26].mxu0 }
0x1495   :  { %v3622_v1 = vpop.f32.mrb[27].mxu0 }
0x1496   :  { %v3108_v30 = vadd.f32 %v3588_v19, %v3038_v61  ;;  %v3623_v13 = vadd.f32 %v3622_v1, %v3621_v35 }
0x1498   :  { %v3178_v10 = vadd.f32 %v3623_v13, %v3108_v30 }
0x149a   :  { %3181 = vst [vmem:[#allocation7] sm:$0x3] %v3178_v10 }
0x149b   :  { %4340 = shalt.err (!%p4337_p12)
}
0x149c   :  { %s4341_s17 = scalar_lea.hbm %s5305_s10, 32 }
0x149d   :  { %p4342_p13 = scmp.ne.s32.totalorder %s5305_s10, %s4341_s17  ;;  %p4345_p0 = scmp.lt.u32.totalorder %s4341_s17, %s5305_s10 }
0x149f   :  { %p4347_p1 = pnand %p4345_p0, %p4342_p13 }
0x14a1   :  { %4350 = shalt.err (!%p4347_p1)
}
0x14a2   :  { %3191 = dma.vmem_to_hbm [thread:$0]  %s3189_s0, 32, %s5305_s10, [#allocation6]  }
0x14a3   :  { %4353 = dma.done.wait [#allocation6], 32  }
0x14a4   :  { %4354 = vsyncadd [#allocation6], 4294967264 }
0x14a5   :  { %3195 = vsyncpa [#allocation5], 1 }
0x14a6   :  { %3196 = vsyncpa [#allocation6], 1 }

</bundles_post_ra>
